<compile_context>
chip_gen: v7x
topology: tpu7x:2x2x1
jax: 0.10.0
libtpu: 0.0.40
codegen_flags: <defaults>
</compile_context>

<pallas_src>
import functools

import jax
import jax.numpy as jnp
from jax import lax
from jax.experimental import pallas as pl
from jax.experimental.pallas import tpu as pltpu

MAX_LENGTH = 10
SOS_TOKEN = 0


def _log_softmax(logits):
    m = jnp.max(logits, axis=-1, keepdims=True)
    s = logits - m
    return s - jnp.log(jnp.sum(jnp.exp(s), axis=-1, keepdims=True))


def _decoder_kernel(B, S, H, NO,
                    enc_ref, h0_ref, ua_w_ref, ua_b_ref,
                    w_h_ref, b_h_ref, va_w_ref, va_b_ref,
                    emb_wih_ref, w_ih_c_ref, b_ih_ref,
                    w_o_ref, b_o_ref,
                    logp_ref, attn_ref, hout_ref):
    # ---- prologue: loop-invariant work, done once ----
    keys = enc_ref[...]                                            # (B, S, H)
    # Ua(keys) + b_ua in-kernel (one dot over keys already in VMEM).
    ua_k = (jnp.dot(keys.reshape(B * S, H), ua_w_ref[...],
                    preferred_element_type=jnp.float32)
            + ua_b_ref[...]).reshape(B, S, H)                      # (B, S, H)
    va_row = va_w_ref[...]                                         # (1, H)
    va_b = va_b_ref[...]                                           # (1, 1)

    h = h0_ref[...]                                                # (B, H)
    iota_no = lax.broadcasted_iota(jnp.int32, (B, NO), 1)
    onehot = (iota_no == SOS_TOKEN).astype(jnp.float32)            # SOS start

    logp_steps = []
    attn_steps = []

    # Fully unrolled greedy decode (MAX_LENGTH small steps).
    for step in range(MAX_LENGTH):
        # Fused h-projections: [Wa | W_hh | W_o](h) in a single MXU push.
        # (weights re-read from VMEM refs each step to keep vreg pressure low)
        hz = (jnp.dot(h, w_h_ref[...], preferred_element_type=jnp.float32)
              + b_h_ref[...])                                      # (B, 256)
        wa_q = hz[:, :H]                                           # (B, H)
        h_r = hz[:, H:2 * H]
        h_z = hz[:, 2 * H:3 * H]
        h_n = hz[:, 3 * H:4 * H]

        # Logits for step-1 piggyback on this matmul (h here == h_{step}).
        # Greedy feedback branch is off the attention critical path.
        if step > 0:
            logits_prev = hz[:, 4 * H:4 * H + NO]                  # (B, NO)
            logp_steps.append(_log_softmax(logits_prev))
            mx = jnp.max(logits_prev, axis=-1, keepdims=True)
            idx = jnp.min(jnp.where(logits_prev >= mx, iota_no, NO),
                          axis=-1, keepdims=True)                  # first argmax
            onehot = (iota_no == idx).astype(jnp.float32)

        # ---- Bahdanau attention: Va(tanh(Wa(q) + Ua(keys))) ----
        t = jnp.tanh(wa_q[:, None, :] + ua_k)                      # (B, S, H)
        # Va as VPU multiply + lane reduce (avoid N=1 MXU matmul).
        scores = jnp.sum(t * va_row, axis=-1) + va_b               # (B, S)
        scores = scores - jnp.max(scores, axis=-1, keepdims=True)
        e = jnp.exp(scores)
        # Exact reciprocal so stored attention weights sum to 1 exactly.
        attn_w = e / jnp.sum(e, axis=-1, keepdims=True)            # (B, S)
        attn_steps.append(attn_w)
        context = jnp.sum(attn_w[:, :, None] * keys, axis=1)       # (B, H)

        # ---- GRU cell (PyTorch gate order r,z,n); embedding lookup fused ----
        # TODO(synk): nn.Dropout(p=0.1) omitted (eval-mode identity).
        gi = (jnp.dot(onehot, emb_wih_ref[...],
                      preferred_element_type=jnp.float32)
              + jnp.dot(context, w_ih_c_ref[...],
                        preferred_element_type=jnp.float32)
              + b_ih_ref[...])                                     # (B, 3H)
        i_r, i_z, i_n = gi[:, :H], gi[:, H:2 * H], gi[:, 2 * H:]
        r = jax.nn.sigmoid(i_r + h_r)
        z = jax.nn.sigmoid(i_z + h_z)
        n = jnp.tanh(i_n + r * h_n)                # h_n already includes b_hn
        h = (1.0 - z) * n + z * h                                  # (B, H)

    # ---- epilogue: logits for the final step need one extra dot ----
    logits_last = (jnp.dot(h, w_o_ref[...], preferred_element_type=jnp.float32)
                   + b_o_ref[...])
    logp_steps.append(_log_softmax(logits_last))

    # ---- single lane-dense stores for all steps ----
    logp_ref[...] = jnp.concatenate(logp_steps, axis=-1)           # (B, L*NO)
    attn_ref[...] = jnp.concatenate(attn_steps, axis=-1)           # (B, L*S)
    hout_ref[...] = h


def attention_decoder_forward(encoder_outputs, encoder_hidden, params):
    """encoder_outputs: (B, S, H) f32, encoder_hidden: (1, B, H) f32.

    Returns (decoder_outputs (B, MAX_LENGTH, n_output) log-probs,
             decoder_hidden (1, B, H),
             attentions (B, MAX_LENGTH, S)) — same as the PyTorch module with
             target_tensor=None (greedy decoding, eval mode).
    """
    B, S, H = encoder_outputs.shape
    NO = params["emb"].shape[0]
    h0 = encoder_hidden[0]                                         # (B, H)

    # ---- weight packing (cheap, one-time, plain XLA) ----
    w_ih_e = params["w_ih"][:H]                                    # (H, 3H)
    w_ih_c = params["w_ih"][H:]                                    # (H, 3H)
    # Fuse embedding table into the GRU input projection: (NO, 3H).
    emb_wih = jnp.dot(params["emb"], w_ih_e)
    # Fused h-projection [Wa | W_hh | W_o], zero-padded to a 128-lane multiple.
    w_h_ext = jnp.concatenate([params["wa_w"], params["w_hh"], params["w_o"]],
                              axis=1)                              # (H, 4H+NO)
    b_h_ext = jnp.concatenate([params["wa_b"], params["b_hh"], params["b_o"]],
                              axis=1)                              # (1, 4H+NO)
    packw_raw = 4 * H + NO
    packw = ((packw_raw + 127) // 128) * 128
    if packw > packw_raw:
        w_h_ext = jnp.pad(w_h_ext, ((0, 0), (0, packw - packw_raw)))
        b_h_ext = jnp.pad(b_h_ext, ((0, 0), (0, packw - packw_raw)))
    va_row = params["va_w"].reshape(1, H)

    kernel = functools.partial(_decoder_kernel, B, S, H, NO)

    # No grid: whole decode is one invocation; plain full-array VMEM specs
    # (no unused double-buffering).
    vmem = functools.partial(pl.BlockSpec, memory_space=pltpu.MemorySpace.VMEM)

    logp_flat, attn_flat, h_final = pl.pallas_call(
        kernel,
        out_shape=(
            jax.ShapeDtypeStruct((B, MAX_LENGTH * NO), jnp.float32),
            jax.ShapeDtypeStruct((B, MAX_LENGTH * S), jnp.float32),
            jax.ShapeDtypeStruct((B, H), jnp.float32),
        ),
        in_specs=[vmem() for _ in range(13)],
        out_specs=(vmem(), vmem(), vmem()),
    )(
        encoder_outputs, h0,
        params["ua_w"], params["ua_b"],
        w_h_ext, b_h_ext,
        va_row, params["va_b"],
        emb_wih, w_ih_c, params["b_ih"],
        params["w_o"], params["b_o"],
    )

    decoder_outputs = logp_flat.reshape(B, MAX_LENGTH, NO)         # batch-first
    attentions = attn_flat.reshape(B, MAX_LENGTH, S)
    decoder_hidden = h_final[None]                                 # (1, B, H)
    return decoder_outputs, decoder_hidden, attentions


def init_params(key, n_hidden, n_output):
    ks = jax.random.split(key, 12)
    scale = 0.1

    def rnd(k, shape):
        return jax.random.normal(k, shape, jnp.float32) * scale

    H, NO = n_hidden, n_output
    return {
        "emb":  rnd(ks[0], (NO, H)),
        "wa_w": rnd(ks[1], (H, H)),
        "wa_b": rnd(ks[2], (1, H)),
        "ua_w": rnd(ks[3], (H, H)),
        "ua_b": rnd(ks[4], (1, H)),
        "va_w": rnd(ks[5], (H, 1)),
        "va_b": rnd(ks[6], (1, 1)),
        "w_ih": rnd(ks[7], (2 * H, 3 * H)),   # (in, out), gate order r,z,n
        "b_ih": rnd(ks[8], (1, 3 * H)),
        "w_hh": rnd(ks[9], (H, 3 * H)),
        "b_hh": rnd(ks[10], (1, 3 * H)),
        "w_o":  rnd(ks[11], (H, NO)),
        "b_o":  jnp.zeros((1, NO), jnp.float32),
    }


if __name__ == "__main__":
    B, S, H, NO = 2, MAX_LENGTH, 32, 16
    key = jax.random.PRNGKey(0)
    k_enc, k_hid, k_par = jax.random.split(key, 3)

    encoder_outputs = jax.random.normal(k_enc, (B, S, H), jnp.float32)
    encoder_hidden = jax.random.normal(k_hid, (1, B, H), jnp.float32)
    params = init_params(k_par, H, NO)

    dec_out, dec_hidden, attns = attention_decoder_forward(
        encoder_outputs, encoder_hidden, params)
    jax.block_until_ready((dec_out, dec_hidden, attns))

    assert dec_out.shape == (B, MAX_LENGTH, NO)
    assert dec_hidden.shape == (1, B, H)
    assert attns.shape == (B, MAX_LENGTH, S)
    # Sanity: attention weights and softmax probabilities normalize.
    assert bool(jnp.allclose(attns.sum(-1), 1.0, atol=1e-3))
    assert bool(jnp.allclose(jnp.exp(dec_out).sum(-1), 1.0, atol=1e-3))
    print("KERNEL_OK")
</pallas_src>

<mosaic_0001>
module attributes {stable_mosaic.version = 11 : i64} {
  func.func @_decoder_kernel(%arg0: memref<2x10x32xf32, #tpu.memory_space<vmem>>, %arg1: memref<2x32xf32, #tpu.memory_space<vmem>>, %arg2: memref<32x32xf32, #tpu.memory_space<vmem>>, %arg3: memref<1x32xf32, #tpu.memory_space<vmem>>, %arg4: memref<32x256xf32, #tpu.memory_space<vmem>>, %arg5: memref<1x256xf32, #tpu.memory_space<vmem>>, %arg6: memref<1x32xf32, #tpu.memory_space<vmem>>, %arg7: memref<1x1xf32, #tpu.memory_space<vmem>>, %arg8: memref<16x96xf32, #tpu.memory_space<vmem>>, %arg9: memref<32x96xf32, #tpu.memory_space<vmem>>, %arg10: memref<1x96xf32, #tpu.memory_space<vmem>>, %arg11: memref<32x16xf32, #tpu.memory_space<vmem>>, %arg12: memref<1x16xf32, #tpu.memory_space<vmem>>, %arg13: memref<2x160xf32, #tpu.memory_space<vmem>>, %arg14: memref<2x100xf32, #tpu.memory_space<vmem>>, %arg15: memref<2x32xf32, #tpu.memory_space<vmem>>) attributes {dimension_semantics = [], scalar_prefetch = 0 : i64, scratch_operands = 0 : i64, tpu.core_type = #tpu.core_type<tc>} {
    %c0 = arith.constant 0 : index
    %c0_0 = arith.constant 0 : index
    %c0_1 = arith.constant 0 : index
    %0 = vector.load %arg0[%c0, %c0_0, %c0_1] : memref<2x10x32xf32, #tpu.memory_space<vmem>>, vector<2x10x32xf32>
    %1 = vector.shape_cast %0 : vector<2x10x32xf32> to vector<20x32xf32>
    %c0_2 = arith.constant 0 : index
    %c0_3 = arith.constant 0 : index
    %2 = vector.load %arg2[%c0_2, %c0_3] : memref<32x32xf32, #tpu.memory_space<vmem>>, vector<32x32xf32>
    %cst = arith.constant dense<0.000000e+00> : vector<20x32xf32>
    %3 = tpu.matmul %1, %2, %cst {dimension_numbers = #tpu.dot_dimension_numbers<[1], [0], [0], [1], [0, 0, 1, 1], [], []>} : vector<20x32xf32>, vector<32x32xf32>, vector<20x32xf32> -> vector<20x32xf32>
    %c0_4 = arith.constant 0 : index
    %c0_5 = arith.constant 0 : index
    %4 = vector.load %arg3[%c0_4, %c0_5] : memref<1x32xf32, #tpu.memory_space<vmem>>, vector<1x32xf32>
    %5 = vector.broadcast %4 : vector<1x32xf32> to vector<20x32xf32>
    %6 = arith.addf %3, %5 : vector<20x32xf32>
    %7 = vector.shape_cast %6 : vector<20x32xf32> to vector<2x10x32xf32>
    %c0_6 = arith.constant 0 : index
    %c0_7 = arith.constant 0 : index
    %8 = vector.load %arg6[%c0_6, %c0_7] : memref<1x32xf32, #tpu.memory_space<vmem>>, vector<1x32xf32>
    %c0_8 = arith.constant 0 : index
    %c0_9 = arith.constant 0 : index
    %9 = vector.load %arg7[%c0_8, %c0_9] : memref<1x1xf32, #tpu.memory_space<vmem>>, vector<1x1xf32>
    %c0_10 = arith.constant 0 : index
    %c0_11 = arith.constant 0 : index
    %10 = vector.load %arg1[%c0_10, %c0_11] : memref<2x32xf32, #tpu.memory_space<vmem>>, vector<2x32xf32>
    %11 = tpu.iota {dimensions = array<i32: 1>} : vector<2x16xi32>
    %c0_i32 = arith.constant 0 : i32
    %12 = vector.broadcast %c0_i32 : i32 to vector<2x16xi32>
    %13 = arith.cmpi eq, %11, %12 : vector<2x16xi32>
    %14 = arith.extui %13 : vector<2x16xi1> to vector<2x16xi32>
    %15 = arith.sitofp %14 : vector<2x16xi32> to vector<2x16xf32>
    %c0_12 = arith.constant 0 : index
    %c0_13 = arith.constant 0 : index
    %16 = vector.load %arg4[%c0_12, %c0_13] : memref<32x256xf32, #tpu.memory_space<vmem>>, vector<32x256xf32>
    %cst_14 = arith.constant dense<0.000000e+00> : vector<2x256xf32>
    %17 = tpu.matmul %10, %16, %cst_14 {dimension_numbers = #tpu.dot_dimension_numbers<[1], [0], [0], [1], [0, 0, 1, 1], [], []>} : vector<2x32xf32>, vector<32x256xf32>, vector<2x256xf32> -> vector<2x256xf32>
    %c0_15 = arith.constant 0 : index
    %c0_16 = arith.constant 0 : index
    %18 = vector.load %arg5[%c0_15, %c0_16] : memref<1x256xf32, #tpu.memory_space<vmem>>, vector<1x256xf32>
    %19 = vector.broadcast %18 : vector<1x256xf32> to vector<2x256xf32>
    %20 = arith.addf %17, %19 : vector<2x256xf32>
    %21 = vector.extract_strided_slice %20 {offsets = [0, 0], sizes = [2, 32], strides = [1, 1]} : vector<2x256xf32> to vector<2x32xf32>
    %22 = vector.extract_strided_slice %20 {offsets = [0, 32], sizes = [2, 32], strides = [1, 1]} : vector<2x256xf32> to vector<2x32xf32>
    %23 = vector.extract_strided_slice %20 {offsets = [0, 64], sizes = [2, 32], strides = [1, 1]} : vector<2x256xf32> to vector<2x32xf32>
    %24 = vector.extract_strided_slice %20 {offsets = [0, 96], sizes = [2, 32], strides = [1, 1]} : vector<2x256xf32> to vector<2x32xf32>
    %25 = vector.shape_cast %21 : vector<2x32xf32> to vector<2x1x32xf32>
    %26 = vector.broadcast %25 : vector<2x1x32xf32> to vector<2x10x32xf32>
    %27 = arith.addf %26, %7 : vector<2x10x32xf32>
    %28 = math.tanh %27 : vector<2x10x32xf32>
    %29 = vector.shape_cast %8 : vector<1x32xf32> to vector<1x1x32xf32>
    %30 = vector.broadcast %29 : vector<1x1x32xf32> to vector<2x10x32xf32>
    %31 = arith.mulf %28, %30 : vector<2x10x32xf32>
    %cst_17 = arith.constant dense<0.000000e+00> : vector<2x10xf32>
    %32 = vector.multi_reduction <add>, %31, %cst_17 [2] : vector<2x10x32xf32> to vector<2x10xf32>
    %33 = vector.broadcast %9 : vector<1x1xf32> to vector<2x10xf32>
    %34 = arith.addf %32, %33 : vector<2x10xf32>
    %cst_18 = arith.constant dense<0xFF800000> : vector<2xf32>
    %35 = vector.multi_reduction <maximumf>, %34, %cst_18 [1] : vector<2x10xf32> to vector<2xf32>
    %36 = vector.shape_cast %35 : vector<2xf32> to vector<2x1xf32>
    %37 = vector.broadcast %36 : vector<2x1xf32> to vector<2x10xf32>
    %38 = arith.subf %34, %37 : vector<2x10xf32>
    %39 = math.exp %38 : vector<2x10xf32>
    %cst_19 = arith.constant dense<0.000000e+00> : vector<2xf32>
    %40 = vector.multi_reduction <add>, %39, %cst_19 [1] : vector<2x10xf32> to vector<2xf32>
    %41 = vector.shape_cast %40 : vector<2xf32> to vector<2x1xf32>
    %42 = vector.broadcast %41 : vector<2x1xf32> to vector<2x10xf32>
    %43 = arith.divf %39, %42 : vector<2x10xf32>
    %44 = vector.shape_cast %43 : vector<2x10xf32> to vector<2x10x1xf32>
    %45 = vector.broadcast %44 : vector<2x10x1xf32> to vector<2x10x32xf32>
    %46 = arith.mulf %45, %0 : vector<2x10x32xf32>
    %cst_20 = arith.constant dense<0.000000e+00> : vector<2x32xf32>
    %47 = vector.multi_reduction <add>, %46, %cst_20 [1] : vector<2x10x32xf32> to vector<2x32xf32>
    %c0_21 = arith.constant 0 : index
    %c0_22 = arith.constant 0 : index
    %48 = vector.load %arg8[%c0_21, %c0_22] : memref<16x96xf32, #tpu.memory_space<vmem>>, vector<16x96xf32>
    %cst_23 = arith.constant dense<0.000000e+00> : vector<2x96xf32>
    %49 = tpu.matmul %15, %48, %cst_23 {dimension_numbers = #tpu.dot_dimension_numbers<[1], [0], [0], [1], [0, 0, 1, 1], [], []>} : vector<2x16xf32>, vector<16x96xf32>, vector<2x96xf32> -> vector<2x96xf32>
    %c0_24 = arith.constant 0 : index
    %c0_25 = arith.constant 0 : index
    %50 = vector.load %arg9[%c0_24, %c0_25] : memref<32x96xf32, #tpu.memory_space<vmem>>, vector<32x96xf32>
    %cst_26 = arith.constant dense<0.000000e+00> : vector<2x96xf32>
    %51 = tpu.matmul %47, %50, %cst_26 {dimension_numbers = #tpu.dot_dimension_numbers<[1], [0], [0], [1], [0, 0, 1, 1], [], []>} : vector<2x32xf32>, vector<32x96xf32>, vector<2x96xf32> -> vector<2x96xf32>
    %52 = arith.addf %49, %51 : vector<2x96xf32>
    %c0_27 = arith.constant 0 : index
    %c0_28 = arith.constant 0 : index
    %53 = vector.load %arg10[%c0_27, %c0_28] : memref<1x96xf32, #tpu.memory_space<vmem>>, vector<1x96xf32>
    %54 = vector.broadcast %53 : vector<1x96xf32> to vector<2x96xf32>
    %55 = arith.addf %52, %54 : vector<2x96xf32>
    %56 = vector.extract_strided_slice %55 {offsets = [0, 0], sizes = [2, 32], strides = [1, 1]} : vector<2x96xf32> to vector<2x32xf32>
    %57 = vector.extract_strided_slice %55 {offsets = [0, 32], sizes = [2, 32], strides = [1, 1]} : vector<2x96xf32> to vector<2x32xf32>
    %58 = vector.extract_strided_slice %55 {offsets = [0, 64], sizes = [2, 32], strides = [1, 1]} : vector<2x96xf32> to vector<2x32xf32>
    %59 = arith.addf %56, %22 : vector<2x32xf32>
    %60 = arith.negf %59 : vector<2x32xf32>
    %61 = math.exp %60 : vector<2x32xf32>
    %cst_29 = arith.constant 1.000000e+00 : f32
    %62 = vector.broadcast %cst_29 : f32 to vector<2x32xf32>
    %63 = arith.addf %62, %61 : vector<2x32xf32>
    %64 = arith.divf %62, %63 : vector<2x32xf32>
    %65 = arith.addf %57, %23 : vector<2x32xf32>
    %66 = arith.negf %65 : vector<2x32xf32>
    %67 = math.exp %66 : vector<2x32xf32>
    %cst_30 = arith.constant 1.000000e+00 : f32
    %68 = vector.broadcast %cst_30 : f32 to vector<2x32xf32>
    %69 = arith.addf %68, %67 : vector<2x32xf32>
    %70 = arith.divf %68, %69 : vector<2x32xf32>
    %71 = arith.mulf %64, %24 : vector<2x32xf32>
    %72 = arith.addf %58, %71 : vector<2x32xf32>
    %73 = math.tanh %72 : vector<2x32xf32>
    %cst_31 = arith.constant 1.000000e+00 : f32
    %74 = vector.broadcast %cst_31 : f32 to vector<2x32xf32>
    %75 = arith.subf %74, %70 : vector<2x32xf32>
    %76 = arith.mulf %75, %73 : vector<2x32xf32>
    %77 = arith.mulf %70, %10 : vector<2x32xf32>
    %78 = arith.addf %76, %77 : vector<2x32xf32>
    %c0_32 = arith.constant 0 : index
    %c0_33 = arith.constant 0 : index
    %79 = vector.load %arg4[%c0_32, %c0_33] : memref<32x256xf32, #tpu.memory_space<vmem>>, vector<32x256xf32>
    %cst_34 = arith.constant dense<0.000000e+00> : vector<2x256xf32>
    %80 = tpu.matmul %78, %79, %cst_34 {dimension_numbers = #tpu.dot_dimension_numbers<[1], [0], [0], [1], [0, 0, 1, 1], [], []>} : vector<2x32xf32>, vector<32x256xf32>, vector<2x256xf32> -> vector<2x256xf32>
    %c0_35 = arith.constant 0 : index
    %c0_36 = arith.constant 0 : index
    %81 = vector.load %arg5[%c0_35, %c0_36] : memref<1x256xf32, #tpu.memory_space<vmem>>, vector<1x256xf32>
    %82 = vector.broadcast %81 : vector<1x256xf32> to vector<2x256xf32>
    %83 = arith.addf %80, %82 : vector<2x256xf32>
    %84 = vector.extract_strided_slice %83 {offsets = [0, 0], sizes = [2, 32], strides = [1, 1]} : vector<2x256xf32> to vector<2x32xf32>
    %85 = vector.extract_strided_slice %83 {offsets = [0, 32], sizes = [2, 32], strides = [1, 1]} : vector<2x256xf32> to vector<2x32xf32>
    %86 = vector.extract_strided_slice %83 {offsets = [0, 64], sizes = [2, 32], strides = [1, 1]} : vector<2x256xf32> to vector<2x32xf32>
    %87 = vector.extract_strided_slice %83 {offsets = [0, 96], sizes = [2, 32], strides = [1, 1]} : vector<2x256xf32> to vector<2x32xf32>
    %88 = vector.extract_strided_slice %83 {offsets = [0, 128], sizes = [2, 16], strides = [1, 1]} : vector<2x256xf32> to vector<2x16xf32>
    %cst_37 = arith.constant dense<0xFF800000> : vector<2xf32>
    %89 = vector.multi_reduction <maximumf>, %88, %cst_37 [1] : vector<2x16xf32> to vector<2xf32>
    %90 = vector.shape_cast %89 : vector<2xf32> to vector<2x1xf32>
    %91 = vector.broadcast %90 : vector<2x1xf32> to vector<2x16xf32>
    %92 = arith.subf %88, %91 : vector<2x16xf32>
    %93 = math.exp %92 : vector<2x16xf32>
    %cst_38 = arith.constant dense<0.000000e+00> : vector<2xf32>
    %94 = vector.multi_reduction <add>, %93, %cst_38 [1] : vector<2x16xf32> to vector<2xf32>
    %95 = vector.shape_cast %94 : vector<2xf32> to vector<2x1xf32>
    %96 = math.log %95 : vector<2x1xf32>
    %97 = vector.broadcast %96 : vector<2x1xf32> to vector<2x16xf32>
    %98 = arith.subf %92, %97 : vector<2x16xf32>
    %cst_39 = arith.constant dense<0xFF800000> : vector<2xf32>
    %99 = vector.multi_reduction <maximumf>, %88, %cst_39 [1] : vector<2x16xf32> to vector<2xf32>
    %100 = vector.shape_cast %99 : vector<2xf32> to vector<2x1xf32>
    %101 = vector.broadcast %100 : vector<2x1xf32> to vector<2x16xf32>
    %102 = arith.cmpf oge, %88, %101 : vector<2x16xf32>
    %c16_i32 = arith.constant 16 : i32
    %103 = vector.broadcast %c16_i32 : i32 to vector<2x16xi32>
    %104 = arith.select %102, %11, %103 : vector<2x16xi1>, vector<2x16xi32>
    %cst_40 = arith.constant dense<2147483647> : vector<2xi32>
    %105 = vector.multi_reduction <minsi>, %104, %cst_40 [1] : vector<2x16xi32> to vector<2xi32>
    %106 = vector.shape_cast %105 : vector<2xi32> to vector<2x1xi32>
    %107 = vector.broadcast %106 : vector<2x1xi32> to vector<2x16xi32>
    %108 = arith.cmpi eq, %11, %107 : vector<2x16xi32>
    %109 = arith.extui %108 : vector<2x16xi1> to vector<2x16xi32>
    %110 = arith.sitofp %109 : vector<2x16xi32> to vector<2x16xf32>
    %111 = vector.shape_cast %84 : vector<2x32xf32> to vector<2x1x32xf32>
    %112 = vector.broadcast %111 : vector<2x1x32xf32> to vector<2x10x32xf32>
    %113 = arith.addf %112, %7 : vector<2x10x32xf32>
    %114 = math.tanh %113 : vector<2x10x32xf32>
    %115 = vector.shape_cast %8 : vector<1x32xf32> to vector<1x1x32xf32>
    %116 = vector.broadcast %115 : vector<1x1x32xf32> to vector<2x10x32xf32>
    %117 = arith.mulf %114, %116 : vector<2x10x32xf32>
    %cst_41 = arith.constant dense<0.000000e+00> : vector<2x10xf32>
    %118 = vector.multi_reduction <add>, %117, %cst_41 [2] : vector<2x10x32xf32> to vector<2x10xf32>
    %119 = vector.broadcast %9 : vector<1x1xf32> to vector<2x10xf32>
    %120 = arith.addf %118, %119 : vector<2x10xf32>
    %cst_42 = arith.constant dense<0xFF800000> : vector<2xf32>
    %121 = vector.multi_reduction <maximumf>, %120, %cst_42 [1] : vector<2x10xf32> to vector<2xf32>
    %122 = vector.shape_cast %121 : vector<2xf32> to vector<2x1xf32>
    %123 = vector.broadcast %122 : vector<2x1xf32> to vector<2x10xf32>
    %124 = arith.subf %120, %123 : vector<2x10xf32>
    %125 = math.exp %124 : vector<2x10xf32>
    %cst_43 = arith.constant dense<0.000000e+00> : vector<2xf32>
    %126 = vector.multi_reduction <add>, %125, %cst_43 [1] : vector<2x10xf32> to vector<2xf32>
    %127 = vector.shape_cast %126 : vector<2xf32> to vector<2x1xf32>
    %128 = vector.broadcast %127 : vector<2x1xf32> to vector<2x10xf32>
    %129 = arith.divf %125, %128 : vector<2x10xf32>
    %130 = vector.shape_cast %129 : vector<2x10xf32> to vector<2x10x1xf32>
    %131 = vector.broadcast %130 : vector<2x10x1xf32> to vector<2x10x32xf32>
    %132 = arith.mulf %131, %0 : vector<2x10x32xf32>
    %cst_44 = arith.constant dense<0.000000e+00> : vector<2x32xf32>
    %133 = vector.multi_reduction <add>, %132, %cst_44 [1] : vector<2x10x32xf32> to vector<2x32xf32>
    %c0_45 = arith.constant 0 : index
    %c0_46 = arith.constant 0 : index
    %134 = vector.load %arg8[%c0_45, %c0_46] : memref<16x96xf32, #tpu.memory_space<vmem>>, vector<16x96xf32>
    %cst_47 = arith.constant dense<0.000000e+00> : vector<2x96xf32>
    %135 = tpu.matmul %110, %134, %cst_47 {dimension_numbers = #tpu.dot_dimension_numbers<[1], [0], [0], [1], [0, 0, 1, 1], [], []>} : vector<2x16xf32>, vector<16x96xf32>, vector<2x96xf32> -> vector<2x96xf32>
    %c0_48 = arith.constant 0 : index
    %c0_49 = arith.constant 0 : index
    %136 = vector.load %arg9[%c0_48, %c0_49] : memref<32x96xf32, #tpu.memory_space<vmem>>, vector<32x96xf32>
    %cst_50 = arith.constant dense<0.000000e+00> : vector<2x96xf32>
    %137 = tpu.matmul %133, %136, %cst_50 {dimension_numbers = #tpu.dot_dimension_numbers<[1], [0], [0], [1], [0, 0, 1, 1], [], []>} : vector<2x32xf32>, vector<32x96xf32>, vector<2x96xf32> -> vector<2x96xf32>
    %138 = arith.addf %135, %137 : vector<2x96xf32>
    %c0_51 = arith.constant 0 : index
    %c0_52 = arith.constant 0 : index
    %139 = vector.load %arg10[%c0_51, %c0_52] : memref<1x96xf32, #tpu.memory_space<vmem>>, vector<1x96xf32>
    %140 = vector.broadcast %139 : vector<1x96xf32> to vector<2x96xf32>
    %141 = arith.addf %138, %140 : vector<2x96xf32>
    %142 = vector.extract_strided_slice %141 {offsets = [0, 0], sizes = [2, 32], strides = [1, 1]} : vector<2x96xf32> to vector<2x32xf32>
    %143 = vector.extract_strided_slice %141 {offsets = [0, 32], sizes = [2, 32], strides = [1, 1]} : vector<2x96xf32> to vector<2x32xf32>
    %144 = vector.extract_strided_slice %141 {offsets = [0, 64], sizes = [2, 32], strides = [1, 1]} : vector<2x96xf32> to vector<2x32xf32>
    %145 = arith.addf %142, %85 : vector<2x32xf32>
    %146 = arith.negf %145 : vector<2x32xf32>
    %147 = math.exp %146 : vector<2x32xf32>
    %cst_53 = arith.constant 1.000000e+00 : f32
    %148 = vector.broadcast %cst_53 : f32 to vector<2x32xf32>
    %149 = arith.addf %148, %147 : vector<2x32xf32>
    %150 = arith.divf %148, %149 : vector<2x32xf32>
    %151 = arith.addf %143, %86 : vector<2x32xf32>
    %152 = arith.negf %151 : vector<2x32xf32>
    %153 = math.exp %152 : vector<2x32xf32>
    %cst_54 = arith.constant 1.000000e+00 : f32
    %154 = vector.broadcast %cst_54 : f32 to vector<2x32xf32>
    %155 = arith.addf %154, %153 : vector<2x32xf32>
    %156 = arith.divf %154, %155 : vector<2x32xf32>
    %157 = arith.mulf %150, %87 : vector<2x32xf32>
    %158 = arith.addf %144, %157 : vector<2x32xf32>
    %159 = math.tanh %158 : vector<2x32xf32>
    %cst_55 = arith.constant 1.000000e+00 : f32
    %160 = vector.broadcast %cst_55 : f32 to vector<2x32xf32>
    %161 = arith.subf %160, %156 : vector<2x32xf32>
    %162 = arith.mulf %161, %159 : vector<2x32xf32>
    %163 = arith.mulf %156, %78 : vector<2x32xf32>
    %164 = arith.addf %162, %163 : vector<2x32xf32>
    %c0_56 = arith.constant 0 : index
    %c0_57 = arith.constant 0 : index
    %165 = vector.load %arg4[%c0_56, %c0_57] : memref<32x256xf32, #tpu.memory_space<vmem>>, vector<32x256xf32>
    %cst_58 = arith.constant dense<0.000000e+00> : vector<2x256xf32>
    %166 = tpu.matmul %164, %165, %cst_58 {dimension_numbers = #tpu.dot_dimension_numbers<[1], [0], [0], [1], [0, 0, 1, 1], [], []>} : vector<2x32xf32>, vector<32x256xf32>, vector<2x256xf32> -> vector<2x256xf32>
    %c0_59 = arith.constant 0 : index
    %c0_60 = arith.constant 0 : index
    %167 = vector.load %arg5[%c0_59, %c0_60] : memref<1x256xf32, #tpu.memory_space<vmem>>, vector<1x256xf32>
    %168 = vector.broadcast %167 : vector<1x256xf32> to vector<2x256xf32>
    %169 = arith.addf %166, %168 : vector<2x256xf32>
    %170 = vector.extract_strided_slice %169 {offsets = [0, 0], sizes = [2, 32], strides = [1, 1]} : vector<2x256xf32> to vector<2x32xf32>
    %171 = vector.extract_strided_slice %169 {offsets = [0, 32], sizes = [2, 32], strides = [1, 1]} : vector<2x256xf32> to vector<2x32xf32>
    %172 = vector.extract_strided_slice %169 {offsets = [0, 64], sizes = [2, 32], strides = [1, 1]} : vector<2x256xf32> to vector<2x32xf32>
    %173 = vector.extract_strided_slice %169 {offsets = [0, 96], sizes = [2, 32], strides = [1, 1]} : vector<2x256xf32> to vector<2x32xf32>
    %174 = vector.extract_strided_slice %169 {offsets = [0, 128], sizes = [2, 16], strides = [1, 1]} : vector<2x256xf32> to vector<2x16xf32>
    %cst_61 = arith.constant dense<0xFF800000> : vector<2xf32>
    %175 = vector.multi_reduction <maximumf>, %174, %cst_61 [1] : vector<2x16xf32> to vector<2xf32>
    %176 = vector.shape_cast %175 : vector<2xf32> to vector<2x1xf32>
    %177 = vector.broadcast %176 : vector<2x1xf32> to vector<2x16xf32>
    %178 = arith.subf %174, %177 : vector<2x16xf32>
    %179 = math.exp %178 : vector<2x16xf32>
    %cst_62 = arith.constant dense<0.000000e+00> : vector<2xf32>
    %180 = vector.multi_reduction <add>, %179, %cst_62 [1] : vector<2x16xf32> to vector<2xf32>
    %181 = vector.shape_cast %180 : vector<2xf32> to vector<2x1xf32>
    %182 = math.log %181 : vector<2x1xf32>
    %183 = vector.broadcast %182 : vector<2x1xf32> to vector<2x16xf32>
    %184 = arith.subf %178, %183 : vector<2x16xf32>
    %cst_63 = arith.constant dense<0xFF800000> : vector<2xf32>
    %185 = vector.multi_reduction <maximumf>, %174, %cst_63 [1] : vector<2x16xf32> to vector<2xf32>
    %186 = vector.shape_cast %185 : vector<2xf32> to vector<2x1xf32>
    %187 = vector.broadcast %186 : vector<2x1xf32> to vector<2x16xf32>
    %188 = arith.cmpf oge, %174, %187 : vector<2x16xf32>
    %c16_i32_64 = arith.constant 16 : i32
    %189 = vector.broadcast %c16_i32_64 : i32 to vector<2x16xi32>
    %190 = arith.select %188, %11, %189 : vector<2x16xi1>, vector<2x16xi32>
    %cst_65 = arith.constant dense<2147483647> : vector<2xi32>
    %191 = vector.multi_reduction <minsi>, %190, %cst_65 [1] : vector<2x16xi32> to vector<2xi32>
    %192 = vector.shape_cast %191 : vector<2xi32> to vector<2x1xi32>
    %193 = vector.broadcast %192 : vector<2x1xi32> to vector<2x16xi32>
    %194 = arith.cmpi eq, %11, %193 : vector<2x16xi32>
    %195 = arith.extui %194 : vector<2x16xi1> to vector<2x16xi32>
    %196 = arith.sitofp %195 : vector<2x16xi32> to vector<2x16xf32>
    %197 = vector.shape_cast %170 : vector<2x32xf32> to vector<2x1x32xf32>
    %198 = vector.broadcast %197 : vector<2x1x32xf32> to vector<2x10x32xf32>
    %199 = arith.addf %198, %7 : vector<2x10x32xf32>
    %200 = math.tanh %199 : vector<2x10x32xf32>
    %201 = vector.shape_cast %8 : vector<1x32xf32> to vector<1x1x32xf32>
    %202 = vector.broadcast %201 : vector<1x1x32xf32> to vector<2x10x32xf32>
    %203 = arith.mulf %200, %202 : vector<2x10x32xf32>
    %cst_66 = arith.constant dense<0.000000e+00> : vector<2x10xf32>
    %204 = vector.multi_reduction <add>, %203, %cst_66 [2] : vector<2x10x32xf32> to vector<2x10xf32>
    %205 = vector.broadcast %9 : vector<1x1xf32> to vector<2x10xf32>
    %206 = arith.addf %204, %205 : vector<2x10xf32>
    %cst_67 = arith.constant dense<0xFF800000> : vector<2xf32>
    %207 = vector.multi_reduction <maximumf>, %206, %cst_67 [1] : vector<2x10xf32> to vector<2xf32>
    %208 = vector.shape_cast %207 : vector<2xf32> to vector<2x1xf32>
    %209 = vector.broadcast %208 : vector<2x1xf32> to vector<2x10xf32>
    %210 = arith.subf %206, %209 : vector<2x10xf32>
    %211 = math.exp %210 : vector<2x10xf32>
    %cst_68 = arith.constant dense<0.000000e+00> : vector<2xf32>
    %212 = vector.multi_reduction <add>, %211, %cst_68 [1] : vector<2x10xf32> to vector<2xf32>
    %213 = vector.shape_cast %212 : vector<2xf32> to vector<2x1xf32>
    %214 = vector.broadcast %213 : vector<2x1xf32> to vector<2x10xf32>
    %215 = arith.divf %211, %214 : vector<2x10xf32>
    %216 = vector.shape_cast %215 : vector<2x10xf32> to vector<2x10x1xf32>
    %217 = vector.broadcast %216 : vector<2x10x1xf32> to vector<2x10x32xf32>
    %218 = arith.mulf %217, %0 : vector<2x10x32xf32>
    %cst_69 = arith.constant dense<0.000000e+00> : vector<2x32xf32>
    %219 = vector.multi_reduction <add>, %218, %cst_69 [1] : vector<2x10x32xf32> to vector<2x32xf32>
    %c0_70 = arith.constant 0 : index
    %c0_71 = arith.constant 0 : index
    %220 = vector.load %arg8[%c0_70, %c0_71] : memref<16x96xf32, #tpu.memory_space<vmem>>, vector<16x96xf32>
    %cst_72 = arith.constant dense<0.000000e+00> : vector<2x96xf32>
    %221 = tpu.matmul %196, %220, %cst_72 {dimension_numbers = #tpu.dot_dimension_numbers<[1], [0], [0], [1], [0, 0, 1, 1], [], []>} : vector<2x16xf32>, vector<16x96xf32>, vector<2x96xf32> -> vector<2x96xf32>
    %c0_73 = arith.constant 0 : index
    %c0_74 = arith.constant 0 : index
    %222 = vector.load %arg9[%c0_73, %c0_74] : memref<32x96xf32, #tpu.memory_space<vmem>>, vector<32x96xf32>
    %cst_75 = arith.constant dense<0.000000e+00> : vector<2x96xf32>
    %223 = tpu.matmul %219, %222, %cst_75 {dimension_numbers = #tpu.dot_dimension_numbers<[1], [0], [0], [1], [0, 0, 1, 1], [], []>} : vector<2x32xf32>, vector<32x96xf32>, vector<2x96xf32> -> vector<2x96xf32>
    %224 = arith.addf %221, %223 : vector<2x96xf32>
    %c0_76 = arith.constant 0 : index
    %c0_77 = arith.constant 0 : index
    %225 = vector.load %arg10[%c0_76, %c0_77] : memref<1x96xf32, #tpu.memory_space<vmem>>, vector<1x96xf32>
    %226 = vector.broadcast %225 : vector<1x96xf32> to vector<2x96xf32>
    %227 = arith.addf %224, %226 : vector<2x96xf32>
    %228 = vector.extract_strided_slice %227 {offsets = [0, 0], sizes = [2, 32], strides = [1, 1]} : vector<2x96xf32> to vector<2x32xf32>
    %229 = vector.extract_strided_slice %227 {offsets = [0, 32], sizes = [2, 32], strides = [1, 1]} : vector<2x96xf32> to vector<2x32xf32>
    %230 = vector.extract_strided_slice %227 {offsets = [0, 64], sizes = [2, 32], strides = [1, 1]} : vector<2x96xf32> to vector<2x32xf32>
    %231 = arith.addf %228, %171 : vector<2x32xf32>
    %232 = arith.negf %231 : vector<2x32xf32>
    %233 = math.exp %232 : vector<2x32xf32>
    %cst_78 = arith.constant 1.000000e+00 : f32
    %234 = vector.broadcast %cst_78 : f32 to vector<2x32xf32>
    %235 = arith.addf %234, %233 : vector<2x32xf32>
    %236 = arith.divf %234, %235 : vector<2x32xf32>
    %237 = arith.addf %229, %172 : vector<2x32xf32>
    %238 = arith.negf %237 : vector<2x32xf32>
    %239 = math.exp %238 : vector<2x32xf32>
    %cst_79 = arith.constant 1.000000e+00 : f32
    %240 = vector.broadcast %cst_79 : f32 to vector<2x32xf32>
    %241 = arith.addf %240, %239 : vector<2x32xf32>
    %242 = arith.divf %240, %241 : vector<2x32xf32>
    %243 = arith.mulf %236, %173 : vector<2x32xf32>
    %244 = arith.addf %230, %243 : vector<2x32xf32>
    %245 = math.tanh %244 : vector<2x32xf32>
    %cst_80 = arith.constant 1.000000e+00 : f32
    %246 = vector.broadcast %cst_80 : f32 to vector<2x32xf32>
    %247 = arith.subf %246, %242 : vector<2x32xf32>
    %248 = arith.mulf %247, %245 : vector<2x32xf32>
    %249 = arith.mulf %242, %164 : vector<2x32xf32>
    %250 = arith.addf %248, %249 : vector<2x32xf32>
    %c0_81 = arith.constant 0 : index
    %c0_82 = arith.constant 0 : index
    %251 = vector.load %arg4[%c0_81, %c0_82] : memref<32x256xf32, #tpu.memory_space<vmem>>, vector<32x256xf32>
    %cst_83 = arith.constant dense<0.000000e+00> : vector<2x256xf32>
    %252 = tpu.matmul %250, %251, %cst_83 {dimension_numbers = #tpu.dot_dimension_numbers<[1], [0], [0], [1], [0, 0, 1, 1], [], []>} : vector<2x32xf32>, vector<32x256xf32>, vector<2x256xf32> -> vector<2x256xf32>
    %c0_84 = arith.constant 0 : index
    %c0_85 = arith.constant 0 : index
    %253 = vector.load %arg5[%c0_84, %c0_85] : memref<1x256xf32, #tpu.memory_space<vmem>>, vector<1x256xf32>
    %254 = vector.broadcast %253 : vector<1x256xf32> to vector<2x256xf32>
    %255 = arith.addf %252, %254 : vector<2x256xf32>
    %256 = vector.extract_strided_slice %255 {offsets = [0, 0], sizes = [2, 32], strides = [1, 1]} : vector<2x256xf32> to vector<2x32xf32>
    %257 = vector.extract_strided_slice %255 {offsets = [0, 32], sizes = [2, 32], strides = [1, 1]} : vector<2x256xf32> to vector<2x32xf32>
    %258 = vector.extract_strided_slice %255 {offsets = [0, 64], sizes = [2, 32], strides = [1, 1]} : vector<2x256xf32> to vector<2x32xf32>
    %259 = vector.extract_strided_slice %255 {offsets = [0, 96], sizes = [2, 32], strides = [1, 1]} : vector<2x256xf32> to vector<2x32xf32>
    %260 = vector.extract_strided_slice %255 {offsets = [0, 128], sizes = [2, 16], strides = [1, 1]} : vector<2x256xf32> to vector<2x16xf32>
    %cst_86 = arith.constant dense<0xFF800000> : vector<2xf32>
    %261 = vector.multi_reduction <maximumf>, %260, %cst_86 [1] : vector<2x16xf32> to vector<2xf32>
    %262 = vector.shape_cast %261 : vector<2xf32> to vector<2x1xf32>
    %263 = vector.broadcast %262 : vector<2x1xf32> to vector<2x16xf32>
    %264 = arith.subf %260, %263 : vector<2x16xf32>
    %265 = math.exp %264 : vector<2x16xf32>
    %cst_87 = arith.constant dense<0.000000e+00> : vector<2xf32>
    %266 = vector.multi_reduction <add>, %265, %cst_87 [1] : vector<2x16xf32> to vector<2xf32>
    %267 = vector.shape_cast %266 : vector<2xf32> to vector<2x1xf32>
    %268 = math.log %267 : vector<2x1xf32>
    %269 = vector.broadcast %268 : vector<2x1xf32> to vector<2x16xf32>
    %270 = arith.subf %264, %269 : vector<2x16xf32>
    %cst_88 = arith.constant dense<0xFF800000> : vector<2xf32>
    %271 = vector.multi_reduction <maximumf>, %260, %cst_88 [1] : vector<2x16xf32> to vector<2xf32>
    %272 = vector.shape_cast %271 : vector<2xf32> to vector<2x1xf32>
    %273 = vector.broadcast %272 : vector<2x1xf32> to vector<2x16xf32>
    %274 = arith.cmpf oge, %260, %273 : vector<2x16xf32>
    %c16_i32_89 = arith.constant 16 : i32
    %275 = vector.broadcast %c16_i32_89 : i32 to vector<2x16xi32>
    %276 = arith.select %274, %11, %275 : vector<2x16xi1>, vector<2x16xi32>
    %cst_90 = arith.constant dense<2147483647> : vector<2xi32>
    %277 = vector.multi_reduction <minsi>, %276, %cst_90 [1] : vector<2x16xi32> to vector<2xi32>
    %278 = vector.shape_cast %277 : vector<2xi32> to vector<2x1xi32>
    %279 = vector.broadcast %278 : vector<2x1xi32> to vector<2x16xi32>
    %280 = arith.cmpi eq, %11, %279 : vector<2x16xi32>
    %281 = arith.extui %280 : vector<2x16xi1> to vector<2x16xi32>
    %282 = arith.sitofp %281 : vector<2x16xi32> to vector<2x16xf32>
    %283 = vector.shape_cast %256 : vector<2x32xf32> to vector<2x1x32xf32>
    %284 = vector.broadcast %283 : vector<2x1x32xf32> to vector<2x10x32xf32>
    %285 = arith.addf %284, %7 : vector<2x10x32xf32>
    %286 = math.tanh %285 : vector<2x10x32xf32>
    %287 = vector.shape_cast %8 : vector<1x32xf32> to vector<1x1x32xf32>
    %288 = vector.broadcast %287 : vector<1x1x32xf32> to vector<2x10x32xf32>
    %289 = arith.mulf %286, %288 : vector<2x10x32xf32>
    %cst_91 = arith.constant dense<0.000000e+00> : vector<2x10xf32>
    %290 = vector.multi_reduction <add>, %289, %cst_91 [2] : vector<2x10x32xf32> to vector<2x10xf32>
    %291 = vector.broadcast %9 : vector<1x1xf32> to vector<2x10xf32>
    %292 = arith.addf %290, %291 : vector<2x10xf32>
    %cst_92 = arith.constant dense<0xFF800000> : vector<2xf32>
    %293 = vector.multi_reduction <maximumf>, %292, %cst_92 [1] : vector<2x10xf32> to vector<2xf32>
    %294 = vector.shape_cast %293 : vector<2xf32> to vector<2x1xf32>
    %295 = vector.broadcast %294 : vector<2x1xf32> to vector<2x10xf32>
    %296 = arith.subf %292, %295 : vector<2x10xf32>
    %297 = math.exp %296 : vector<2x10xf32>
    %cst_93 = arith.constant dense<0.000000e+00> : vector<2xf32>
    %298 = vector.multi_reduction <add>, %297, %cst_93 [1] : vector<2x10xf32> to vector<2xf32>
    %299 = vector.shape_cast %298 : vector<2xf32> to vector<2x1xf32>
    %300 = vector.broadcast %299 : vector<2x1xf32> to vector<2x10xf32>
    %301 = arith.divf %297, %300 : vector<2x10xf32>
    %302 = vector.shape_cast %301 : vector<2x10xf32> to vector<2x10x1xf32>
    %303 = vector.broadcast %302 : vector<2x10x1xf32> to vector<2x10x32xf32>
    %304 = arith.mulf %303, %0 : vector<2x10x32xf32>
    %cst_94 = arith.constant dense<0.000000e+00> : vector<2x32xf32>
    %305 = vector.multi_reduction <add>, %304, %cst_94 [1] : vector<2x10x32xf32> to vector<2x32xf32>
    %c0_95 = arith.constant 0 : index
    %c0_96 = arith.constant 0 : index
    %306 = vector.load %arg8[%c0_95, %c0_96] : memref<16x96xf32, #tpu.memory_space<vmem>>, vector<16x96xf32>
    %cst_97 = arith.constant dense<0.000000e+00> : vector<2x96xf32>
    %307 = tpu.matmul %282, %306, %cst_97 {dimension_numbers = #tpu.dot_dimension_numbers<[1], [0], [0], [1], [0, 0, 1, 1], [], []>} : vector<2x16xf32>, vector<16x96xf32>, vector<2x96xf32> -> vector<2x96xf32>
    %c0_98 = arith.constant 0 : index
    %c0_99 = arith.constant 0 : index
    %308 = vector.load %arg9[%c0_98, %c0_99] : memref<32x96xf32, #tpu.memory_space<vmem>>, vector<32x96xf32>
    %cst_100 = arith.constant dense<0.000000e+00> : vector<2x96xf32>
    %309 = tpu.matmul %305, %308, %cst_100 {dimension_numbers = #tpu.dot_dimension_numbers<[1], [0], [0], [1], [0, 0, 1, 1], [], []>} : vector<2x32xf32>, vector<32x96xf32>, vector<2x96xf32> -> vector<2x96xf32>
    %310 = arith.addf %307, %309 : vector<2x96xf32>
    %c0_101 = arith.constant 0 : index
    %c0_102 = arith.constant 0 : index
    %311 = vector.load %arg10[%c0_101, %c0_102] : memref<1x96xf32, #tpu.memory_space<vmem>>, vector<1x96xf32>
    %312 = vector.broadcast %311 : vector<1x96xf32> to vector<2x96xf32>
    %313 = arith.addf %310, %312 : vector<2x96xf32>
    %314 = vector.extract_strided_slice %313 {offsets = [0, 0], sizes = [2, 32], strides = [1, 1]} : vector<2x96xf32> to vector<2x32xf32>
    %315 = vector.extract_strided_slice %313 {offsets = [0, 32], sizes = [2, 32], strides = [1, 1]} : vector<2x96xf32> to vector<2x32xf32>
    %316 = vector.extract_strided_slice %313 {offsets = [0, 64], sizes = [2, 32], strides = [1, 1]} : vector<2x96xf32> to vector<2x32xf32>
    %317 = arith.addf %314, %257 : vector<2x32xf32>
    %318 = arith.negf %317 : vector<2x32xf32>
    %319 = math.exp %318 : vector<2x32xf32>
    %cst_103 = arith.constant 1.000000e+00 : f32
    %320 = vector.broadcast %cst_103 : f32 to vector<2x32xf32>
    %321 = arith.addf %320, %319 : vector<2x32xf32>
    %322 = arith.divf %320, %321 : vector<2x32xf32>
    %323 = arith.addf %315, %258 : vector<2x32xf32>
    %324 = arith.negf %323 : vector<2x32xf32>
    %325 = math.exp %324 : vector<2x32xf32>
    %cst_104 = arith.constant 1.000000e+00 : f32
    %326 = vector.broadcast %cst_104 : f32 to vector<2x32xf32>
    %327 = arith.addf %326, %325 : vector<2x32xf32>
    %328 = arith.divf %326, %327 : vector<2x32xf32>
    %329 = arith.mulf %322, %259 : vector<2x32xf32>
    %330 = arith.addf %316, %329 : vector<2x32xf32>
    %331 = math.tanh %330 : vector<2x32xf32>
    %cst_105 = arith.constant 1.000000e+00 : f32
    %332 = vector.broadcast %cst_105 : f32 to vector<2x32xf32>
    %333 = arith.subf %332, %328 : vector<2x32xf32>
    %334 = arith.mulf %333, %331 : vector<2x32xf32>
    %335 = arith.mulf %328, %250 : vector<2x32xf32>
    %336 = arith.addf %334, %335 : vector<2x32xf32>
    %c0_106 = arith.constant 0 : index
    %c0_107 = arith.constant 0 : index
    %337 = vector.load %arg4[%c0_106, %c0_107] : memref<32x256xf32, #tpu.memory_space<vmem>>, vector<32x256xf32>
    %cst_108 = arith.constant dense<0.000000e+00> : vector<2x256xf32>
    %338 = tpu.matmul %336, %337, %cst_108 {dimension_numbers = #tpu.dot_dimension_numbers<[1], [0], [0], [1], [0, 0, 1, 1], [], []>} : vector<2x32xf32>, vector<32x256xf32>, vector<2x256xf32> -> vector<2x256xf32>
    %c0_109 = arith.constant 0 : index
    %c0_110 = arith.constant 0 : index
    %339 = vector.load %arg5[%c0_109, %c0_110] : memref<1x256xf32, #tpu.memory_space<vmem>>, vector<1x256xf32>
    %340 = vector.broadcast %339 : vector<1x256xf32> to vector<2x256xf32>
    %341 = arith.addf %338, %340 : vector<2x256xf32>
    %342 = vector.extract_strided_slice %341 {offsets = [0, 0], sizes = [2, 32], strides = [1, 1]} : vector<2x256xf32> to vector<2x32xf32>
    %343 = vector.extract_strided_slice %341 {offsets = [0, 32], sizes = [2, 32], strides = [1, 1]} : vector<2x256xf32> to vector<2x32xf32>
    %344 = vector.extract_strided_slice %341 {offsets = [0, 64], sizes = [2, 32], strides = [1, 1]} : vector<2x256xf32> to vector<2x32xf32>
    %345 = vector.extract_strided_slice %341 {offsets = [0, 96], sizes = [2, 32], strides = [1, 1]} : vector<2x256xf32> to vector<2x32xf32>
    %346 = vector.extract_strided_slice %341 {offsets = [0, 128], sizes = [2, 16], strides = [1, 1]} : vector<2x256xf32> to vector<2x16xf32>
    %cst_111 = arith.constant dense<0xFF800000> : vector<2xf32>
    %347 = vector.multi_reduction <maximumf>, %346, %cst_111 [1] : vector<2x16xf32> to vector<2xf32>
    %348 = vector.shape_cast %347 : vector<2xf32> to vector<2x1xf32>
    %349 = vector.broadcast %348 : vector<2x1xf32> to vector<2x16xf32>
    %350 = arith.subf %346, %349 : vector<2x16xf32>
    %351 = math.exp %350 : vector<2x16xf32>
    %cst_112 = arith.constant dense<0.000000e+00> : vector<2xf32>
    %352 = vector.multi_reduction <add>, %351, %cst_112 [1] : vector<2x16xf32> to vector<2xf32>
    %353 = vector.shape_cast %352 : vector<2xf32> to vector<2x1xf32>
    %354 = math.log %353 : vector<2x1xf32>
    %355 = vector.broadcast %354 : vector<2x1xf32> to vector<2x16xf32>
    %356 = arith.subf %350, %355 : vector<2x16xf32>
    %cst_113 = arith.constant dense<0xFF800000> : vector<2xf32>
    %357 = vector.multi_reduction <maximumf>, %346, %cst_113 [1] : vector<2x16xf32> to vector<2xf32>
    %358 = vector.shape_cast %357 : vector<2xf32> to vector<2x1xf32>
    %359 = vector.broadcast %358 : vector<2x1xf32> to vector<2x16xf32>
    %360 = arith.cmpf oge, %346, %359 : vector<2x16xf32>
    %c16_i32_114 = arith.constant 16 : i32
    %361 = vector.broadcast %c16_i32_114 : i32 to vector<2x16xi32>
    %362 = arith.select %360, %11, %361 : vector<2x16xi1>, vector<2x16xi32>
    %cst_115 = arith.constant dense<2147483647> : vector<2xi32>
    %363 = vector.multi_reduction <minsi>, %362, %cst_115 [1] : vector<2x16xi32> to vector<2xi32>
    %364 = vector.shape_cast %363 : vector<2xi32> to vector<2x1xi32>
    %365 = vector.broadcast %364 : vector<2x1xi32> to vector<2x16xi32>
    %366 = arith.cmpi eq, %11, %365 : vector<2x16xi32>
    %367 = arith.extui %366 : vector<2x16xi1> to vector<2x16xi32>
    %368 = arith.sitofp %367 : vector<2x16xi32> to vector<2x16xf32>
    %369 = vector.shape_cast %342 : vector<2x32xf32> to vector<2x1x32xf32>
    %370 = vector.broadcast %369 : vector<2x1x32xf32> to vector<2x10x32xf32>
    %371 = arith.addf %370, %7 : vector<2x10x32xf32>
    %372 = math.tanh %371 : vector<2x10x32xf32>
    %373 = vector.shape_cast %8 : vector<1x32xf32> to vector<1x1x32xf32>
    %374 = vector.broadcast %373 : vector<1x1x32xf32> to vector<2x10x32xf32>
    %375 = arith.mulf %372, %374 : vector<2x10x32xf32>
    %cst_116 = arith.constant dense<0.000000e+00> : vector<2x10xf32>
    %376 = vector.multi_reduction <add>, %375, %cst_116 [2] : vector<2x10x32xf32> to vector<2x10xf32>
    %377 = vector.broadcast %9 : vector<1x1xf32> to vector<2x10xf32>
    %378 = arith.addf %376, %377 : vector<2x10xf32>
    %cst_117 = arith.constant dense<0xFF800000> : vector<2xf32>
    %379 = vector.multi_reduction <maximumf>, %378, %cst_117 [1] : vector<2x10xf32> to vector<2xf32>
    %380 = vector.shape_cast %379 : vector<2xf32> to vector<2x1xf32>
    %381 = vector.broadcast %380 : vector<2x1xf32> to vector<2x10xf32>
    %382 = arith.subf %378, %381 : vector<2x10xf32>
    %383 = math.exp %382 : vector<2x10xf32>
    %cst_118 = arith.constant dense<0.000000e+00> : vector<2xf32>
    %384 = vector.multi_reduction <add>, %383, %cst_118 [1] : vector<2x10xf32> to vector<2xf32>
    %385 = vector.shape_cast %384 : vector<2xf32> to vector<2x1xf32>
    %386 = vector.broadcast %385 : vector<2x1xf32> to vector<2x10xf32>
    %387 = arith.divf %383, %386 : vector<2x10xf32>
    %388 = vector.shape_cast %387 : vector<2x10xf32> to vector<2x10x1xf32>
    %389 = vector.broadcast %388 : vector<2x10x1xf32> to vector<2x10x32xf32>
    %390 = arith.mulf %389, %0 : vector<2x10x32xf32>
    %cst_119 = arith.constant dense<0.000000e+00> : vector<2x32xf32>
    %391 = vector.multi_reduction <add>, %390, %cst_119 [1] : vector<2x10x32xf32> to vector<2x32xf32>
    %c0_120 = arith.constant 0 : index
    %c0_121 = arith.constant 0 : index
    %392 = vector.load %arg8[%c0_120, %c0_121] : memref<16x96xf32, #tpu.memory_space<vmem>>, vector<16x96xf32>
    %cst_122 = arith.constant dense<0.000000e+00> : vector<2x96xf32>
    %393 = tpu.matmul %368, %392, %cst_122 {dimension_numbers = #tpu.dot_dimension_numbers<[1], [0], [0], [1], [0, 0, 1, 1], [], []>} : vector<2x16xf32>, vector<16x96xf32>, vector<2x96xf32> -> vector<2x96xf32>
    %c0_123 = arith.constant 0 : index
    %c0_124 = arith.constant 0 : index
    %394 = vector.load %arg9[%c0_123, %c0_124] : memref<32x96xf32, #tpu.memory_space<vmem>>, vector<32x96xf32>
    %cst_125 = arith.constant dense<0.000000e+00> : vector<2x96xf32>
    %395 = tpu.matmul %391, %394, %cst_125 {dimension_numbers = #tpu.dot_dimension_numbers<[1], [0], [0], [1], [0, 0, 1, 1], [], []>} : vector<2x32xf32>, vector<32x96xf32>, vector<2x96xf32> -> vector<2x96xf32>
    %396 = arith.addf %393, %395 : vector<2x96xf32>
    %c0_126 = arith.constant 0 : index
    %c0_127 = arith.constant 0 : index
    %397 = vector.load %arg10[%c0_126, %c0_127] : memref<1x96xf32, #tpu.memory_space<vmem>>, vector<1x96xf32>
    %398 = vector.broadcast %397 : vector<1x96xf32> to vector<2x96xf32>
    %399 = arith.addf %396, %398 : vector<2x96xf32>
    %400 = vector.extract_strided_slice %399 {offsets = [0, 0], sizes = [2, 32], strides = [1, 1]} : vector<2x96xf32> to vector<2x32xf32>
    %401 = vector.extract_strided_slice %399 {offsets = [0, 32], sizes = [2, 32], strides = [1, 1]} : vector<2x96xf32> to vector<2x32xf32>
    %402 = vector.extract_strided_slice %399 {offsets = [0, 64], sizes = [2, 32], strides = [1, 1]} : vector<2x96xf32> to vector<2x32xf32>
    %403 = arith.addf %400, %343 : vector<2x32xf32>
    %404 = arith.negf %403 : vector<2x32xf32>
    %405 = math.exp %404 : vector<2x32xf32>
    %cst_128 = arith.constant 1.000000e+00 : f32
    %406 = vector.broadcast %cst_128 : f32 to vector<2x32xf32>
    %407 = arith.addf %406, %405 : vector<2x32xf32>
    %408 = arith.divf %406, %407 : vector<2x32xf32>
    %409 = arith.addf %401, %344 : vector<2x32xf32>
    %410 = arith.negf %409 : vector<2x32xf32>
    %411 = math.exp %410 : vector<2x32xf32>
    %cst_129 = arith.constant 1.000000e+00 : f32
    %412 = vector.broadcast %cst_129 : f32 to vector<2x32xf32>
    %413 = arith.addf %412, %411 : vector<2x32xf32>
    %414 = arith.divf %412, %413 : vector<2x32xf32>
    %415 = arith.mulf %408, %345 : vector<2x32xf32>
    %416 = arith.addf %402, %415 : vector<2x32xf32>
    %417 = math.tanh %416 : vector<2x32xf32>
    %cst_130 = arith.constant 1.000000e+00 : f32
    %418 = vector.broadcast %cst_130 : f32 to vector<2x32xf32>
    %419 = arith.subf %418, %414 : vector<2x32xf32>
    %420 = arith.mulf %419, %417 : vector<2x32xf32>
    %421 = arith.mulf %414, %336 : vector<2x32xf32>
    %422 = arith.addf %420, %421 : vector<2x32xf32>
    %c0_131 = arith.constant 0 : index
    %c0_132 = arith.constant 0 : index
    %423 = vector.load %arg4[%c0_131, %c0_132] : memref<32x256xf32, #tpu.memory_space<vmem>>, vector<32x256xf32>
    %cst_133 = arith.constant dense<0.000000e+00> : vector<2x256xf32>
    %424 = tpu.matmul %422, %423, %cst_133 {dimension_numbers = #tpu.dot_dimension_numbers<[1], [0], [0], [1], [0, 0, 1, 1], [], []>} : vector<2x32xf32>, vector<32x256xf32>, vector<2x256xf32> -> vector<2x256xf32>
    %c0_134 = arith.constant 0 : index
    %c0_135 = arith.constant 0 : index
    %425 = vector.load %arg5[%c0_134, %c0_135] : memref<1x256xf32, #tpu.memory_space<vmem>>, vector<1x256xf32>
    %426 = vector.broadcast %425 : vector<1x256xf32> to vector<2x256xf32>
    %427 = arith.addf %424, %426 : vector<2x256xf32>
    %428 = vector.extract_strided_slice %427 {offsets = [0, 0], sizes = [2, 32], strides = [1, 1]} : vector<2x256xf32> to vector<2x32xf32>
    %429 = vector.extract_strided_slice %427 {offsets = [0, 32], sizes = [2, 32], strides = [1, 1]} : vector<2x256xf32> to vector<2x32xf32>
    %430 = vector.extract_strided_slice %427 {offsets = [0, 64], sizes = [2, 32], strides = [1, 1]} : vector<2x256xf32> to vector<2x32xf32>
    %431 = vector.extract_strided_slice %427 {offsets = [0, 96], sizes = [2, 32], strides = [1, 1]} : vector<2x256xf32> to vector<2x32xf32>
    %432 = vector.extract_strided_slice %427 {offsets = [0, 128], sizes = [2, 16], strides = [1, 1]} : vector<2x256xf32> to vector<2x16xf32>
    %cst_136 = arith.constant dense<0xFF800000> : vector<2xf32>
    %433 = vector.multi_reduction <maximumf>, %432, %cst_136 [1] : vector<2x16xf32> to vector<2xf32>
    %434 = vector.shape_cast %433 : vector<2xf32> to vector<2x1xf32>
    %435 = vector.broadcast %434 : vector<2x1xf32> to vector<2x16xf32>
    %436 = arith.subf %432, %435 : vector<2x16xf32>
    %437 = math.exp %436 : vector<2x16xf32>
    %cst_137 = arith.constant dense<0.000000e+00> : vector<2xf32>
    %438 = vector.multi_reduction <add>, %437, %cst_137 [1] : vector<2x16xf32> to vector<2xf32>
    %439 = vector.shape_cast %438 : vector<2xf32> to vector<2x1xf32>
    %440 = math.log %439 : vector<2x1xf32>
    %441 = vector.broadcast %440 : vector<2x1xf32> to vector<2x16xf32>
    %442 = arith.subf %436, %441 : vector<2x16xf32>
    %cst_138 = arith.constant dense<0xFF800000> : vector<2xf32>
    %443 = vector.multi_reduction <maximumf>, %432, %cst_138 [1] : vector<2x16xf32> to vector<2xf32>
    %444 = vector.shape_cast %443 : vector<2xf32> to vector<2x1xf32>
    %445 = vector.broadcast %444 : vector<2x1xf32> to vector<2x16xf32>
    %446 = arith.cmpf oge, %432, %445 : vector<2x16xf32>
    %c16_i32_139 = arith.constant 16 : i32
    %447 = vector.broadcast %c16_i32_139 : i32 to vector<2x16xi32>
    %448 = arith.select %446, %11, %447 : vector<2x16xi1>, vector<2x16xi32>
    %cst_140 = arith.constant dense<2147483647> : vector<2xi32>
    %449 = vector.multi_reduction <minsi>, %448, %cst_140 [1] : vector<2x16xi32> to vector<2xi32>
    %450 = vector.shape_cast %449 : vector<2xi32> to vector<2x1xi32>
    %451 = vector.broadcast %450 : vector<2x1xi32> to vector<2x16xi32>
    %452 = arith.cmpi eq, %11, %451 : vector<2x16xi32>
    %453 = arith.extui %452 : vector<2x16xi1> to vector<2x16xi32>
    %454 = arith.sitofp %453 : vector<2x16xi32> to vector<2x16xf32>
    %455 = vector.shape_cast %428 : vector<2x32xf32> to vector<2x1x32xf32>
    %456 = vector.broadcast %455 : vector<2x1x32xf32> to vector<2x10x32xf32>
    %457 = arith.addf %456, %7 : vector<2x10x32xf32>
    %458 = math.tanh %457 : vector<2x10x32xf32>
    %459 = vector.shape_cast %8 : vector<1x32xf32> to vector<1x1x32xf32>
    %460 = vector.broadcast %459 : vector<1x1x32xf32> to vector<2x10x32xf32>
    %461 = arith.mulf %458, %460 : vector<2x10x32xf32>
    %cst_141 = arith.constant dense<0.000000e+00> : vector<2x10xf32>
    %462 = vector.multi_reduction <add>, %461, %cst_141 [2] : vector<2x10x32xf32> to vector<2x10xf32>
    %463 = vector.broadcast %9 : vector<1x1xf32> to vector<2x10xf32>
    %464 = arith.addf %462, %463 : vector<2x10xf32>
    %cst_142 = arith.constant dense<0xFF800000> : vector<2xf32>
    %465 = vector.multi_reduction <maximumf>, %464, %cst_142 [1] : vector<2x10xf32> to vector<2xf32>
    %466 = vector.shape_cast %465 : vector<2xf32> to vector<2x1xf32>
    %467 = vector.broadcast %466 : vector<2x1xf32> to vector<2x10xf32>
    %468 = arith.subf %464, %467 : vector<2x10xf32>
    %469 = math.exp %468 : vector<2x10xf32>
    %cst_143 = arith.constant dense<0.000000e+00> : vector<2xf32>
    %470 = vector.multi_reduction <add>, %469, %cst_143 [1] : vector<2x10xf32> to vector<2xf32>
    %471 = vector.shape_cast %470 : vector<2xf32> to vector<2x1xf32>
    %472 = vector.broadcast %471 : vector<2x1xf32> to vector<2x10xf32>
    %473 = arith.divf %469, %472 : vector<2x10xf32>
    %474 = vector.shape_cast %473 : vector<2x10xf32> to vector<2x10x1xf32>
    %475 = vector.broadcast %474 : vector<2x10x1xf32> to vector<2x10x32xf32>
    %476 = arith.mulf %475, %0 : vector<2x10x32xf32>
    %cst_144 = arith.constant dense<0.000000e+00> : vector<2x32xf32>
    %477 = vector.multi_reduction <add>, %476, %cst_144 [1] : vector<2x10x32xf32> to vector<2x32xf32>
    %c0_145 = arith.constant 0 : index
    %c0_146 = arith.constant 0 : index
    %478 = vector.load %arg8[%c0_145, %c0_146] : memref<16x96xf32, #tpu.memory_space<vmem>>, vector<16x96xf32>
    %cst_147 = arith.constant dense<0.000000e+00> : vector<2x96xf32>
    %479 = tpu.matmul %454, %478, %cst_147 {dimension_numbers = #tpu.dot_dimension_numbers<[1], [0], [0], [1], [0, 0, 1, 1], [], []>} : vector<2x16xf32>, vector<16x96xf32>, vector<2x96xf32> -> vector<2x96xf32>
    %c0_148 = arith.constant 0 : index
    %c0_149 = arith.constant 0 : index
    %480 = vector.load %arg9[%c0_148, %c0_149] : memref<32x96xf32, #tpu.memory_space<vmem>>, vector<32x96xf32>
    %cst_150 = arith.constant dense<0.000000e+00> : vector<2x96xf32>
    %481 = tpu.matmul %477, %480, %cst_150 {dimension_numbers = #tpu.dot_dimension_numbers<[1], [0], [0], [1], [0, 0, 1, 1], [], []>} : vector<2x32xf32>, vector<32x96xf32>, vector<2x96xf32> -> vector<2x96xf32>
    %482 = arith.addf %479, %481 : vector<2x96xf32>
    %c0_151 = arith.constant 0 : index
    %c0_152 = arith.constant 0 : index
    %483 = vector.load %arg10[%c0_151, %c0_152] : memref<1x96xf32, #tpu.memory_space<vmem>>, vector<1x96xf32>
    %484 = vector.broadcast %483 : vector<1x96xf32> to vector<2x96xf32>
    %485 = arith.addf %482, %484 : vector<2x96xf32>
    %486 = vector.extract_strided_slice %485 {offsets = [0, 0], sizes = [2, 32], strides = [1, 1]} : vector<2x96xf32> to vector<2x32xf32>
    %487 = vector.extract_strided_slice %485 {offsets = [0, 32], sizes = [2, 32], strides = [1, 1]} : vector<2x96xf32> to vector<2x32xf32>
    %488 = vector.extract_strided_slice %485 {offsets = [0, 64], sizes = [2, 32], strides = [1, 1]} : vector<2x96xf32> to vector<2x32xf32>
    %489 = arith.addf %486, %429 : vector<2x32xf32>
    %490 = arith.negf %489 : vector<2x32xf32>
    %491 = math.exp %490 : vector<2x32xf32>
    %cst_153 = arith.constant 1.000000e+00 : f32
    %492 = vector.broadcast %cst_153 : f32 to vector<2x32xf32>
    %493 = arith.addf %492, %491 : vector<2x32xf32>
    %494 = arith.divf %492, %493 : vector<2x32xf32>
    %495 = arith.addf %487, %430 : vector<2x32xf32>
    %496 = arith.negf %495 : vector<2x32xf32>
    %497 = math.exp %496 : vector<2x32xf32>
    %cst_154 = arith.constant 1.000000e+00 : f32
    %498 = vector.broadcast %cst_154 : f32 to vector<2x32xf32>
    %499 = arith.addf %498, %497 : vector<2x32xf32>
    %500 = arith.divf %498, %499 : vector<2x32xf32>
    %501 = arith.mulf %494, %431 : vector<2x32xf32>
    %502 = arith.addf %488, %501 : vector<2x32xf32>
    %503 = math.tanh %502 : vector<2x32xf32>
    %cst_155 = arith.constant 1.000000e+00 : f32
    %504 = vector.broadcast %cst_155 : f32 to vector<2x32xf32>
    %505 = arith.subf %504, %500 : vector<2x32xf32>
    %506 = arith.mulf %505, %503 : vector<2x32xf32>
    %507 = arith.mulf %500, %422 : vector<2x32xf32>
    %508 = arith.addf %506, %507 : vector<2x32xf32>
    %c0_156 = arith.constant 0 : index
    %c0_157 = arith.constant 0 : index
    %509 = vector.load %arg4[%c0_156, %c0_157] : memref<32x256xf32, #tpu.memory_space<vmem>>, vector<32x256xf32>
    %cst_158 = arith.constant dense<0.000000e+00> : vector<2x256xf32>
    %510 = tpu.matmul %508, %509, %cst_158 {dimension_numbers = #tpu.dot_dimension_numbers<[1], [0], [0], [1], [0, 0, 1, 1], [], []>} : vector<2x32xf32>, vector<32x256xf32>, vector<2x256xf32> -> vector<2x256xf32>
    %c0_159 = arith.constant 0 : index
    %c0_160 = arith.constant 0 : index
    %511 = vector.load %arg5[%c0_159, %c0_160] : memref<1x256xf32, #tpu.memory_space<vmem>>, vector<1x256xf32>
    %512 = vector.broadcast %511 : vector<1x256xf32> to vector<2x256xf32>
    %513 = arith.addf %510, %512 : vector<2x256xf32>
    %514 = vector.extract_strided_slice %513 {offsets = [0, 0], sizes = [2, 32], strides = [1, 1]} : vector<2x256xf32> to vector<2x32xf32>
    %515 = vector.extract_strided_slice %513 {offsets = [0, 32], sizes = [2, 32], strides = [1, 1]} : vector<2x256xf32> to vector<2x32xf32>
    %516 = vector.extract_strided_slice %513 {offsets = [0, 64], sizes = [2, 32], strides = [1, 1]} : vector<2x256xf32> to vector<2x32xf32>
    %517 = vector.extract_strided_slice %513 {offsets = [0, 96], sizes = [2, 32], strides = [1, 1]} : vector<2x256xf32> to vector<2x32xf32>
    %518 = vector.extract_strided_slice %513 {offsets = [0, 128], sizes = [2, 16], strides = [1, 1]} : vector<2x256xf32> to vector<2x16xf32>
    %cst_161 = arith.constant dense<0xFF800000> : vector<2xf32>
    %519 = vector.multi_reduction <maximumf>, %518, %cst_161 [1] : vector<2x16xf32> to vector<2xf32>
    %520 = vector.shape_cast %519 : vector<2xf32> to vector<2x1xf32>
    %521 = vector.broadcast %520 : vector<2x1xf32> to vector<2x16xf32>
    %522 = arith.subf %518, %521 : vector<2x16xf32>
    %523 = math.exp %522 : vector<2x16xf32>
    %cst_162 = arith.constant dense<0.000000e+00> : vector<2xf32>
    %524 = vector.multi_reduction <add>, %523, %cst_162 [1] : vector<2x16xf32> to vector<2xf32>
    %525 = vector.shape_cast %524 : vector<2xf32> to vector<2x1xf32>
    %526 = math.log %525 : vector<2x1xf32>
    %527 = vector.broadcast %526 : vector<2x1xf32> to vector<2x16xf32>
    %528 = arith.subf %522, %527 : vector<2x16xf32>
    %cst_163 = arith.constant dense<0xFF800000> : vector<2xf32>
    %529 = vector.multi_reduction <maximumf>, %518, %cst_163 [1] : vector<2x16xf32> to vector<2xf32>
    %530 = vector.shape_cast %529 : vector<2xf32> to vector<2x1xf32>
    %531 = vector.broadcast %530 : vector<2x1xf32> to vector<2x16xf32>
    %532 = arith.cmpf oge, %518, %531 : vector<2x16xf32>
    %c16_i32_164 = arith.constant 16 : i32
    %533 = vector.broadcast %c16_i32_164 : i32 to vector<2x16xi32>
    %534 = arith.select %532, %11, %533 : vector<2x16xi1>, vector<2x16xi32>
    %cst_165 = arith.constant dense<2147483647> : vector<2xi32>
    %535 = vector.multi_reduction <minsi>, %534, %cst_165 [1] : vector<2x16xi32> to vector<2xi32>
    %536 = vector.shape_cast %535 : vector<2xi32> to vector<2x1xi32>
    %537 = vector.broadcast %536 : vector<2x1xi32> to vector<2x16xi32>
    %538 = arith.cmpi eq, %11, %537 : vector<2x16xi32>
    %539 = arith.extui %538 : vector<2x16xi1> to vector<2x16xi32>
    %540 = arith.sitofp %539 : vector<2x16xi32> to vector<2x16xf32>
    %541 = vector.shape_cast %514 : vector<2x32xf32> to vector<2x1x32xf32>
    %542 = vector.broadcast %541 : vector<2x1x32xf32> to vector<2x10x32xf32>
    %543 = arith.addf %542, %7 : vector<2x10x32xf32>
    %544 = math.tanh %543 : vector<2x10x32xf32>
    %545 = vector.shape_cast %8 : vector<1x32xf32> to vector<1x1x32xf32>
    %546 = vector.broadcast %545 : vector<1x1x32xf32> to vector<2x10x32xf32>
    %547 = arith.mulf %544, %546 : vector<2x10x32xf32>
    %cst_166 = arith.constant dense<0.000000e+00> : vector<2x10xf32>
    %548 = vector.multi_reduction <add>, %547, %cst_166 [2] : vector<2x10x32xf32> to vector<2x10xf32>
    %549 = vector.broadcast %9 : vector<1x1xf32> to vector<2x10xf32>
    %550 = arith.addf %548, %549 : vector<2x10xf32>
    %cst_167 = arith.constant dense<0xFF800000> : vector<2xf32>
    %551 = vector.multi_reduction <maximumf>, %550, %cst_167 [1] : vector<2x10xf32> to vector<2xf32>
    %552 = vector.shape_cast %551 : vector<2xf32> to vector<2x1xf32>
    %553 = vector.broadcast %552 : vector<2x1xf32> to vector<2x10xf32>
    %554 = arith.subf %550, %553 : vector<2x10xf32>
    %555 = math.exp %554 : vector<2x10xf32>
    %cst_168 = arith.constant dense<0.000000e+00> : vector<2xf32>
    %556 = vector.multi_reduction <add>, %555, %cst_168 [1] : vector<2x10xf32> to vector<2xf32>
    %557 = vector.shape_cast %556 : vector<2xf32> to vector<2x1xf32>
    %558 = vector.broadcast %557 : vector<2x1xf32> to vector<2x10xf32>
    %559 = arith.divf %555, %558 : vector<2x10xf32>
    %560 = vector.shape_cast %559 : vector<2x10xf32> to vector<2x10x1xf32>
    %561 = vector.broadcast %560 : vector<2x10x1xf32> to vector<2x10x32xf32>
    %562 = arith.mulf %561, %0 : vector<2x10x32xf32>
    %cst_169 = arith.constant dense<0.000000e+00> : vector<2x32xf32>
    %563 = vector.multi_reduction <add>, %562, %cst_169 [1] : vector<2x10x32xf32> to vector<2x32xf32>
    %c0_170 = arith.constant 0 : index
    %c0_171 = arith.constant 0 : index
    %564 = vector.load %arg8[%c0_170, %c0_171] : memref<16x96xf32, #tpu.memory_space<vmem>>, vector<16x96xf32>
    %cst_172 = arith.constant dense<0.000000e+00> : vector<2x96xf32>
    %565 = tpu.matmul %540, %564, %cst_172 {dimension_numbers = #tpu.dot_dimension_numbers<[1], [0], [0], [1], [0, 0, 1, 1], [], []>} : vector<2x16xf32>, vector<16x96xf32>, vector<2x96xf32> -> vector<2x96xf32>
    %c0_173 = arith.constant 0 : index
    %c0_174 = arith.constant 0 : index
    %566 = vector.load %arg9[%c0_173, %c0_174] : memref<32x96xf32, #tpu.memory_space<vmem>>, vector<32x96xf32>
    %cst_175 = arith.constant dense<0.000000e+00> : vector<2x96xf32>
    %567 = tpu.matmul %563, %566, %cst_175 {dimension_numbers = #tpu.dot_dimension_numbers<[1], [0], [0], [1], [0, 0, 1, 1], [], []>} : vector<2x32xf32>, vector<32x96xf32>, vector<2x96xf32> -> vector<2x96xf32>
    %568 = arith.addf %565, %567 : vector<2x96xf32>
    %c0_176 = arith.constant 0 : index
    %c0_177 = arith.constant 0 : index
    %569 = vector.load %arg10[%c0_176, %c0_177] : memref<1x96xf32, #tpu.memory_space<vmem>>, vector<1x96xf32>
    %570 = vector.broadcast %569 : vector<1x96xf32> to vector<2x96xf32>
    %571 = arith.addf %568, %570 : vector<2x96xf32>
    %572 = vector.extract_strided_slice %571 {offsets = [0, 0], sizes = [2, 32], strides = [1, 1]} : vector<2x96xf32> to vector<2x32xf32>
    %573 = vector.extract_strided_slice %571 {offsets = [0, 32], sizes = [2, 32], strides = [1, 1]} : vector<2x96xf32> to vector<2x32xf32>
    %574 = vector.extract_strided_slice %571 {offsets = [0, 64], sizes = [2, 32], strides = [1, 1]} : vector<2x96xf32> to vector<2x32xf32>
    %575 = arith.addf %572, %515 : vector<2x32xf32>
    %576 = arith.negf %575 : vector<2x32xf32>
    %577 = math.exp %576 : vector<2x32xf32>
    %cst_178 = arith.constant 1.000000e+00 : f32
    %578 = vector.broadcast %cst_178 : f32 to vector<2x32xf32>
    %579 = arith.addf %578, %577 : vector<2x32xf32>
    %580 = arith.divf %578, %579 : vector<2x32xf32>
    %581 = arith.addf %573, %516 : vector<2x32xf32>
    %582 = arith.negf %581 : vector<2x32xf32>
    %583 = math.exp %582 : vector<2x32xf32>
    %cst_179 = arith.constant 1.000000e+00 : f32
    %584 = vector.broadcast %cst_179 : f32 to vector<2x32xf32>
    %585 = arith.addf %584, %583 : vector<2x32xf32>
    %586 = arith.divf %584, %585 : vector<2x32xf32>
    %587 = arith.mulf %580, %517 : vector<2x32xf32>
    %588 = arith.addf %574, %587 : vector<2x32xf32>
    %589 = math.tanh %588 : vector<2x32xf32>
    %cst_180 = arith.constant 1.000000e+00 : f32
    %590 = vector.broadcast %cst_180 : f32 to vector<2x32xf32>
    %591 = arith.subf %590, %586 : vector<2x32xf32>
    %592 = arith.mulf %591, %589 : vector<2x32xf32>
    %593 = arith.mulf %586, %508 : vector<2x32xf32>
    %594 = arith.addf %592, %593 : vector<2x32xf32>
    %c0_181 = arith.constant 0 : index
    %c0_182 = arith.constant 0 : index
    %595 = vector.load %arg4[%c0_181, %c0_182] : memref<32x256xf32, #tpu.memory_space<vmem>>, vector<32x256xf32>
    %cst_183 = arith.constant dense<0.000000e+00> : vector<2x256xf32>
    %596 = tpu.matmul %594, %595, %cst_183 {dimension_numbers = #tpu.dot_dimension_numbers<[1], [0], [0], [1], [0, 0, 1, 1], [], []>} : vector<2x32xf32>, vector<32x256xf32>, vector<2x256xf32> -> vector<2x256xf32>
    %c0_184 = arith.constant 0 : index
    %c0_185 = arith.constant 0 : index
    %597 = vector.load %arg5[%c0_184, %c0_185] : memref<1x256xf32, #tpu.memory_space<vmem>>, vector<1x256xf32>
    %598 = vector.broadcast %597 : vector<1x256xf32> to vector<2x256xf32>
    %599 = arith.addf %596, %598 : vector<2x256xf32>
    %600 = vector.extract_strided_slice %599 {offsets = [0, 0], sizes = [2, 32], strides = [1, 1]} : vector<2x256xf32> to vector<2x32xf32>
    %601 = vector.extract_strided_slice %599 {offsets = [0, 32], sizes = [2, 32], strides = [1, 1]} : vector<2x256xf32> to vector<2x32xf32>
    %602 = vector.extract_strided_slice %599 {offsets = [0, 64], sizes = [2, 32], strides = [1, 1]} : vector<2x256xf32> to vector<2x32xf32>
    %603 = vector.extract_strided_slice %599 {offsets = [0, 96], sizes = [2, 32], strides = [1, 1]} : vector<2x256xf32> to vector<2x32xf32>
    %604 = vector.extract_strided_slice %599 {offsets = [0, 128], sizes = [2, 16], strides = [1, 1]} : vector<2x256xf32> to vector<2x16xf32>
    %cst_186 = arith.constant dense<0xFF800000> : vector<2xf32>
    %605 = vector.multi_reduction <maximumf>, %604, %cst_186 [1] : vector<2x16xf32> to vector<2xf32>
    %606 = vector.shape_cast %605 : vector<2xf32> to vector<2x1xf32>
    %607 = vector.broadcast %606 : vector<2x1xf32> to vector<2x16xf32>
    %608 = arith.subf %604, %607 : vector<2x16xf32>
    %609 = math.exp %608 : vector<2x16xf32>
    %cst_187 = arith.constant dense<0.000000e+00> : vector<2xf32>
    %610 = vector.multi_reduction <add>, %609, %cst_187 [1] : vector<2x16xf32> to vector<2xf32>
    %611 = vector.shape_cast %610 : vector<2xf32> to vector<2x1xf32>
    %612 = math.log %611 : vector<2x1xf32>
    %613 = vector.broadcast %612 : vector<2x1xf32> to vector<2x16xf32>
    %614 = arith.subf %608, %613 : vector<2x16xf32>
    %cst_188 = arith.constant dense<0xFF800000> : vector<2xf32>
    %615 = vector.multi_reduction <maximumf>, %604, %cst_188 [1] : vector<2x16xf32> to vector<2xf32>
    %616 = vector.shape_cast %615 : vector<2xf32> to vector<2x1xf32>
    %617 = vector.broadcast %616 : vector<2x1xf32> to vector<2x16xf32>
    %618 = arith.cmpf oge, %604, %617 : vector<2x16xf32>
    %c16_i32_189 = arith.constant 16 : i32
    %619 = vector.broadcast %c16_i32_189 : i32 to vector<2x16xi32>
    %620 = arith.select %618, %11, %619 : vector<2x16xi1>, vector<2x16xi32>
    %cst_190 = arith.constant dense<2147483647> : vector<2xi32>
    %621 = vector.multi_reduction <minsi>, %620, %cst_190 [1] : vector<2x16xi32> to vector<2xi32>
    %622 = vector.shape_cast %621 : vector<2xi32> to vector<2x1xi32>
    %623 = vector.broadcast %622 : vector<2x1xi32> to vector<2x16xi32>
    %624 = arith.cmpi eq, %11, %623 : vector<2x16xi32>
    %625 = arith.extui %624 : vector<2x16xi1> to vector<2x16xi32>
    %626 = arith.sitofp %625 : vector<2x16xi32> to vector<2x16xf32>
    %627 = vector.shape_cast %600 : vector<2x32xf32> to vector<2x1x32xf32>
    %628 = vector.broadcast %627 : vector<2x1x32xf32> to vector<2x10x32xf32>
    %629 = arith.addf %628, %7 : vector<2x10x32xf32>
    %630 = math.tanh %629 : vector<2x10x32xf32>
    %631 = vector.shape_cast %8 : vector<1x32xf32> to vector<1x1x32xf32>
    %632 = vector.broadcast %631 : vector<1x1x32xf32> to vector<2x10x32xf32>
    %633 = arith.mulf %630, %632 : vector<2x10x32xf32>
    %cst_191 = arith.constant dense<0.000000e+00> : vector<2x10xf32>
    %634 = vector.multi_reduction <add>, %633, %cst_191 [2] : vector<2x10x32xf32> to vector<2x10xf32>
    %635 = vector.broadcast %9 : vector<1x1xf32> to vector<2x10xf32>
    %636 = arith.addf %634, %635 : vector<2x10xf32>
    %cst_192 = arith.constant dense<0xFF800000> : vector<2xf32>
    %637 = vector.multi_reduction <maximumf>, %636, %cst_192 [1] : vector<2x10xf32> to vector<2xf32>
    %638 = vector.shape_cast %637 : vector<2xf32> to vector<2x1xf32>
    %639 = vector.broadcast %638 : vector<2x1xf32> to vector<2x10xf32>
    %640 = arith.subf %636, %639 : vector<2x10xf32>
    %641 = math.exp %640 : vector<2x10xf32>
    %cst_193 = arith.constant dense<0.000000e+00> : vector<2xf32>
    %642 = vector.multi_reduction <add>, %641, %cst_193 [1] : vector<2x10xf32> to vector<2xf32>
    %643 = vector.shape_cast %642 : vector<2xf32> to vector<2x1xf32>
    %644 = vector.broadcast %643 : vector<2x1xf32> to vector<2x10xf32>
    %645 = arith.divf %641, %644 : vector<2x10xf32>
    %646 = vector.shape_cast %645 : vector<2x10xf32> to vector<2x10x1xf32>
    %647 = vector.broadcast %646 : vector<2x10x1xf32> to vector<2x10x32xf32>
    %648 = arith.mulf %647, %0 : vector<2x10x32xf32>
    %cst_194 = arith.constant dense<0.000000e+00> : vector<2x32xf32>
    %649 = vector.multi_reduction <add>, %648, %cst_194 [1] : vector<2x10x32xf32> to vector<2x32xf32>
    %c0_195 = arith.constant 0 : index
    %c0_196 = arith.constant 0 : index
    %650 = vector.load %arg8[%c0_195, %c0_196] : memref<16x96xf32, #tpu.memory_space<vmem>>, vector<16x96xf32>
    %cst_197 = arith.constant dense<0.000000e+00> : vector<2x96xf32>
    %651 = tpu.matmul %626, %650, %cst_197 {dimension_numbers = #tpu.dot_dimension_numbers<[1], [0], [0], [1], [0, 0, 1, 1], [], []>} : vector<2x16xf32>, vector<16x96xf32>, vector<2x96xf32> -> vector<2x96xf32>
    %c0_198 = arith.constant 0 : index
    %c0_199 = arith.constant 0 : index
    %652 = vector.load %arg9[%c0_198, %c0_199] : memref<32x96xf32, #tpu.memory_space<vmem>>, vector<32x96xf32>
    %cst_200 = arith.constant dense<0.000000e+00> : vector<2x96xf32>
    %653 = tpu.matmul %649, %652, %cst_200 {dimension_numbers = #tpu.dot_dimension_numbers<[1], [0], [0], [1], [0, 0, 1, 1], [], []>} : vector<2x32xf32>, vector<32x96xf32>, vector<2x96xf32> -> vector<2x96xf32>
    %654 = arith.addf %651, %653 : vector<2x96xf32>
    %c0_201 = arith.constant 0 : index
    %c0_202 = arith.constant 0 : index
    %655 = vector.load %arg10[%c0_201, %c0_202] : memref<1x96xf32, #tpu.memory_space<vmem>>, vector<1x96xf32>
    %656 = vector.broadcast %655 : vector<1x96xf32> to vector<2x96xf32>
    %657 = arith.addf %654, %656 : vector<2x96xf32>
    %658 = vector.extract_strided_slice %657 {offsets = [0, 0], sizes = [2, 32], strides = [1, 1]} : vector<2x96xf32> to vector<2x32xf32>
    %659 = vector.extract_strided_slice %657 {offsets = [0, 32], sizes = [2, 32], strides = [1, 1]} : vector<2x96xf32> to vector<2x32xf32>
    %660 = vector.extract_strided_slice %657 {offsets = [0, 64], sizes = [2, 32], strides = [1, 1]} : vector<2x96xf32> to vector<2x32xf32>
    %661 = arith.addf %658, %601 : vector<2x32xf32>
    %662 = arith.negf %661 : vector<2x32xf32>
    %663 = math.exp %662 : vector<2x32xf32>
    %cst_203 = arith.constant 1.000000e+00 : f32
    %664 = vector.broadcast %cst_203 : f32 to vector<2x32xf32>
    %665 = arith.addf %664, %663 : vector<2x32xf32>
    %666 = arith.divf %664, %665 : vector<2x32xf32>
    %667 = arith.addf %659, %602 : vector<2x32xf32>
    %668 = arith.negf %667 : vector<2x32xf32>
    %669 = math.exp %668 : vector<2x32xf32>
    %cst_204 = arith.constant 1.000000e+00 : f32
    %670 = vector.broadcast %cst_204 : f32 to vector<2x32xf32>
    %671 = arith.addf %670, %669 : vector<2x32xf32>
    %672 = arith.divf %670, %671 : vector<2x32xf32>
    %673 = arith.mulf %666, %603 : vector<2x32xf32>
    %674 = arith.addf %660, %673 : vector<2x32xf32>
    %675 = math.tanh %674 : vector<2x32xf32>
    %cst_205 = arith.constant 1.000000e+00 : f32
    %676 = vector.broadcast %cst_205 : f32 to vector<2x32xf32>
    %677 = arith.subf %676, %672 : vector<2x32xf32>
    %678 = arith.mulf %677, %675 : vector<2x32xf32>
    %679 = arith.mulf %672, %594 : vector<2x32xf32>
    %680 = arith.addf %678, %679 : vector<2x32xf32>
    %c0_206 = arith.constant 0 : index
    %c0_207 = arith.constant 0 : index
    %681 = vector.load %arg4[%c0_206, %c0_207] : memref<32x256xf32, #tpu.memory_space<vmem>>, vector<32x256xf32>
    %cst_208 = arith.constant dense<0.000000e+00> : vector<2x256xf32>
    %682 = tpu.matmul %680, %681, %cst_208 {dimension_numbers = #tpu.dot_dimension_numbers<[1], [0], [0], [1], [0, 0, 1, 1], [], []>} : vector<2x32xf32>, vector<32x256xf32>, vector<2x256xf32> -> vector<2x256xf32>
    %c0_209 = arith.constant 0 : index
    %c0_210 = arith.constant 0 : index
    %683 = vector.load %arg5[%c0_209, %c0_210] : memref<1x256xf32, #tpu.memory_space<vmem>>, vector<1x256xf32>
    %684 = vector.broadcast %683 : vector<1x256xf32> to vector<2x256xf32>
    %685 = arith.addf %682, %684 : vector<2x256xf32>
    %686 = vector.extract_strided_slice %685 {offsets = [0, 0], sizes = [2, 32], strides = [1, 1]} : vector<2x256xf32> to vector<2x32xf32>
    %687 = vector.extract_strided_slice %685 {offsets = [0, 32], sizes = [2, 32], strides = [1, 1]} : vector<2x256xf32> to vector<2x32xf32>
    %688 = vector.extract_strided_slice %685 {offsets = [0, 64], sizes = [2, 32], strides = [1, 1]} : vector<2x256xf32> to vector<2x32xf32>
    %689 = vector.extract_strided_slice %685 {offsets = [0, 96], sizes = [2, 32], strides = [1, 1]} : vector<2x256xf32> to vector<2x32xf32>
    %690 = vector.extract_strided_slice %685 {offsets = [0, 128], sizes = [2, 16], strides = [1, 1]} : vector<2x256xf32> to vector<2x16xf32>
    %cst_211 = arith.constant dense<0xFF800000> : vector<2xf32>
    %691 = vector.multi_reduction <maximumf>, %690, %cst_211 [1] : vector<2x16xf32> to vector<2xf32>
    %692 = vector.shape_cast %691 : vector<2xf32> to vector<2x1xf32>
    %693 = vector.broadcast %692 : vector<2x1xf32> to vector<2x16xf32>
    %694 = arith.subf %690, %693 : vector<2x16xf32>
    %695 = math.exp %694 : vector<2x16xf32>
    %cst_212 = arith.constant dense<0.000000e+00> : vector<2xf32>
    %696 = vector.multi_reduction <add>, %695, %cst_212 [1] : vector<2x16xf32> to vector<2xf32>
    %697 = vector.shape_cast %696 : vector<2xf32> to vector<2x1xf32>
    %698 = math.log %697 : vector<2x1xf32>
    %699 = vector.broadcast %698 : vector<2x1xf32> to vector<2x16xf32>
    %700 = arith.subf %694, %699 : vector<2x16xf32>
    %cst_213 = arith.constant dense<0xFF800000> : vector<2xf32>
    %701 = vector.multi_reduction <maximumf>, %690, %cst_213 [1] : vector<2x16xf32> to vector<2xf32>
    %702 = vector.shape_cast %701 : vector<2xf32> to vector<2x1xf32>
    %703 = vector.broadcast %702 : vector<2x1xf32> to vector<2x16xf32>
    %704 = arith.cmpf oge, %690, %703 : vector<2x16xf32>
    %c16_i32_214 = arith.constant 16 : i32
    %705 = vector.broadcast %c16_i32_214 : i32 to vector<2x16xi32>
    %706 = arith.select %704, %11, %705 : vector<2x16xi1>, vector<2x16xi32>
    %cst_215 = arith.constant dense<2147483647> : vector<2xi32>
    %707 = vector.multi_reduction <minsi>, %706, %cst_215 [1] : vector<2x16xi32> to vector<2xi32>
    %708 = vector.shape_cast %707 : vector<2xi32> to vector<2x1xi32>
    %709 = vector.broadcast %708 : vector<2x1xi32> to vector<2x16xi32>
    %710 = arith.cmpi eq, %11, %709 : vector<2x16xi32>
    %711 = arith.extui %710 : vector<2x16xi1> to vector<2x16xi32>
    %712 = arith.sitofp %711 : vector<2x16xi32> to vector<2x16xf32>
    %713 = vector.shape_cast %686 : vector<2x32xf32> to vector<2x1x32xf32>
    %714 = vector.broadcast %713 : vector<2x1x32xf32> to vector<2x10x32xf32>
    %715 = arith.addf %714, %7 : vector<2x10x32xf32>
    %716 = math.tanh %715 : vector<2x10x32xf32>
    %717 = vector.shape_cast %8 : vector<1x32xf32> to vector<1x1x32xf32>
    %718 = vector.broadcast %717 : vector<1x1x32xf32> to vector<2x10x32xf32>
    %719 = arith.mulf %716, %718 : vector<2x10x32xf32>
    %cst_216 = arith.constant dense<0.000000e+00> : vector<2x10xf32>
    %720 = vector.multi_reduction <add>, %719, %cst_216 [2] : vector<2x10x32xf32> to vector<2x10xf32>
    %721 = vector.broadcast %9 : vector<1x1xf32> to vector<2x10xf32>
    %722 = arith.addf %720, %721 : vector<2x10xf32>
    %cst_217 = arith.constant dense<0xFF800000> : vector<2xf32>
    %723 = vector.multi_reduction <maximumf>, %722, %cst_217 [1] : vector<2x10xf32> to vector<2xf32>
    %724 = vector.shape_cast %723 : vector<2xf32> to vector<2x1xf32>
    %725 = vector.broadcast %724 : vector<2x1xf32> to vector<2x10xf32>
    %726 = arith.subf %722, %725 : vector<2x10xf32>
    %727 = math.exp %726 : vector<2x10xf32>
    %cst_218 = arith.constant dense<0.000000e+00> : vector<2xf32>
    %728 = vector.multi_reduction <add>, %727, %cst_218 [1] : vector<2x10xf32> to vector<2xf32>
    %729 = vector.shape_cast %728 : vector<2xf32> to vector<2x1xf32>
    %730 = vector.broadcast %729 : vector<2x1xf32> to vector<2x10xf32>
    %731 = arith.divf %727, %730 : vector<2x10xf32>
    %732 = vector.shape_cast %731 : vector<2x10xf32> to vector<2x10x1xf32>
    %733 = vector.broadcast %732 : vector<2x10x1xf32> to vector<2x10x32xf32>
    %734 = arith.mulf %733, %0 : vector<2x10x32xf32>
    %cst_219 = arith.constant dense<0.000000e+00> : vector<2x32xf32>
    %735 = vector.multi_reduction <add>, %734, %cst_219 [1] : vector<2x10x32xf32> to vector<2x32xf32>
    %c0_220 = arith.constant 0 : index
    %c0_221 = arith.constant 0 : index
    %736 = vector.load %arg8[%c0_220, %c0_221] : memref<16x96xf32, #tpu.memory_space<vmem>>, vector<16x96xf32>
    %cst_222 = arith.constant dense<0.000000e+00> : vector<2x96xf32>
    %737 = tpu.matmul %712, %736, %cst_222 {dimension_numbers = #tpu.dot_dimension_numbers<[1], [0], [0], [1], [0, 0, 1, 1], [], []>} : vector<2x16xf32>, vector<16x96xf32>, vector<2x96xf32> -> vector<2x96xf32>
    %c0_223 = arith.constant 0 : index
    %c0_224 = arith.constant 0 : index
    %738 = vector.load %arg9[%c0_223, %c0_224] : memref<32x96xf32, #tpu.memory_space<vmem>>, vector<32x96xf32>
    %cst_225 = arith.constant dense<0.000000e+00> : vector<2x96xf32>
    %739 = tpu.matmul %735, %738, %cst_225 {dimension_numbers = #tpu.dot_dimension_numbers<[1], [0], [0], [1], [0, 0, 1, 1], [], []>} : vector<2x32xf32>, vector<32x96xf32>, vector<2x96xf32> -> vector<2x96xf32>
    %740 = arith.addf %737, %739 : vector<2x96xf32>
    %c0_226 = arith.constant 0 : index
    %c0_227 = arith.constant 0 : index
    %741 = vector.load %arg10[%c0_226, %c0_227] : memref<1x96xf32, #tpu.memory_space<vmem>>, vector<1x96xf32>
    %742 = vector.broadcast %741 : vector<1x96xf32> to vector<2x96xf32>
    %743 = arith.addf %740, %742 : vector<2x96xf32>
    %744 = vector.extract_strided_slice %743 {offsets = [0, 0], sizes = [2, 32], strides = [1, 1]} : vector<2x96xf32> to vector<2x32xf32>
    %745 = vector.extract_strided_slice %743 {offsets = [0, 32], sizes = [2, 32], strides = [1, 1]} : vector<2x96xf32> to vector<2x32xf32>
    %746 = vector.extract_strided_slice %743 {offsets = [0, 64], sizes = [2, 32], strides = [1, 1]} : vector<2x96xf32> to vector<2x32xf32>
    %747 = arith.addf %744, %687 : vector<2x32xf32>
    %748 = arith.negf %747 : vector<2x32xf32>
    %749 = math.exp %748 : vector<2x32xf32>
    %cst_228 = arith.constant 1.000000e+00 : f32
    %750 = vector.broadcast %cst_228 : f32 to vector<2x32xf32>
    %751 = arith.addf %750, %749 : vector<2x32xf32>
    %752 = arith.divf %750, %751 : vector<2x32xf32>
    %753 = arith.addf %745, %688 : vector<2x32xf32>
    %754 = arith.negf %753 : vector<2x32xf32>
    %755 = math.exp %754 : vector<2x32xf32>
    %cst_229 = arith.constant 1.000000e+00 : f32
    %756 = vector.broadcast %cst_229 : f32 to vector<2x32xf32>
    %757 = arith.addf %756, %755 : vector<2x32xf32>
    %758 = arith.divf %756, %757 : vector<2x32xf32>
    %759 = arith.mulf %752, %689 : vector<2x32xf32>
    %760 = arith.addf %746, %759 : vector<2x32xf32>
    %761 = math.tanh %760 : vector<2x32xf32>
    %cst_230 = arith.constant 1.000000e+00 : f32
    %762 = vector.broadcast %cst_230 : f32 to vector<2x32xf32>
    %763 = arith.subf %762, %758 : vector<2x32xf32>
    %764 = arith.mulf %763, %761 : vector<2x32xf32>
    %765 = arith.mulf %758, %680 : vector<2x32xf32>
    %766 = arith.addf %764, %765 : vector<2x32xf32>
    %c0_231 = arith.constant 0 : index
    %c0_232 = arith.constant 0 : index
    %767 = vector.load %arg4[%c0_231, %c0_232] : memref<32x256xf32, #tpu.memory_space<vmem>>, vector<32x256xf32>
    %cst_233 = arith.constant dense<0.000000e+00> : vector<2x256xf32>
    %768 = tpu.matmul %766, %767, %cst_233 {dimension_numbers = #tpu.dot_dimension_numbers<[1], [0], [0], [1], [0, 0, 1, 1], [], []>} : vector<2x32xf32>, vector<32x256xf32>, vector<2x256xf32> -> vector<2x256xf32>
    %c0_234 = arith.constant 0 : index
    %c0_235 = arith.constant 0 : index
    %769 = vector.load %arg5[%c0_234, %c0_235] : memref<1x256xf32, #tpu.memory_space<vmem>>, vector<1x256xf32>
    %770 = vector.broadcast %769 : vector<1x256xf32> to vector<2x256xf32>
    %771 = arith.addf %768, %770 : vector<2x256xf32>
    %772 = vector.extract_strided_slice %771 {offsets = [0, 0], sizes = [2, 32], strides = [1, 1]} : vector<2x256xf32> to vector<2x32xf32>
    %773 = vector.extract_strided_slice %771 {offsets = [0, 32], sizes = [2, 32], strides = [1, 1]} : vector<2x256xf32> to vector<2x32xf32>
    %774 = vector.extract_strided_slice %771 {offsets = [0, 64], sizes = [2, 32], strides = [1, 1]} : vector<2x256xf32> to vector<2x32xf32>
    %775 = vector.extract_strided_slice %771 {offsets = [0, 96], sizes = [2, 32], strides = [1, 1]} : vector<2x256xf32> to vector<2x32xf32>
    %776 = vector.extract_strided_slice %771 {offsets = [0, 128], sizes = [2, 16], strides = [1, 1]} : vector<2x256xf32> to vector<2x16xf32>
    %cst_236 = arith.constant dense<0xFF800000> : vector<2xf32>
    %777 = vector.multi_reduction <maximumf>, %776, %cst_236 [1] : vector<2x16xf32> to vector<2xf32>
    %778 = vector.shape_cast %777 : vector<2xf32> to vector<2x1xf32>
    %779 = vector.broadcast %778 : vector<2x1xf32> to vector<2x16xf32>
    %780 = arith.subf %776, %779 : vector<2x16xf32>
    %781 = math.exp %780 : vector<2x16xf32>
    %cst_237 = arith.constant dense<0.000000e+00> : vector<2xf32>
    %782 = vector.multi_reduction <add>, %781, %cst_237 [1] : vector<2x16xf32> to vector<2xf32>
    %783 = vector.shape_cast %782 : vector<2xf32> to vector<2x1xf32>
    %784 = math.log %783 : vector<2x1xf32>
    %785 = vector.broadcast %784 : vector<2x1xf32> to vector<2x16xf32>
    %786 = arith.subf %780, %785 : vector<2x16xf32>
    %cst_238 = arith.constant dense<0xFF800000> : vector<2xf32>
    %787 = vector.multi_reduction <maximumf>, %776, %cst_238 [1] : vector<2x16xf32> to vector<2xf32>
    %788 = vector.shape_cast %787 : vector<2xf32> to vector<2x1xf32>
    %789 = vector.broadcast %788 : vector<2x1xf32> to vector<2x16xf32>
    %790 = arith.cmpf oge, %776, %789 : vector<2x16xf32>
    %c16_i32_239 = arith.constant 16 : i32
    %791 = vector.broadcast %c16_i32_239 : i32 to vector<2x16xi32>
    %792 = arith.select %790, %11, %791 : vector<2x16xi1>, vector<2x16xi32>
    %cst_240 = arith.constant dense<2147483647> : vector<2xi32>
    %793 = vector.multi_reduction <minsi>, %792, %cst_240 [1] : vector<2x16xi32> to vector<2xi32>
    %794 = vector.shape_cast %793 : vector<2xi32> to vector<2x1xi32>
    %795 = vector.broadcast %794 : vector<2x1xi32> to vector<2x16xi32>
    %796 = arith.cmpi eq, %11, %795 : vector<2x16xi32>
    %797 = arith.extui %796 : vector<2x16xi1> to vector<2x16xi32>
    %798 = arith.sitofp %797 : vector<2x16xi32> to vector<2x16xf32>
    %799 = vector.shape_cast %772 : vector<2x32xf32> to vector<2x1x32xf32>
    %800 = vector.broadcast %799 : vector<2x1x32xf32> to vector<2x10x32xf32>
    %801 = arith.addf %800, %7 : vector<2x10x32xf32>
    %802 = math.tanh %801 : vector<2x10x32xf32>
    %803 = vector.shape_cast %8 : vector<1x32xf32> to vector<1x1x32xf32>
    %804 = vector.broadcast %803 : vector<1x1x32xf32> to vector<2x10x32xf32>
    %805 = arith.mulf %802, %804 : vector<2x10x32xf32>
    %cst_241 = arith.constant dense<0.000000e+00> : vector<2x10xf32>
    %806 = vector.multi_reduction <add>, %805, %cst_241 [2] : vector<2x10x32xf32> to vector<2x10xf32>
    %807 = vector.broadcast %9 : vector<1x1xf32> to vector<2x10xf32>
    %808 = arith.addf %806, %807 : vector<2x10xf32>
    %cst_242 = arith.constant dense<0xFF800000> : vector<2xf32>
    %809 = vector.multi_reduction <maximumf>, %808, %cst_242 [1] : vector<2x10xf32> to vector<2xf32>
    %810 = vector.shape_cast %809 : vector<2xf32> to vector<2x1xf32>
    %811 = vector.broadcast %810 : vector<2x1xf32> to vector<2x10xf32>
    %812 = arith.subf %808, %811 : vector<2x10xf32>
    %813 = math.exp %812 : vector<2x10xf32>
    %cst_243 = arith.constant dense<0.000000e+00> : vector<2xf32>
    %814 = vector.multi_reduction <add>, %813, %cst_243 [1] : vector<2x10xf32> to vector<2xf32>
    %815 = vector.shape_cast %814 : vector<2xf32> to vector<2x1xf32>
    %816 = vector.broadcast %815 : vector<2x1xf32> to vector<2x10xf32>
    %817 = arith.divf %813, %816 : vector<2x10xf32>
    %818 = vector.shape_cast %817 : vector<2x10xf32> to vector<2x10x1xf32>
    %819 = vector.broadcast %818 : vector<2x10x1xf32> to vector<2x10x32xf32>
    %820 = arith.mulf %819, %0 : vector<2x10x32xf32>
    %cst_244 = arith.constant dense<0.000000e+00> : vector<2x32xf32>
    %821 = vector.multi_reduction <add>, %820, %cst_244 [1] : vector<2x10x32xf32> to vector<2x32xf32>
    %c0_245 = arith.constant 0 : index
    %c0_246 = arith.constant 0 : index
    %822 = vector.load %arg8[%c0_245, %c0_246] : memref<16x96xf32, #tpu.memory_space<vmem>>, vector<16x96xf32>
    %cst_247 = arith.constant dense<0.000000e+00> : vector<2x96xf32>
    %823 = tpu.matmul %798, %822, %cst_247 {dimension_numbers = #tpu.dot_dimension_numbers<[1], [0], [0], [1], [0, 0, 1, 1], [], []>} : vector<2x16xf32>, vector<16x96xf32>, vector<2x96xf32> -> vector<2x96xf32>
    %c0_248 = arith.constant 0 : index
    %c0_249 = arith.constant 0 : index
    %824 = vector.load %arg9[%c0_248, %c0_249] : memref<32x96xf32, #tpu.memory_space<vmem>>, vector<32x96xf32>
    %cst_250 = arith.constant dense<0.000000e+00> : vector<2x96xf32>
    %825 = tpu.matmul %821, %824, %cst_250 {dimension_numbers = #tpu.dot_dimension_numbers<[1], [0], [0], [1], [0, 0, 1, 1], [], []>} : vector<2x32xf32>, vector<32x96xf32>, vector<2x96xf32> -> vector<2x96xf32>
    %826 = arith.addf %823, %825 : vector<2x96xf32>
    %c0_251 = arith.constant 0 : index
    %c0_252 = arith.constant 0 : index
    %827 = vector.load %arg10[%c0_251, %c0_252] : memref<1x96xf32, #tpu.memory_space<vmem>>, vector<1x96xf32>
    %828 = vector.broadcast %827 : vector<1x96xf32> to vector<2x96xf32>
    %829 = arith.addf %826, %828 : vector<2x96xf32>
    %830 = vector.extract_strided_slice %829 {offsets = [0, 0], sizes = [2, 32], strides = [1, 1]} : vector<2x96xf32> to vector<2x32xf32>
    %831 = vector.extract_strided_slice %829 {offsets = [0, 32], sizes = [2, 32], strides = [1, 1]} : vector<2x96xf32> to vector<2x32xf32>
    %832 = vector.extract_strided_slice %829 {offsets = [0, 64], sizes = [2, 32], strides = [1, 1]} : vector<2x96xf32> to vector<2x32xf32>
    %833 = arith.addf %830, %773 : vector<2x32xf32>
    %834 = arith.negf %833 : vector<2x32xf32>
    %835 = math.exp %834 : vector<2x32xf32>
    %cst_253 = arith.constant 1.000000e+00 : f32
    %836 = vector.broadcast %cst_253 : f32 to vector<2x32xf32>
    %837 = arith.addf %836, %835 : vector<2x32xf32>
    %838 = arith.divf %836, %837 : vector<2x32xf32>
    %839 = arith.addf %831, %774 : vector<2x32xf32>
    %840 = arith.negf %839 : vector<2x32xf32>
    %841 = math.exp %840 : vector<2x32xf32>
    %cst_254 = arith.constant 1.000000e+00 : f32
    %842 = vector.broadcast %cst_254 : f32 to vector<2x32xf32>
    %843 = arith.addf %842, %841 : vector<2x32xf32>
    %844 = arith.divf %842, %843 : vector<2x32xf32>
    %845 = arith.mulf %838, %775 : vector<2x32xf32>
    %846 = arith.addf %832, %845 : vector<2x32xf32>
    %847 = math.tanh %846 : vector<2x32xf32>
    %cst_255 = arith.constant 1.000000e+00 : f32
    %848 = vector.broadcast %cst_255 : f32 to vector<2x32xf32>
    %849 = arith.subf %848, %844 : vector<2x32xf32>
    %850 = arith.mulf %849, %847 : vector<2x32xf32>
    %851 = arith.mulf %844, %766 : vector<2x32xf32>
    %852 = arith.addf %850, %851 : vector<2x32xf32>
    %c0_256 = arith.constant 0 : index
    %c0_257 = arith.constant 0 : index
    %853 = vector.load %arg11[%c0_256, %c0_257] : memref<32x16xf32, #tpu.memory_space<vmem>>, vector<32x16xf32>
    %cst_258 = arith.constant dense<0.000000e+00> : vector<2x16xf32>
    %854 = tpu.matmul %852, %853, %cst_258 {dimension_numbers = #tpu.dot_dimension_numbers<[1], [0], [0], [1], [0, 0, 1, 1], [], []>} : vector<2x32xf32>, vector<32x16xf32>, vector<2x16xf32> -> vector<2x16xf32>
    %c0_259 = arith.constant 0 : index
    %c0_260 = arith.constant 0 : index
    %855 = vector.load %arg12[%c0_259, %c0_260] : memref<1x16xf32, #tpu.memory_space<vmem>>, vector<1x16xf32>
    %856 = vector.broadcast %855 : vector<1x16xf32> to vector<2x16xf32>
    %857 = arith.addf %854, %856 : vector<2x16xf32>
    %cst_261 = arith.constant dense<0xFF800000> : vector<2xf32>
    %858 = vector.multi_reduction <maximumf>, %857, %cst_261 [1] : vector<2x16xf32> to vector<2xf32>
    %859 = vector.shape_cast %858 : vector<2xf32> to vector<2x1xf32>
    %860 = vector.broadcast %859 : vector<2x1xf32> to vector<2x16xf32>
    %861 = arith.subf %857, %860 : vector<2x16xf32>
    %862 = math.exp %861 : vector<2x16xf32>
    %cst_262 = arith.constant dense<0.000000e+00> : vector<2xf32>
    %863 = vector.multi_reduction <add>, %862, %cst_262 [1] : vector<2x16xf32> to vector<2xf32>
    %864 = vector.shape_cast %863 : vector<2xf32> to vector<2x1xf32>
    %865 = math.log %864 : vector<2x1xf32>
    %866 = vector.broadcast %865 : vector<2x1xf32> to vector<2x16xf32>
    %867 = arith.subf %861, %866 : vector<2x16xf32>
    %868 = tpu.concatenate %98, %184, %270, %356, %442, %528, %614, %700, %786, %867 in 1 : vector<2x16xf32>, vector<2x16xf32>, vector<2x16xf32>, vector<2x16xf32>, vector<2x16xf32>, vector<2x16xf32>, vector<2x16xf32>, vector<2x16xf32>, vector<2x16xf32>, vector<2x16xf32> -> vector<2x160xf32>
    %c0_263 = arith.constant 0 : index
    %c0_264 = arith.constant 0 : index
    %869 = vector.load %arg13[%c0_263, %c0_264] : memref<2x160xf32, #tpu.memory_space<vmem>>, vector<2x160xf32>
    tpu.vector_store %arg13[%c0_263, %c0_264], %868 {strides = array<i32>} : memref<2x160xf32, #tpu.memory_space<vmem>>, vector<2x160xf32>,
    %870 = tpu.concatenate %43, %129, %215, %301, %387, %473, %559, %645, %731, %817 in 1 : vector<2x10xf32>, vector<2x10xf32>, vector<2x10xf32>, vector<2x10xf32>, vector<2x10xf32>, vector<2x10xf32>, vector<2x10xf32>, vector<2x10xf32>, vector<2x10xf32>, vector<2x10xf32> -> vector<2x100xf32>
    %c0_265 = arith.constant 0 : index
    %c0_266 = arith.constant 0 : index
    %871 = vector.load %arg14[%c0_265, %c0_266] : memref<2x100xf32, #tpu.memory_space<vmem>>, vector<2x100xf32>
    tpu.vector_store %arg14[%c0_265, %c0_266], %870 {strides = array<i32>} : memref<2x100xf32, #tpu.memory_space<vmem>>, vector<2x100xf32>,
    %c0_267 = arith.constant 0 : index
    %c0_268 = arith.constant 0 : index
    %872 = vector.load %arg15[%c0_267, %c0_268] : memref<2x32xf32, #tpu.memory_space<vmem>>, vector<2x32xf32>
    tpu.vector_store %arg15[%c0_267, %c0_268], %852 {strides = array<i32>} : memref<2x32xf32, #tpu.memory_space<vmem>>, vector<2x32xf32>,
    return
  }
}

</mosaic_0001>

<bundles_post_ra>
// kernel: tpu_custom_call.1
= control target key start
LH: loop header
LB: loop body
LE: loop exit
PB: predicated region body
PF: predicated region fallthrough
CT: control target
= control target key end

     0   :  { %s8572_s0 = inlined_call_operand.vmem [shape: f32[2,10,32], index: 0, kind: input, shape index: {}]   ;;  %s8573_s1 = inlined_call_operand.vmem [shape: f32[2,32], index: 1, kind: input, shape index: {}]   ;;  %s8574_s2 = inlined_call_operand.vmem [shape: f32[32,32], index: 2, kind: input, shape index: {}]   ;;  %s8575_s3 = inlined_call_operand.hbm [shape: f32[1,32], index: 3, kind: input, shape index: {}]   ;;  %s8576_s4 = inlined_call_operand.vmem [shape: f32[32,256], index: 4, kind: input, shape index: {}]   ;;  %s8577_s5 = inlined_call_operand.hbm [shape: f32[1,256], index: 5, kind: input, shape index: {}]   ;;  %s8578_s6 = inlined_call_operand.hbm [shape: f32[1,32], index: 6, kind: input, shape index: {}]   ;;  %s8579_s7 = inlined_call_operand.<no memory space> [shape: f32[1,1], index: 7, kind: input, shape index: {}]   ;;  %s8580_s8 = inlined_call_operand.hbm [shape: f32[16,96], index: 8, kind: input, shape index: {}]   ;;  %s8581_s9 = inlined_call_operand.vmem [shape: f32[32,96], index: 9, kind: input, shape index: {}]   ;;  %s8582_s10 = inlined_call_operand.vmem [shape: f32[1,96], index: 10, kind: input, shape index: {}]   ;;  %s8583_s11 = inlined_call_operand.vmem [shape: f32[32,16], index: 11, kind: input, shape index: {}]   ;;  %s8584_s12 = inlined_call_operand.vmem [shape: f32[1,16], index: 12, kind: input, shape index: {}]   ;;  %s8585_s13 = inlined_call_operand.hbm [shape: f32[2,160], index: 13, kind: output, shape index: {0}]   ;;  %s8586_s14 = inlined_call_operand.hbm [shape: f32[2,100], index: 14, kind: output, shape index: {1}]   ;;  %s8587_s15 = inlined_call_operand.hbm [shape: f32[2,32], index: 15, kind: output, shape index: {2}]  }
   0x1   :  { %v21_v0 = vstv %s8579_s7 }
   0x2   :  { %22 = vst [vmem:[#allocation2] sm:$0x1] %v21_v0 }
   0x3   :  { %23 = vsyncpa [#allocation4], 0 }
   0x4   :  { %24 = vsyncpa [#allocation7], 0 }
   0x5   :  { %25 = vsyncpa [#allocation10], 0 }
   0x6   :  { %26 = vsyncpa [#allocation5], 0 }
   0x7   :  { %27 = vsyncpa [#allocation13], 0  ;;  %s6863_s20 = smov [#allocation6]   ;;  %s6864_s22 = smov [#allocation3]  }
   0x8   :  { %s52_s21 = sshll.u32 %s6863_s20, 4  ;;  %s40_s23 = sshll.u32 %s6864_s22, 4  ;;  %s53_s21 = int_to_ptr.vmem [resolvable:$true] %s52_s21  ;;  %s41_s23 = int_to_ptr.vmem [resolvable:$true] %s40_s23 }
   0x9   :  { %s6699_s26 = scalar_lea.hbm %s8577_s5, 32 }
   0xa   :  { %p6700_p0 = scmp.ne.s32.totalorder %s8577_s5, %s6699_s26  ;;  %p6703_p1 = scmp.lt.u32.totalorder %s6699_s26, %s8577_s5 }
   0xc   :  { %p6705_p2 = pnand %p6703_p1, %p6700_p0 }
   0xe   :  { %6708 = shalt.err (!%p6705_p2)
}
   0xf   :  { %s6709_s30 = scalar_lea.vmem %s53_s21, 32  ;;  %p6714_p4 = scmp.lt.s32.totalorder %s53_s21, %s53_s21 }
  0x10   :  { %p6710_p3 = scmp.ne.s32.totalorder %s53_s21, %s6709_s30  ;;  %p6715_p5 = scmp.lt.s32.totalorder %s6709_s30, %s6709_s30 }
  0x12   :  { %p6716_p6 = por %p6715_p5, %p6714_p4 }
  0x14   :  { %p6717_p7 = pnand %p6716_p6, %p6710_p3 }
  0x16   :  { %6720 = shalt.err (!%p6717_p7)
}
  0x17   :  { %55 = dma.hbm_to_vmem [thread:$0]  %s8577_s5, 32, %s53_s21, [#allocation7]  }
  0x18   :  { %s6721_s20 = scalar_lea.hbm %s8575_s3, 16 }
  0x19   :  { %p6722_p8 = scmp.ne.s32.totalorder %s8575_s3, %s6721_s20  ;;  %p6725_p9 = scmp.lt.u32.totalorder %s6721_s20, %s8575_s3 }
  0x1b   :  { %p6727_p10 = pnand %p6725_p9, %p6722_p8 }
  0x1d   :  { %6730 = shalt.err (!%p6727_p10)
}
  0x1e   :  { %s6731_s27 = scalar_lea.vmem %s41_s23, 16  ;;  %s6735_s28 = scalar_lea.vmem %s41_s23, 32 }
  0x1f   :  { %p6732_p11 = scmp.ne.s32.totalorder %s41_s23, %s6731_s27  ;;  %p6736_p12 = scmp.lt.s32.totalorder %s41_s23, %s41_s23 }
  0x20   :  { %p6737_p13 = scmp.lt.s32.totalorder %s6735_s28, %s6731_s27 }
  0x22   :  { %p6738_p0 = por %p6737_p13, %p6736_p12 }
  0x24   :  { %p6739_p1 = pnand %p6738_p0, %p6732_p11 }
  0x26   :  { %6742 = shalt.err (!%p6739_p1)
}
  0x27   :  { %43 = dma.hbm_to_vmem [thread:$0]  %s8575_s3, 16, %s41_s23, [#allocation4]  }
  0x28   :  { %s6865_s7 = smov [#allocation8]   ;;  %s6866_s30 = smov [#allocation9]  }
  0x29   :  { %s62_s29 = sshll.u32 %s6865_s7, 4  ;;  %s73_s16 = sshll.u32 %s6866_s30, 4  ;;  %s63_s29 = int_to_ptr.vmem [resolvable:$true] %s62_s29  ;;  %s6992_s16 = int_to_ptr.vmem [resolvable:$true] %s73_s16 }
  0x2a   :  { %s6743_s19 = scalar_lea.hbm %s8578_s6, 16 }
  0x2b   :  { %p6744_p2 = scmp.ne.s32.totalorder %s8578_s6, %s6743_s19  ;;  %p6747_p3 = scmp.lt.u32.totalorder %s6743_s19, %s8578_s6 }
  0x2d   :  { %p6749_p4 = pnand %p6747_p3, %p6744_p2 }
  0x2f   :  { %6752 = shalt.err (!%p6749_p4)
}
  0x30   :  { %s6753_s3 = scalar_lea.vmem %s63_s29, 16  ;;  %s6757_s23 = scalar_lea.vmem %s63_s29, 32 }
  0x31   :  { %p6754_p5 = scmp.ne.s32.totalorder %s63_s29, %s6753_s3  ;;  %p6758_p6 = scmp.lt.s32.totalorder %s63_s29, %s63_s29 }
  0x32   :  { %p6759_p7 = scmp.lt.s32.totalorder %s6757_s23, %s6753_s3 }
  0x34   :  { %p6760_p8 = por %p6759_p7, %p6758_p6 }
  0x36   :  { %p6761_p9 = pnand %p6760_p8, %p6754_p5 }
  0x38   :  { %6764 = shalt.err (!%p6761_p9)
}
  0x39   :  { %65 = dma.hbm_to_vmem [thread:$0]  %s8578_s6, 16, %s63_s29, [#allocation7]  }
  0x3a   :  { %s6765_s21 = scalar_lea.hbm %s8580_s8, 256 }
  0x3b   :  { %p6766_p10 = scmp.ne.s32.totalorder %s8580_s8, %s6765_s21  ;;  %p6769_p11 = scmp.lt.u32.totalorder %s6765_s21, %s8580_s8 }
  0x3d   :  { %p6771_p12 = pnand %p6769_p11, %p6766_p10 }
  0x3f   :  { %6774 = shalt.err (!%p6771_p12)
}
  0x40   :  { %s6775_s19 = scalar_lea.vmem %s6992_s16, 256  ;;  %p6780_p0 = scmp.lt.s32.totalorder %s6992_s16, %s6992_s16 }
  0x41   :  { %p6776_p13 = scmp.ne.s32.totalorder %s6992_s16, %s6775_s19  ;;  %p6781_p1 = scmp.lt.s32.totalorder %s6775_s19, %s6775_s19 }
  0x43   :  { %p6782_p2 = por %p6781_p1, %p6780_p0 }
  0x45   :  { %p6783_p3 = pnand %p6782_p2, %p6776_p13 }
  0x47   :  { %6786 = shalt.err (!%p6783_p3)
}
  0x48   :  { %s6867_s6 = smov 128   ;;  %s6868_s29 = smov 8  }
  0x49   :  { %79 = dma.hbm_to_vmem [thread:$0]  %s8580_s8, 256, %s6992_s16, [#allocation10], %s6867_s6, %s6867_s6, %s6868_s29  }
  0x4a   :  { %6853 = dma.done.wait [#allocation4], 16  }
  0x4b   :  { %6854 = vsyncadd [#allocation4], 4294967280 }
  0x4c   :  { %6855 = dma.done.wait [#allocation7], 48  }
  0x4d   :  { %6856 = vsyncadd [#allocation7], 4294967248 }
  0x4e   :  { %6857 = dma.done.wait [#allocation10], 256  }
  0x4f   :  { %6858 = vsyncadd [#allocation10], 4294967040  ;;  %v112_v1 = vlaneseq  ;;  %v8588_v2 = vmov 0.0|0.0   ;;  %vm6870_vm0 = vmmov 0   ;;  %v8590_v3 = vmov 0.0   ;;  %v156_v8 = vld [vmem:[%s8574_s2] sm:$0xff] }
  0x50   :  { %6173 = vmatprep.subr.bf16.mxu0 %v8588_v2  ;;  %5973 = vmatprep.mubr.msk.f32.mxu0 %vm6870_vm0, %v8590_v3  ;;  %v6872_v4 = vmov 1983009808   ;;  %v157_v9 = vld [vmem:[%s8574_s2 + $0x8] sm:$0xff]  ;;  %v352_v12 = vld [vmem:[%s8576_s4 + $0x18] sm:$0xff]  ;;  %v349_v13 = vld [vmem:[%s8576_s4] sm:$0xff]  ;;  %vm209_vm1 = vcmask 261120  }
  0x51   :  { %v110_v5 = vunpack.c.l.s4 %v6872_v4  ;;  %436 = vmatprep.mubr.f32.mxu1 %v8590_v3  ;;  %v7028_v7 = vshrl.u32 %v112_v1, 7  ;;  %v350_v10 = vld [vmem:[%s8576_s4 + $0x8] sm:$0xff]  ;;  %v6174_v11 = vpack.c.bf16 %v157_v9, %v156_v8  ;;  %v351_v14 = vld [vmem:[%s8576_s4 + $0x10] sm:$0xff]  ;;  %v159_v19 = vld [vmem:[%s8574_s2 + $0x18] sm:$0xff]  ;;  %v6873_v56 = vmov 0   ;;  %s6876_s30 = smov 32  }
  0x52   :  { %v7051_v16 = vpack.c.bf16 %v352_v12, %v350_v10  ;;  %v7053_v17 = vpack.c.bf16 %v351_v14, %v349_v13  ;;  %v158_v18 = vld [vmem:[%s8574_s2 + $0x10] sm:$0xff]  ;;  %v354_v20 = vld [vmem:[%s8576_s4 + $0x28] sm:$0xff]  ;;  %v356_v22 = vld [vmem:[%s8576_s4 + $0x38] sm:$0xff]  ;;  %6377 = vset.pattern.permute.xlu0 %v6873_v56  ;;  %6378 = vset.pattern.permute.xlu1 %v6873_v56  ;;  %v6874_v58 = vmov 1966171168   ;;  %vm548_vm2 = vcmask 254976  }
  0x53   :  { %v111_v6 = vunpack.c.0.s8 %v110_v5  ;;  %6175 = vmatpush3.bf16.msra.mxu0 %v6174_v11  ;;  %v6177_v21 = vpack.c.bf16 %v159_v19, %v158_v18  ;;  %v353_v23 = vld [vmem:[%s8576_s4 + $0x20] sm:$0xff]  ;;  %v355_v24 = vld [vmem:[%s8576_s4 + $0x30] sm:$0xff]  ;;  %v7075_v25 = vpack.c.bf16 %v356_v22, %v354_v20  ;;  %v7085_v27 = vld [vmem:[%s8572_s0 + $0x8] sm:$0x3]  ;;  %v7142_v57 = vsub.s32 0, %v7028_v7  ;;  %s6877_s24 = smov 64  }
  0x54   :  { %6180 = vmatprep.subr.bf16.mxu1 %v7051_v16  ;;  %6176 = vmatprep.subr.bf16.mxu0 %v8588_v2  ;;  %v7080_v26 = vld [vmem:[%s8572_s0] sm:$0xff]  ;;  %v7088_v28 = vpack.c.bf16 %v355_v24, %v353_v23  ;;  %v7097_v31 = vld [vmem:[%s8572_s0 + $0x10] sm:$0xff]  ;;  %v7118_v43 = vld [vmem:[%s8572_s0 + $0x18] sm:$0x3]  ;;  %v444_v59 = vunpack.c.l.s4 %v6874_v58  ;;  %vm584_vm3 = vcmask 130112   ;;  %vm595_vm4 = vcmask 1041409  }
  0x55   :  { %v7049_v15 = vsub.s32 %v111_v6, %v7028_v7  ;;  %6182 = vmatpush1.bf16.msra.mxu1 %v7053_v17  ;;  %v108_v29 = vcombine.high %v7080_v26, %v7080_v26  ;;  %v132_v33 = vcombine.high %v7097_v31, %v7097_v31  ;;  %v7113_v41 = vld [vmem:[%s8573_s1] sm:$0x3]  ;;  %v7144_v60 = vld [vmem:[#allocation6] sm:$0x3]  ;;  %vm598_vm5 = vcmask 74752   ;;  %s6875_s1 = smov 96  }
  0x56   :  { %6184 = vmatprep.subr.bf16.mxu1 %v7075_v25  ;;  %v7148_v61 = vrot.slane %v7144_v60, %v7142_v57  ;;  %v445_v62 = vunpack.c.0.s8 %v444_v59  ;;  %v5814_v6 = vld [vmem:[#allocation3] ss:$0 sm:$0xff]  ;;  %vm804_vm7 = vcmask 130048   ;;  %vm993_vm8 = vcmask 123904   ;;  %s6879_s28 = smov 48   ;;  %s6882_s22 = smov [#allocation12]  }
  0x57   :  { %8620 = vst [vmem:[#allocation20_spill] sm:$0xff] %v7049_v15  ;;  %v115_v30 = vrot.slane %v7080_v26, %v7049_v15  ;;  %v131_v32 = vrot.slane %v7085_v27, %v7049_v15  ;;  %v139_v34 = vrot.slane %v7097_v31, %v7049_v15  ;;  %6178 = vmatpush3.bf16.msra.mxu0 %v6177_v21  ;;  %s5786_s8 = sshll.u32 %s6882_s22, 4  ;;  %s5787_s8 = int_to_ptr.vmem [resolvable:$true] %s5786_s8 }
  0x58   :  { %v122_v35 = vrot.slane %v108_v29, %v7049_v15  ;;  %v146_v37 = vrot.slane %v132_v33, %v7049_v15  ;;  %6204 = vmatprep.subr.bf16.mxu0 %v8588_v2  ;;  %v155_v47 = vrot.slane %v7118_v43, %v7049_v15  ;;  %v7154_v4 = vsub.s32 %v445_v62, %v7028_v7  ;;  %p6792_p5 = scmp.lt.s32.totalorder %s5787_s8, %s5787_s8 }
  0x59   :  { %v123_v36 = vcombine.high %v115_v30, %v115_v30  ;;  %v147_v38 = vcombine.high %v139_v34, %v139_v34  ;;  %6186 = vmatpush1.bf16.msra.mxu1 %v7088_v28  ;;  %v184_v42 = vcombine.low %v131_v32, %v139_v34 }
  0x5a   :  { %v124_v39 = vcombine.high %v122_v35, %v122_v35  ;;  %6187 = vmatprep.subr.bf16.mxu1 %v8588_v2  ;;  %v148_v51 = vcombine.high %v146_v37, %v146_v37 }
  0x5b   :  { %v167_v40 = vcombine.low %v115_v30, %v123_v36  ;;  %v185_v44 = vcombine.low %v147_v38, %v146_v37  ;;  %v192_v49 = vrot.slane %v184_v42, %v7049_v15 }
  0x5c   :  { %v168_v45 = vcombine.low %v122_v35, %v124_v39  ;;  %5819 = vmatmul.mubr.msk.f32.vlgmr.msra.gmra.mrb[0].mxu1 %vm209_vm1, %v7113_v41  ;;  %v201_v54 = vcombine.low %v148_v51, %v155_v47 }
  0x5d   :  { %v175_v46 = vrot.slane %v167_v40, %v7049_v15  ;;  %v199_v50 = vrot.slane %v185_v44, %v7049_v15  ;;  %5990 = vmatprep.mubr.msk.f32.mxu1 %vm6870_vm0, %v8590_v3 }
  0x5e   :  { %v182_v48 = vrot.slane %v168_v45, %v7049_v15  ;;  %v208_v55 = vrot.slane %v201_v54, %v7049_v15 }
  0x5f   :  { %v200_v53 = vcombine.low %v192_v49, %v199_v50 }
  0x60   :  { %v183_v52 = vcombine.low %v175_v46, %v182_v48 }
  0x62   :  { %5974 = vmatmul.mubr.msk.f32.vlgmr.msra.gmra.mrb[0].mxu0 %vm209_vm1, %v183_v52 }
  0x63   :  { %5976 = vmatprep.mubr.msk.f32.mxu0 %vm6870_vm0, %v8590_v3 }
  0x66   :  { %5977 = vmatmul.mubr.msk.f32.gmra.mrb[2].mxu0 %vm209_vm1, %v200_v53 }
  0x67   :  { %5979 = vmatprep.mubr.msk.f32.mxu0 %vm6870_vm0, %v8590_v3 }
  0x6a   :  { %5980 = vmatmul.mubr.msk.f32.gmra.mrb[4].mxu0 %vm209_vm1, %v208_v55 }
  0x6b   :  { %6008 = vmatprep.mubr.msk.f32.mxu0 %vm6870_vm0, %v8590_v3 }
 0x12f   :  { %v438_v63 = vpop.f32.mrb[0].mxu1 }
 0x130   :  { %v7151_v0 = vadd.f32 %v438_v63, %v7148_v61  ;;  %v440_v5 = vpop.f32.mrb[1].mxu1 }
 0x131   :  { %v7185_v5 = vld [vmem:[#allocation8] ss:$0 sm:$0xff] }
 0x132   :  { %v449_v9 = vrot.slane %v7151_v0, %v7154_v4 }
 0x134   :  { %v457_v14 = vrot.slane %v449_v9, %v7154_v4  ;;  %v450_v32 = vcombine.high %v449_v9, %v449_v9 }
 0x135   :  { %v282_v8 = vpop.f32.mrb[0].mxu0 }
 0x136   :  { %v283_v10 = vadd.f32 %v5814_v6, %v282_v8  ;;  %v5975_v11 = vpop.f32.mrb[1].mxu0  ;;  %v468_v33 = vrot.slane %v457_v14, %v7142_v57  ;;  %v464_v46 = vrot.slane %v450_v32, %v7154_v4 }
 0x138   :  { %v299_v12 = vcombine.high %v283_v10, %v283_v10  ;;  %v306_v13 = vrot.slane %v283_v10, %v7049_v15  ;;  %v472_v54 = vrot.slane %v464_v46, %v7142_v57 }
 0x139   :  { %v287_v18 = vpop.f32.mrb[2].mxu0 }
 0x13a   :  { %v313_v19 = vrot.slane %v299_v12, %v7049_v15  ;;  %v314_v20 = vcombine.high %v306_v13, %v306_v13  ;;  %v288_v21 = vadd.f32 %v5814_v6, %v287_v18  ;;  %v5978_v22 = vpop.f32.mrb[3].mxu0 }
 0x13b   :  { %v5821_v22 = vld [vmem:[#allocation2] ss:$0 sm:$0xff] }
 0x13c   :  { %v315_v23 = vcombine.high %v313_v19, %v313_v19  ;;  %v475_v24 = vcombine.low %v306_v13, %v314_v20  ;;  %v316_v29 = vcombine.high %v288_v21, %v288_v21  ;;  %v323_v30 = vrot.slane %v288_v21, %v7049_v15 }
 0x13d   :  { %v292_v34 = vpop.f32.mrb[4].mxu0 }
 0x13e   :  { %v476_v35 = vcombine.low %v313_v19, %v315_v23  ;;  %v330_v36 = vrot.slane %v316_v29, %v7049_v15  ;;  %v331_v37 = vcombine.high %v323_v30, %v323_v30  ;;  %v5981_v38 = vpop.f32.mrb[5].mxu0  ;;  %v7165_v39 = vrot.slane %v323_v30, %v7049_v15 }
 0x13f   :  { %v293_v40 = vadd.f32 %v5814_v6, %v292_v34  ;;  %v483_v42 = vrot.slane %v475_v24, %v7049_v15  ;;  %v7196_v24 = vand.u32 127, %v112_v1 }
 0x140   :  { %v490_v44 = vrot.slane %v476_v35, %v7049_v15  ;;  %v332_v45 = vcombine.high %v330_v36, %v330_v36  ;;  %v499_v47 = vcombine.low %v331_v37, %v330_v36  ;;  %v528_v49 = vadd.f32 %v7165_v39, %v468_v33 }
 0x141   :  { %v339_v48 = vrot.slane %v293_v40, %v7049_v15  ;;  %v579_v29 = vadd.s32 4294967288, %v7196_v24  ;;  %v7204_v34 = vsub.s32 %v7196_v24, %v7028_v7  ;;  %vm346_vm6 = vcmp.eq.s32.totalorder %v7196_v24, 0 }
 0x142   :  { %v7172_v50 = vcombine.low %v483_v42, %v490_v44  ;;  %6381 = vtanh.f32 %v528_v49  ;;  %v507_v55 = vrot.slane %v499_v47, %v7049_v15 }
 0x143   :  { %v340_v51 = vcombine.high %v339_v48, %v339_v48  ;;  %v500_v52 = vcombine.low %v332_v45, %v339_v48 }
 0x144   :  { %v527_v53 = vadd.f32 %v7172_v50, %v468_v33  ;;  %v7200_v33 = vsub.s32 %v579_v29, %v7028_v7 }
 0x145   :  { %v514_v56 = vrot.slane %v500_v52, %v7049_v15  ;;  %v7179_v58 = vrot.slane %v340_v51, %v7049_v15  ;;  %v7221_v52 = vsub.s32 1, %v7028_v7 }
 0x146   :  { %6383 = vtanh.f32 %v527_v53 }
 0x147   :  { %v7181_v59 = vcombine.low %v507_v55, %v514_v56  ;;  %v530_v62 = vadd.f32 %v7179_v58, %v472_v54 }
 0x149   :  { %v529_v63 = vadd.f32 %v7181_v59, %v472_v54  ;;  %6385 = vtanh.f32 %v530_v62 }
 0x14b   :  { %6387 = vtanh.f32 %v529_v63 }
 0x14c   :  { %v6382_v6 = vpop.eup %6381 }
 0x14d   :  { %v542_v8 = vmul.f32 %v6382_v6, %v7185_v5 }
 0x14f   :  { %v549_v10 = vsel %vm548_vm2, %v542_v8, 0.0 }
 0x150   :  { %v6384_v9 = vpop.eup %6383  ;;  %550 = vadd.xlane.f32.xlu0 %v549_v10 }
 0x151   :  { %v541_v11 = vmul.f32 %v6384_v9, %v7185_v5 }
 0x153   :  { %v545_v12 = vsel %vm209_vm1, %v541_v11, 0.0  ;;  %v6386_v13 = vpop.eup %6385 }
 0x154   :  { %546 = vadd.xlane.f32.xlu0 %v545_v12  ;;  %v544_v20 = vmul.f32 %v6386_v13, %v7185_v5 }
 0x155   :  { %v6388_v14 = vpop.eup %6387 }
 0x156   :  { %v543_v18 = vmul.f32 %v6388_v14, %v7185_v5  ;;  %v555_v21 = vsel %vm548_vm2, %v544_v20, 0.0 }
 0x158   :  { %v552_v19 = vsel %vm209_vm1, %v543_v18, 0.0 }
 0x159   :  { %553 = vadd.xlane.f32.xlu1 %v552_v19 }
 0x15d   :  { %556 = vadd.xlane.f32.xlu1 %v555_v21 }
 0x16a   :  { %564 = vperm.xlu0 %6377, %v5821_v22  }
 0x1dd   :  { %v551_v23 = vpop.xlane.xlu0 %550 }
 0x1e1   :  { %v547_v30 = vpop.xlane.xlu0 %546 }
 0x1e6   :  { %v554_v32 = vpop.xlane.xlu1 %553 }
 0x1e9   :  { %v7206_v35 = vpop.permute.xlu0 %564 }
 0x1ea   :  { %8621 = vst [vmem:[#allocation21_spill] sm:$0xff] %v7206_v35  ;;  %v557_v36 = vpop.xlane.xlu1 %556  ;;  %v567_v38 = vadd.f32 %v7206_v35, %v547_v30  ;;  %v568_v1 = vadd.f32 %v7206_v35, %v551_v23  ;;  %v569_v40 = vadd.f32 %v7206_v35, %v554_v32 }
 0x1eb   :  { %v570_v37 = vadd.f32 %v7206_v35, %v557_v36 }
 0x1ec   :  { %v578_v44 = vrot.slane %v567_v38, %v7204_v34  ;;  %v583_v45 = vrot.slane %v568_v1, %v7200_v33  ;;  %v589_v46 = vrot.slane %v569_v40, %v7204_v34 }
 0x1ed   :  { %v593_v42 = vrot.slane %v570_v37, %v7200_v33 }
 0x1ee   :  { %v585_v47 = vsel %vm584_vm3, %v583_v45, %v578_v44 }
 0x1ef   :  { %v594_v48 = vsel %vm584_vm3, %v593_v42, %v589_v46 }
 0x1f0   :  { %v596_v49 = vsel %vm595_vm4, %v594_v48, %v585_v47 }
 0x1f1   :  { %v599_v51 = vsel %vm598_vm5, %v596_v49, -inf }
 0x1f2   :  { %600 = vmax.xlane.f32.xlu1 %v599_v51 }
 0x27f   :  { %v601_v53 = vpop.xlane.xlu1 %600 }
 0x280   :  { %v606_v54 = vrot.slane %v601_v53, %v7142_v57  ;;  %v610_v55 = vrot.slane %v601_v53, %v7221_v52  ;;  %v725_v53 = vld [vmem:[%s8581_s9] sm:$0xff] }
 0x282   :  { %v613_v56 = vsub.f32 %v567_v38, %v606_v54  ;;  %v614_v62 = vsub.f32 %v568_v1, %v606_v54  ;;  %v615_v6 = vsub.f32 %v569_v40, %v610_v55  ;;  %v616_v9 = vsub.f32 %v570_v37, %v610_v55  ;;  %v726_v54 = vld [vmem:[%s8581_s9 + $0x8] sm:$0xff]  ;;  %v727_v55 = vld [vmem:[%s8581_s9 + $0x10] sm:$0xff] }
 0x284   :  { %v617_v63 = vmul.f32 1.442695, %v613_v56  ;;  %v619_v8 = vmul.f32 1.442695, %v614_v62  ;;  %v621_v10 = vmul.f32 1.442695, %v615_v6  ;;  %v7248_v56 = vpack.c.bf16 %v726_v54, %v725_v53 }
 0x285   :  { %v623_v11 = vmul.f32 1.442695, %v616_v9  ;;  %v728_v62 = vld [vmem:[%s8581_s9 + $0x18] sm:$0xff]  ;;  %s6787_s9 = scalar_lea.vmem %s5787_s8, 32 }
 0x286   :  { %6389 = vpow2.f32 %v617_v63  ;;  %6189 = vmatpush3.bf16.msra.mxu1 %v7248_v56  ;;  %6206 = vmatpush3.bf16.msra.mxu0 %v7248_v56  ;;  %p6788_p4 = scmp.ne.s32.totalorder %s5787_s8, %s6787_s9  ;;  %p6793_p6 = scmp.lt.s32.totalorder %s6787_s9, %s6787_s9 }
 0x287   :  { %6391 = vpow2.f32 %v619_v8  ;;  %6190 = vmatprep.subr.bf16.mxu1 %v8588_v2  ;;  %6207 = vmatprep.subr.bf16.mxu0 %v8588_v2 }
 0x288   :  { %6393 = vpow2.f32 %v621_v10  ;;  %p6794_p7 = por %p6793_p6, %p6792_p5 }
 0x289   :  { %6395 = vpow2.f32 %v623_v11 }
 0x28a   :  { %p6795_p8 = pnand %p6794_p7, %p6788_p4 }
 0x290   :  { %v6390_v12 = vpop.eup %6389 }
 0x291   :  { %630 = vperm.xlu1 %6378, %v6390_v12   ;;  %v6392_v13 = vpop.eup %6391 }
 0x292   :  { %v6394_v14 = vpop.eup %6393 }
 0x293   :  { %v6396_v18 = vpop.eup %6395 }
 0x295   :  { %633 = vperm.xlu1 %6378, %v6392_v13  }
 0x299   :  { %636 = vperm.xlu1 %6378, %v6394_v14  }
 0x29d   :  { %639 = vperm.xlu1 %6378, %v6396_v18  }
 0x310   :  { %v631_v19 = vpop.permute.xlu1 %630 }
 0x311   :  { %v644_v29 = vrot.slane %v631_v19, %v7204_v34 }
 0x314   :  { %v634_v20 = vpop.permute.xlu1 %633 }
 0x315   :  { %v648_v22 = vrot.slane %v634_v20, %v7200_v33 }
 0x317   :  { %v649_v36 = vsel %vm584_vm3, %v648_v22, %v644_v29 }
 0x318   :  { %v637_v21 = vpop.permute.xlu1 %636 }
 0x319   :  { %v653_v30 = vrot.slane %v637_v21, %v7204_v34 }
 0x31c   :  { %v640_v23 = vpop.permute.xlu1 %639 }
 0x31d   :  { %v657_v32 = vrot.slane %v640_v23, %v7200_v33 }
 0x31f   :  { %v658_v37 = vsel %vm584_vm3, %v657_v32, %v653_v30 }
 0x320   :  { %v659_v38 = vsel %vm595_vm4, %v658_v37, %v649_v36 }
 0x321   :  { %v661_v1 = vsel %vm598_vm5, %v659_v38, 0.0 }
 0x322   :  { %662 = vadd.xlane.f32.xlu1 %v661_v1 }
 0x3af   :  { %v663_v40 = vpop.xlane.xlu1 %662 }
 0x3b0   :  { %v668_v42 = vrot.slane %v663_v40, %v7142_v57  ;;  %v672_v44 = vrot.slane %v663_v40, %v7221_v52 }
 0x3b2   :  { %6397 = vrcp.f32 %v668_v42  ;;  %v723_v42 = vld [vmem:[#allocation9] sm:$0xff] }
 0x3b3   :  { %6399 = vrcp.f32 %v672_v44  ;;  %v724_v44 = vld [vmem:[#allocation9 + $0x8] sm:$0xff] }
 0x3bc   :  { %v6398_v45 = vpop.eup %6397 }
 0x3bd   :  { %v676_v46 = vmul.f32 %v6398_v45, %v6390_v12  ;;  %v677_v47 = vmul.f32 %v6398_v45, %v6392_v13  ;;  %v6400_v48 = vpop.eup %6399 }
 0x3be   :  { %v679_v49 = vmul.f32 %v6400_v48, %v6394_v14  ;;  %v680_v51 = vmul.f32 %v6400_v48, %v6396_v18  ;;  %v7283_v48 = vpack.c.bf16 %v724_v44, %v723_v42 }
 0x3bf   :  { %683 = vperm.xlu0 %6377, %v676_v46  }
 0x3c3   :  { %688 = vperm.xlu0 %6377, %v677_v47  }
 0x3c7   :  { %693 = vperm.xlu0 %6377, %v679_v49  }
 0x3cb   :  { %698 = vperm.xlu0 %6377, %v680_v51   ;;  %v5818_v51 = vsel %vm346_vm6, 1.0, %v8590_v3 }
 0x3cf   :  { %886 = vrot.lane.b32.xlu0 %v7151_v0, %s6875_s1 }
 0x3d3   :  { %896 = vrot.lane.b32.xlu0 %v7151_v0, %s6876_s30  ;;  %v7254_v0 = vpack.c.bf16 %v728_v62, %v727_v55  ;;  %v7302_v62 = vld [vmem:[%s8582_s10] ss:$0 sm:$0xff] }
 0x3d5   :  { %6192 = vmatpush3.bf16.msra.mxu1 %v7254_v0  ;;  %6209 = vmatpush3.bf16.msra.mxu0 %v7254_v0 }
 0x3d6   :  { %6193 = vmatprep.subr.bf16.mxu1 %v8588_v2  ;;  %6214 = vmatprep.subr.bf16.mxu0 %v7051_v16 }
 0x43e   :  { %v7263_v63 = vpop.permute.xlu0 %683 }
 0x43f   :  { %v701_v6 = vmul.f32 %v7263_v63, %v7080_v26 }
 0x441   :  { %v705_v10 = vsel %vm209_vm1, %v701_v6, 0.0 }
 0x442   :  { %v7267_v8 = vpop.permute.xlu0 %688 }
 0x443   :  { %v702_v9 = vmul.f32 %v7267_v8, %v7085_v27 }
 0x445   :  { %v706_v11 = vsel %vm548_vm2, %v702_v9, 0.0 }
 0x446   :  { %v707_v12 = vadd.f32 %v706_v11, %v705_v10  ;;  %v7273_v13 = vpop.permute.xlu0 %693 }
 0x447   :  { %v703_v18 = vmul.f32 %v7273_v13, %v7097_v31 }
 0x448   :  { %v708_v14 = vrot.slane %v707_v12, 4 }
 0x449   :  { %v714_v22 = vsel %vm209_vm1, %v703_v18, 0.0 }
 0x44a   :  { %v709_v19 = vadd.f32 %v708_v14, %v707_v12  ;;  %v7277_v20 = vpop.permute.xlu0 %698 }
 0x44b   :  { %v704_v21 = vmul.f32 %v7277_v20, %v7118_v43 }
 0x44c   :  { %v710_v29 = vrot.slane %v709_v19, 2 }
 0x44d   :  { %v715_v23 = vsel %vm548_vm2, %v704_v21, 0.0 }
 0x44e   :  { %v716_v30 = vadd.f32 %v715_v23, %v714_v22  ;;  %v711_v36 = vadd.f32 %v710_v29, %v709_v19  ;;  %v887_v11 = vpop.permute.xlu0 %886 }
 0x450   :  { %v717_v32 = vrot.slane %v716_v30, 4  ;;  %v712_v40 = vrot.slane %v711_v36, 1 }
 0x452   :  { %v718_v37 = vadd.f32 %v717_v32, %v716_v30  ;;  %v713_v46 = vadd.f32 %v712_v40, %v711_v36  ;;  %v897_v22 = vpop.permute.xlu0 %896 }
 0x454   :  { %v719_v38 = vrot.slane %v718_v37, 2 }
 0x456   :  { %v720_v1 = vadd.f32 %v719_v38, %v718_v37 }
 0x458   :  { %v721_v45 = vrot.slane %v720_v1, 1 }
 0x45a   :  { %v722_v47 = vadd.f32 %v721_v45, %v720_v1 }
 0x45c   :  { %v731_v49 = vsel %vm595_vm4, %v722_v47, %v713_v46 }
 0x45d   :  { %5991 = vmatmul.mubr.msk.f32.vlgmr.msra.gmra.mrb[2].mxu1 %vm209_vm1, %v731_v49 }
 0x45e   :  { %6195 = vmatpush3.bf16.msra.mxu1 %v7283_v48  ;;  %5997 = vmatprep.mubr.msk.f32.mxu1 %vm6870_vm0, %v8590_v3 }
 0x45f   :  { %6197 = vmatprep.subr.bf16.mxu1 %v7051_v16 }
 0x461   :  { %5998 = vmatmul.mubr.msk.f32.vlgmr.msra.gmra.mrb[4].mxu1 %vm804_vm7, %v5818_v51 }
 0x462   :  { %6199 = vmatpush1.bf16.msra.mxu1 %v7053_v17  ;;  %986 = vmatprep.mubr.f32.mxu1 %v8590_v3 }
 0x463   :  { %6201 = vmatprep.subr.bf16.mxu1 %v7075_v25 }
 0x466   :  { %6203 = vmatpush1.bf16.msra.mxu1 %v7088_v28 }
 0x467   :  { %6210 = vmatprep.subr.bf16.mxu1 %v8588_v2 }
 0x530   :  { %v800_v53 = vpop.f32.mrb[2].mxu1 }
 0x531   :  { %v5992_v54 = vpop.f32.mrb[3].mxu1 }
 0x534   :  { %v874_v55 = vpop.f32.mrb[4].mxu1 }
 0x535   :  { %v875_v6 = vadd.f32 %v874_v55, %v800_v53  ;;  %v5999_v9 = vpop.f32.mrb[5].mxu1 }
 0x537   :  { %v885_v10 = vadd.f32 %v7302_v62, %v875_v6 }
 0x539   :  { %v889_v12 = vadd.f32 %v887_v11, %v885_v10 }
 0x53b   :  { %v5825_v14 = vmul.f32 -1.442695, %v889_v12 }
 0x53d   :  { %6401 = vpow2.f32 %v5825_v14 }
 0x547   :  { %v6402_v18 = vpop.eup %6401 }
 0x548   :  { %v893_v19 = vadd.f32 1.0, %v6402_v18 }
 0x54a   :  { %6403 = vrcp.f32 %v893_v19 }
 0x554   :  { %v6404_v21 = vpop.eup %6403 }
 0x555   :  { %v899_v23 = vmul.f32 %v6404_v21, %v897_v22  ;;  %v906_v37 = vsub.f32 1.0, %v6404_v21 }
 0x557   :  { %901 = vrot.lane.b32.xlu0 %v899_v23, %s6877_s24 }
 0x55b   :  { %912 = vrot.lane.b32.xlu0 %v7113_v41, %s6876_s30 }
 0x5c9   :  { %v902_v29 = vpop.permute.xlu0 %901 }
 0x5ca   :  { %v904_v30 = vadd.f32 %v902_v29, %v885_v10 }
 0x5cc   :  { %6405 = vtanh.f32 %v904_v30 }
 0x5cd   :  { %v913_v36 = vpop.permute.xlu0 %912 }
 0x5ce   :  { %v915_v1 = vmul.f32 %v6404_v21, %v913_v36 }
 0x5d6   :  { %v6406_v32 = vpop.eup %6405 }
 0x5d7   :  { %908 = vrot.lane.b32.xlu1 %v6406_v32, %s6875_s1 }
 0x649   :  { %v909_v38 = vpop.permute.xlu1 %908 }
 0x64a   :  { %v911_v40 = vmul.f32 %v909_v38, %v906_v37 }
 0x64c   :  { %v7309_v42 = vadd.f32 %v915_v1, %v911_v40 }
 0x64e   :  { %918 = vrot.lane.b32.xlu0 %v7309_v42, %s6875_s1 }
 0x6c0   :  { %v919_v44 = vpop.permute.xlu0 %918 }
 0x6c1   :  { %5826 = vmatmul.mubr.msk.f32.vlgmr.msra.gmra.mrb[6].mxu1 %vm209_vm1, %v919_v44 }
 0x6c2   :  { %6212 = vmatpush3.bf16.msra.mxu1 %v7283_v48  ;;  %6015 = vmatprep.mubr.msk.f32.mxu1 %vm6870_vm0, %v8590_v3 }
 0x6c3   :  { %6221 = vmatprep.subr.bf16.mxu1 %v8588_v2 }
 0x794   :  { %v988_v41 = vpop.f32.mrb[6].mxu1 }
 0x795   :  { %v7319_v45 = vadd.f32 %v988_v41, %v7148_v61  ;;  %v7321_v46 = vpop.f32.mrb[7].mxu1 }
 0x797   :  { %v1033_v47 = vrot.slane %v7319_v45, %v7154_v4 }
 0x799   :  { %v1034_v49 = vcombine.high %v1033_v47, %v1033_v47  ;;  %v1041_v51 = vrot.slane %v1033_v47, %v7154_v4 }
 0x79b   :  { %v1048_v53 = vrot.slane %v1034_v49, %v7154_v4  ;;  %v1052_v54 = vrot.slane %v1041_v51, %v7142_v57 }
 0x79d   :  { %v1056_v55 = vrot.slane %v1048_v53, %v7142_v57  ;;  %v1059_v6 = vadd.f32 %v1052_v54, %v7172_v50  ;;  %v1060_v9 = vadd.f32 %v1052_v54, %v7165_v39 }
 0x79f   :  { %v1061_v10 = vadd.f32 %v1056_v55, %v7181_v59  ;;  %v1062_v11 = vadd.f32 %v1056_v55, %v7179_v58  ;;  %6407 = vtanh.f32 %v1059_v6 }
 0x7a0   :  { %6409 = vtanh.f32 %v1060_v9 }
 0x7a1   :  { %6411 = vtanh.f32 %v1061_v10 }
 0x7a2   :  { %6413 = vtanh.f32 %v1062_v11 }
 0x7a9   :  { %v6408_v12 = vpop.eup %6407 }
 0x7aa   :  { %v6410_v14 = vpop.eup %6409  ;;  %v1067_v18 = vmul.f32 %v6408_v12, %v7185_v5 }
 0x7ab   :  { %v6412_v19 = vpop.eup %6411  ;;  %v1068_v21 = vmul.f32 %v6410_v14, %v7185_v5 }
 0x7ac   :  { %v1071_v22 = vsel %vm209_vm1, %v1067_v18, 0.0  ;;  %v1069_v23 = vmul.f32 %v6412_v19, %v7185_v5  ;;  %v6414_v29 = vpop.eup %6413 }
 0x7ad   :  { %v1074_v30 = vsel %vm548_vm2, %v1068_v21, 0.0  ;;  %1072 = vadd.xlane.f32.xlu0 %v1071_v22  ;;  %v1070_v36 = vmul.f32 %v6414_v29, %v7185_v5 }
 0x7ae   :  { %1075 = vadd.xlane.f32.xlu1 %v1074_v30  ;;  %v1077_v32 = vsel %vm209_vm1, %v1069_v23, 0.0 }
 0x7af   :  { %v1080_v37 = vsel %vm548_vm2, %v1070_v36, 0.0 }
 0x7b1   :  { %1078 = vadd.xlane.f32.xlu0 %v1077_v32 }
 0x7b5   :  { %1081 = vadd.xlane.f32.xlu0 %v1080_v37 }
 0x83a   :  { %v1073_v38 = vpop.xlane.xlu0 %1072 }
 0x83b   :  { %v1076_v1 = vpop.xlane.xlu1 %1075  ;;  %v1083_v41 = vadd.f32 %v1073_v38, %v7206_v35 }
 0x83c   :  { %v1084_v44 = vadd.f32 %v1076_v1, %v7206_v35 }
 0x83d   :  { %v1094_v53 = vrot.slane %v1083_v41, %v7204_v34 }
 0x83e   :  { %v1079_v40 = vpop.xlane.xlu0 %1078  ;;  %v1098_v51 = vrot.slane %v1084_v44, %v7200_v33 }
 0x83f   :  { %v1085_v47 = vadd.f32 %v1079_v40, %v7206_v35 }
 0x840   :  { %v1099_v9 = vsel %vm584_vm3, %v1098_v51, %v1094_v53 }
 0x841   :  { %v1103_v55 = vrot.slane %v1085_v47, %v7204_v34 }
 0x842   :  { %v1082_v49 = vpop.xlane.xlu0 %1081 }
 0x843   :  { %v1086_v54 = vadd.f32 %v1082_v49, %v7206_v35 }
 0x845   :  { %v1107_v6 = vrot.slane %v1086_v54, %v7200_v33 }
 0x847   :  { %v1108_v10 = vsel %vm584_vm3, %v1107_v6, %v1103_v55 }
 0x848   :  { %v1109_v11 = vsel %vm595_vm4, %v1108_v10, %v1099_v9 }
 0x849   :  { %v1111_v12 = vsel %vm598_vm5, %v1109_v11, -inf }
 0x84a   :  { %1112 = vmax.xlane.f32.xlu0 %v1111_v12 }
 0x8d7   :  { %v1113_v14 = vpop.xlane.xlu0 %1112 }
 0x8d8   :  { %v1118_v18 = vrot.slane %v1113_v14, %v7142_v57  ;;  %v1122_v19 = vrot.slane %v1113_v14, %v7221_v52 }
 0x8da   :  { %v1125_v21 = vsub.f32 %v1083_v41, %v1118_v18  ;;  %v1126_v22 = vsub.f32 %v1084_v44, %v1118_v18  ;;  %v1127_v23 = vsub.f32 %v1085_v47, %v1122_v19  ;;  %v1128_v32 = vsub.f32 %v1086_v54, %v1122_v19 }
 0x8db   :  { %v7357_v44 = vrot.slane %v7144_v60, %v7221_v52 }
 0x8dc   :  { %v1129_v29 = vmul.f32 1.442695, %v1125_v21  ;;  %v1131_v30 = vmul.f32 1.442695, %v1126_v22  ;;  %v1133_v36 = vmul.f32 1.442695, %v1127_v23 }
 0x8dd   :  { %v1135_v37 = vmul.f32 1.442695, %v1128_v32  ;;  %v7361_v41 = vadd.f32 %v7321_v46, %v7357_v44 }
 0x8de   :  { %6415 = vpow2.f32 %v1129_v29 }
 0x8df   :  { %6417 = vpow2.f32 %v1131_v30  ;;  %8622 = vst [vmem:[#allocation22_spill] sm:$0xff] %v7361_v41  ;;  %v994_v47 = vsel %vm993_vm8, %v7361_v41, -inf }
 0x8e0   :  { %6419 = vpow2.f32 %v1133_v36 }
 0x8e1   :  { %6421 = vpow2.f32 %v1135_v37 }
 0x8e8   :  { %v6416_v38 = vpop.eup %6415 }
 0x8e9   :  { %v6418_v1 = vpop.eup %6417  ;;  %1142 = vperm.xlu1 %6378, %v6416_v38  }
 0x8ea   :  { %1145 = vperm.xlu0 %6377, %v6418_v1   ;;  %v6420_v40 = vpop.eup %6419 }
 0x8eb   :  { %v6422_v49 = vpop.eup %6421 }
 0x8ed   :  { %1148 = vperm.xlu1 %6378, %v6420_v40  }
 0x8f1   :  { %1151 = vperm.xlu1 %6378, %v6422_v49  }
 0x909   :  { %995 = vmax.xlane.f32.xlu0 %v994_v47 }
 0x968   :  { %v1143_v51 = vpop.permute.xlu1 %1142 }
 0x969   :  { %v1146_v53 = vpop.permute.xlu0 %1145  ;;  %v1156_v6 = vrot.slane %v1143_v51, %v7204_v34 }
 0x96a   :  { %v1160_v55 = vrot.slane %v1146_v53, %v7200_v33 }
 0x96c   :  { %v1149_v54 = vpop.permute.xlu1 %1148  ;;  %v1161_v46 = vsel %vm584_vm3, %v1160_v55, %v1156_v6 }
 0x96d   :  { %v1165_v60 = vrot.slane %v1149_v54, %v7204_v34 }
 0x970   :  { %v1152_v9 = vpop.permute.xlu1 %1151 }
 0x971   :  { %v1169_v10 = vrot.slane %v1152_v9, %v7200_v33 }
 0x973   :  { %v1170_v11 = vsel %vm584_vm3, %v1169_v10, %v1165_v60 }
 0x974   :  { %v1171_v12 = vsel %vm595_vm4, %v1170_v11, %v1161_v46 }
 0x975   :  { %v1173_v14 = vsel %vm598_vm5, %v1171_v12, 0.0 }
 0x976   :  { %1174 = vadd.xlane.f32.xlu1 %v1173_v14 }
 0x996   :  { %v7373_v18 = vpop.xlane.xlu0 %995 }
 0x997   :  { %8623 = vst [vmem:[#allocation23_spill] sm:$0xff] %v7373_v18  ;;  %vm1006_vm9 = vcmp.ge.f32.partialorder %v7361_v41, %v7373_v18 }
 0x998   :  { %v1007_v19 = vsel %vm1006_vm9, %v7196_v24, 16 }
 0x999   :  { %v1008_v21 = vsel %vm993_vm8, %v1007_v19, 2147483647 }
 0x99a   :  { %v1010_v22 = vshra.s32 %v1008_v21, 16  ;;  %v1009_v6 = vand.u32 65535, %v1008_v21 }
 0x99c   :  { %v1012_v23 = vcvt.s32.f32 %v1010_v22  ;;  %v1011_v9 = vcvt.s32.f32 %v1009_v6 }
 0x99e   :  { %1013 = vmin.xlane.f32.xlu0 %v1012_v23 }
 0xa03   :  { %v1175_v29 = vpop.xlane.xlu1 %1174 }
 0xa04   :  { %v1180_v30 = vrot.slane %v1175_v29, %v7142_v57  ;;  %v1184_v32 = vrot.slane %v1175_v29, %v7221_v52 }
 0xa06   :  { %6423 = vrcp.f32 %v1180_v30 }
 0xa07   :  { %6425 = vrcp.f32 %v1184_v32 }
 0xa10   :  { %v6424_v36 = vpop.eup %6423 }
 0xa11   :  { %v1189_v37 = vmul.f32 %v6424_v36, %v6418_v1  ;;  %v1188_v47 = vmul.f32 %v6424_v36, %v6416_v38  ;;  %v6426_v51 = vpop.eup %6425 }
 0xa12   :  { %v1191_v53 = vmul.f32 %v6426_v51, %v6420_v40  ;;  %v1192_v54 = vmul.f32 %v6426_v51, %v6422_v49 }
 0xa13   :  { %1200 = vperm.xlu1 %6378, %v1189_v37   ;;  %1195 = vperm.xlu0 %6377, %v1188_v47  }
 0xa17   :  { %1205 = vperm.xlu1 %6378, %v1191_v53   ;;  %1210 = vperm.xlu0 %6377, %v1192_v54  }
 0xa1b   :  { %1384 = vrot.lane.b32.xlu0 %v7319_v45, %s6875_s1 }
 0xa1f   :  { %1394 = vrot.lane.b32.xlu0 %v7319_v45, %s6876_s30 }
 0xa2b   :  { %v1014_v55 = vpop.xlane.xlu0 %1013 }
 0xa2c   :  { %vm1015_vm10 = vcmp.eq.f32.partialorder %v1012_v23, %v1014_v55 }
 0xa2d   :  { %v1016_v60 = vsel %vm1015_vm10, %v1011_v9, inf }
 0xa3b   :  { %1017 = vmin.xlane.f32.xlu1 %v1016_v60 }
 0xa92   :  { %v7385_v38 = vpop.permute.xlu1 %1200  ;;  %v7387_v1 = vpop.permute.xlu0 %1195 }
 0xa93   :  { %v1214_v40 = vmul.f32 %v7385_v38, %v7085_v27  ;;  %v1213_v49 = vmul.f32 %v7387_v1, %v7080_v26 }
 0xa95   :  { %v1218_v10 = vsel %vm548_vm2, %v1214_v40, 0.0  ;;  %v1217_v45 = vsel %vm209_vm1, %v1213_v49, 0.0 }
 0xa96   :  { %v1219_v46 = vadd.f32 %v1218_v10, %v1217_v45  ;;  %v7395_v11 = vpop.permute.xlu1 %1205  ;;  %v7397_v12 = vpop.permute.xlu0 %1210 }
 0xa97   :  { %v1215_v14 = vmul.f32 %v7395_v11, %v7097_v31  ;;  %v1216_v19 = vmul.f32 %v7397_v12, %v7118_v43  ;;  %v1020_v43 = vcvt.f32.s32 %v1014_v55 }
 0xa98   :  { %v1220_v21 = vrot.slane %v1219_v46, 4 }
 0xa99   :  { %v1226_v27 = vsel %vm209_vm1, %v1215_v14, 0.0  ;;  %v1227_v26 = vsel %vm548_vm2, %v1216_v19, 0.0  ;;  %v1021_v60 = vshll.u32 %v1020_v43, 16 }
 0xa9a   :  { %v1221_v22 = vadd.f32 %v1220_v21, %v1219_v46  ;;  %v1228_v23 = vadd.f32 %v1227_v26, %v1226_v27  ;;  %v1385_v27 = vpop.permute.xlu0 %1384 }
 0xa9c   :  { %v1222_v29 = vrot.slane %v1221_v22, 2  ;;  %v1229_v30 = vrot.slane %v1228_v23, 4 }
 0xa9e   :  { %v1223_v32 = vadd.f32 %v1222_v29, %v1221_v22  ;;  %v1230_v36 = vadd.f32 %v1229_v30, %v1228_v23 }
 0xaa0   :  { %v1231_v37 = vrot.slane %v1230_v36, 2  ;;  %v1224_v47 = vrot.slane %v1223_v32, 1 }
 0xaa2   :  { %v1232_v51 = vadd.f32 %v1231_v37, %v1230_v36  ;;  %v1225_v54 = vadd.f32 %v1224_v47, %v1223_v32  ;;  %v1395_v32 = vpop.permute.xlu0 %1394 }
 0xaa4   :  { %v1233_v53 = vrot.slane %v1232_v51, 1 }
 0xaa6   :  { %v1234_v31 = vadd.f32 %v1233_v53, %v1232_v51 }
 0xaa8   :  { %v1237_v6 = vsel %vm595_vm4, %v1234_v31, %v1225_v54 }
 0xaa9   :  { %6009 = vmatmul.mubr.msk.f32.vlgmr.msra.gmra.mrb[6].mxu0 %vm209_vm1, %v1237_v6 }
 0xaaa   :  { %6216 = vmatpush1.bf16.msra.mxu0 %v7053_v17  ;;  %1481 = vmatprep.mubr.f32.mxu0 %v8590_v3 }
 0xaab   :  { %6218 = vmatprep.subr.bf16.mxu0 %v7075_v25 }
 0xaae   :  { %6220 = vmatpush1.bf16.msra.mxu0 %v7088_v28 }
 0xaaf   :  { %6227 = vmatprep.subr.bf16.mxu0 %v8588_v2 }
 0xac8   :  { %v1018_v9 = vpop.xlane.xlu1 %1017 }
 0xac9   :  { %v1019_v40 = vcvt.f32.s32 %v1018_v9 }
 0xacb   :  { %v1022_v49 = vadd.s32 %v1021_v60, %v1019_v40 }
 0xacd   :  { %vm1023_vm11 = vcmp.eq.s32.totalorder %v7196_v24, %v1022_v49 }
 0xace   :  { %v5827_v10 = vsel %vm1023_vm11, 1.0, %v8590_v3 }
 0xacf   :  { %6016 = vmatmul.mubr.msk.f32.vlgmr.msra.gmra.mrb[8].mxu1 %vm804_vm7, %v5827_v10 }
 0xad0   :  { %6223 = vmatpush3.bf16.msra.mxu1 %v7248_v56  ;;  %6026 = vmatprep.mubr.msk.f32.mxu1 %vm6870_vm0, %v8590_v3 }
 0xad1   :  { %6224 = vmatprep.subr.bf16.mxu1 %v8588_v2 }
 0xad4   :  { %6226 = vmatpush3.bf16.msra.mxu1 %v7254_v0 }
 0xad5   :  { %6231 = vmatprep.subr.bf16.mxu1 %v7051_v16 }
 0xb7c   :  { %v1306_v55 = vpop.f32.mrb[6].mxu0 }
 0xb7d   :  { %v6010_v45 = vpop.f32.mrb[7].mxu0 }
 0xba2   :  { %v1379_v46 = vpop.f32.mrb[8].mxu1 }
 0xba3   :  { %v1380_v14 = vadd.f32 %v1379_v46, %v1306_v55  ;;  %v6017_v19 = vpop.f32.mrb[9].mxu1 }
 0xba5   :  { %v1383_v21 = vadd.f32 %v7302_v62, %v1380_v14 }
 0xba7   :  { %v1387_v26 = vadd.f32 %v1385_v27, %v1383_v21 }
 0xba9   :  { %v5830_v22 = vmul.f32 -1.442695, %v1387_v26 }
 0xbab   :  { %6427 = vpow2.f32 %v5830_v22 }
 0xbb5   :  { %v6428_v23 = vpop.eup %6427 }
 0xbb6   :  { %v1391_v29 = vadd.f32 1.0, %v6428_v23 }
 0xbb8   :  { %6429 = vrcp.f32 %v1391_v29 }
 0xbc2   :  { %v6430_v30 = vpop.eup %6429 }
 0xbc3   :  { %v1397_v36 = vmul.f32 %v6430_v30, %v1395_v32  ;;  %v1404_v53 = vsub.f32 1.0, %v6430_v30  ;;  %v1410_v31 = vmul.f32 %v6430_v30, %v7309_v42 }
 0xbc5   :  { %1399 = vrot.lane.b32.xlu0 %v1397_v36, %s6877_s24 }
 0xc37   :  { %v1400_v37 = vpop.permute.xlu0 %1399 }
 0xc38   :  { %v1402_v47 = vadd.f32 %v1400_v37, %v1383_v21 }
 0xc3a   :  { %6431 = vtanh.f32 %v1402_v47 }
 0xc44   :  { %v6432_v51 = vpop.eup %6431 }
 0xc45   :  { %1406 = vrot.lane.b32.xlu0 %v6432_v51, %s6875_s1 }
 0xcb7   :  { %v1407_v54 = vpop.permute.xlu0 %1406 }
 0xcb8   :  { %v1409_v6 = vmul.f32 %v1407_v54, %v1404_v53 }
 0xcba   :  { %v7425_v43 = vadd.f32 %v1410_v31, %v1409_v6 }
 0xcbc   :  { %1413 = vrot.lane.b32.xlu0 %v7425_v43, %s6875_s1 }
 0xd2e   :  { %v1414_v9 = vpop.permute.xlu0 %1413 }
 0xd2f   :  { %5831 = vmatmul.mubr.msk.f32.vlgmr.msra.gmra.mrb[8].mxu0 %vm209_vm1, %v1414_v9 }
 0xd30   :  { %6229 = vmatpush3.bf16.msra.mxu0 %v7283_v48  ;;  %6033 = vmatprep.mubr.msk.f32.mxu0 %vm6870_vm0, %v8590_v3 }
 0xd31   :  { %6238 = vmatprep.subr.bf16.mxu0 %v8588_v2 }
 0xe02   :  { %v1483_v60 = vpop.f32.mrb[8].mxu0 }
 0xe03   :  { %v7435_v40 = vadd.f32 %v1483_v60, %v7148_v61  ;;  %v7437_v42 = vpop.f32.mrb[9].mxu0 }
 0xe05   :  { %v1527_v49 = vrot.slane %v7435_v40, %v7154_v4 }
 0xe07   :  { %v1528_v10 = vcombine.high %v1527_v49, %v1527_v49  ;;  %v1535_v55 = vrot.slane %v1527_v49, %v7154_v4 }
 0xe09   :  { %v1542_v45 = vrot.slane %v1528_v10, %v7154_v4  ;;  %v1546_v46 = vrot.slane %v1535_v55, %v7142_v57 }
 0xe0b   :  { %v1550_v14 = vrot.slane %v1542_v45, %v7142_v57  ;;  %v1553_v19 = vadd.f32 %v1546_v46, %v7172_v50  ;;  %v1554_v21 = vadd.f32 %v1546_v46, %v7165_v39 }
 0xe0d   :  { %v1555_v27 = vadd.f32 %v1550_v14, %v7181_v59  ;;  %6433 = vtanh.f32 %v1553_v19  ;;  %v1556_v26 = vadd.f32 %v1550_v14, %v7179_v58 }
 0xe0e   :  { %6435 = vtanh.f32 %v1554_v21 }
 0xe0f   :  { %6437 = vtanh.f32 %v1555_v27 }
 0xe10   :  { %6439 = vtanh.f32 %v1556_v26 }
 0xe17   :  { %v6434_v22 = vpop.eup %6433 }
 0xe18   :  { %v6436_v23 = vpop.eup %6435  ;;  %v1561_v29 = vmul.f32 %v6434_v22, %v7185_v5 }
 0xe19   :  { %v6438_v30 = vpop.eup %6437  ;;  %v1562_v32 = vmul.f32 %v6436_v23, %v7185_v5 }
 0xe1a   :  { %v1565_v36 = vsel %vm209_vm1, %v1561_v29, 0.0  ;;  %v1563_v47 = vmul.f32 %v6438_v30, %v7185_v5  ;;  %v6440_v51 = vpop.eup %6439 }
 0xe1b   :  { %v1568_v37 = vsel %vm548_vm2, %v1562_v32, 0.0  ;;  %1566 = vadd.xlane.f32.xlu0 %v1565_v36  ;;  %v1564_v54 = vmul.f32 %v6440_v51, %v7185_v5 }
 0xe1c   :  { %1569 = vadd.xlane.f32.xlu1 %v1568_v37  ;;  %v1571_v53 = vsel %vm209_vm1, %v1563_v47, 0.0 }
 0xe1d   :  { %v1574_v31 = vsel %vm548_vm2, %v1564_v54, 0.0 }
 0xe20   :  { %1572 = vadd.xlane.f32.xlu1 %v1571_v53 }
 0xe24   :  { %1575 = vadd.xlane.f32.xlu1 %v1574_v31 }
 0xea8   :  { %v1567_v9 = vpop.xlane.xlu0 %1566 }
 0xea9   :  { %v1570_v6 = vpop.xlane.xlu1 %1569  ;;  %v1577_v10 = vadd.f32 %v1567_v9, %v7206_v35 }
 0xeaa   :  { %v1578_v49 = vadd.f32 %v1570_v6, %v7206_v35 }
 0xeab   :  { %v1588_v14 = vrot.slane %v1577_v10, %v7204_v34 }
 0xeac   :  { %v1592_v46 = vrot.slane %v1578_v49, %v7200_v33 }
 0xead   :  { %v1573_v60 = vpop.xlane.xlu1 %1572 }
 0xeae   :  { %v1579_v55 = vadd.f32 %v1573_v60, %v7206_v35  ;;  %v1593_v27 = vsel %vm584_vm3, %v1592_v46, %v1588_v14 }
 0xeb0   :  { %v1597_v19 = vrot.slane %v1579_v55, %v7204_v34 }
 0xeb1   :  { %v1576_v45 = vpop.xlane.xlu1 %1575 }
 0xeb2   :  { %v1580_v5 = vadd.f32 %v1576_v45, %v7206_v35 }
 0xeb4   :  { %v1601_v21 = vrot.slane %v1580_v5, %v7200_v33 }
 0xeb6   :  { %v1602_v26 = vsel %vm584_vm3, %v1601_v21, %v1597_v19 }
 0xeb7   :  { %v1603_v22 = vsel %vm595_vm4, %v1602_v26, %v1593_v27 }
 0xeb8   :  { %v1605_v23 = vsel %vm598_vm5, %v1603_v22, -inf }
 0xeb9   :  { %1606 = vmax.xlane.f32.xlu1 %v1605_v23 }
 0xf46   :  { %v1607_v29 = vpop.xlane.xlu1 %1606 }
 0xf47   :  { %v1612_v30 = vrot.slane %v1607_v29, %v7142_v57  ;;  %v1616_v32 = vrot.slane %v1607_v29, %v7221_v52 }
 0xf49   :  { %v1619_v36 = vsub.f32 %v1577_v10, %v1612_v30  ;;  %v1620_v37 = vsub.f32 %v1578_v49, %v1612_v30  ;;  %v1621_v47 = vsub.f32 %v1579_v55, %v1616_v32  ;;  %v1622_v54 = vsub.f32 %v1580_v5, %v1616_v32 }
 0xf4a   :  { %v7473_v49 = vadd.f32 %v7437_v42, %v7357_v44 }
 0xf4b   :  { %v1623_v51 = vmul.f32 1.442695, %v1619_v36  ;;  %v1625_v53 = vmul.f32 1.442695, %v1620_v37  ;;  %v1627_v31 = vmul.f32 1.442695, %v1621_v47 }
 0xf4c   :  { %v1629_v6 = vmul.f32 1.442695, %v1622_v54  ;;  %8624 = vst [vmem:[#allocation24_spill] sm:$0xff] %v7473_v49  ;;  %v1488_v10 = vsel %vm993_vm8, %v7473_v49, -inf }
 0xf4d   :  { %6441 = vpow2.f32 %v1623_v51 }
 0xf4e   :  { %6443 = vpow2.f32 %v1625_v53 }
 0xf4f   :  { %6445 = vpow2.f32 %v1627_v31 }
 0xf50   :  { %6447 = vpow2.f32 %v1629_v6 }
 0xf57   :  { %v6442_v9 = vpop.eup %6441 }
 0xf58   :  { %v6444_v60 = vpop.eup %6443  ;;  %1636 = vperm.xlu1 %6378, %v6442_v9  }
 0xf59   :  { %1639 = vperm.xlu0 %6377, %v6444_v60   ;;  %v6446_v45 = vpop.eup %6445 }
 0xf5a   :  { %v6448_v46 = vpop.eup %6447 }
 0xf5c   :  { %1642 = vperm.xlu1 %6378, %v6446_v45  }
 0xf60   :  { %1645 = vperm.xlu1 %6378, %v6448_v46  }
 0xf78   :  { %1489 = vmax.xlane.f32.xlu0 %v1488_v10 }
 0xfd7   :  { %v1637_v55 = vpop.permute.xlu1 %1636 }
 0xfd8   :  { %v1640_v14 = vpop.permute.xlu0 %1639  ;;  %v1650_v21 = vrot.slane %v1637_v55, %v7204_v34 }
 0xfd9   :  { %v1654_v19 = vrot.slane %v1640_v14, %v7200_v33 }
 0xfdb   :  { %v1643_v5 = vpop.permute.xlu1 %1642  ;;  %v1655_v23 = vsel %vm584_vm3, %v1654_v19, %v1650_v21 }
 0xfdc   :  { %v1659_v26 = vrot.slane %v1643_v5, %v7204_v34 }
 0xfdf   :  { %v1646_v27 = vpop.permute.xlu1 %1645 }
 0xfe0   :  { %v1663_v22 = vrot.slane %v1646_v27, %v7200_v33 }
 0xfe2   :  { %v1664_v42 = vsel %vm584_vm3, %v1663_v22, %v1659_v26 }
 0xfe3   :  { %v1665_v29 = vsel %vm595_vm4, %v1664_v42, %v1655_v23 }
 0xfe4   :  { %v1667_v30 = vsel %vm598_vm5, %v1665_v29, 0.0 }
 0xfe5   :  { %1668 = vadd.xlane.f32.xlu1 %v1667_v30 }
0x1005   :  { %v7485_v32 = vpop.xlane.xlu0 %1489 }
0x1006   :  { %8625 = vst [vmem:[#allocation25_spill] sm:$0xff] %v7485_v32  ;;  %vm1500_vm12 = vcmp.ge.f32.partialorder %v7473_v49, %v7485_v32 }
0x1007   :  { %v1501_v36 = vsel %vm1500_vm12, %v7196_v24, 16 }
0x1008   :  { %v1502_v37 = vsel %vm993_vm8, %v1501_v36, 2147483647 }
0x1009   :  { %v1504_v47 = vshra.s32 %v1502_v37, 16  ;;  %v1503_v27 = vand.u32 65535, %v1502_v37 }
0x100b   :  { %v1506_v51 = vcvt.s32.f32 %v1504_v47  ;;  %v1505_v26 = vcvt.s32.f32 %v1503_v27  ;;  %v7524_v47 = vld [vmem:[%s8572_s0 + $0x10] sm:$0xff] }
0x100d   :  { %1507 = vmin.xlane.f32.xlu0 %v1506_v51 }
0x1072   :  { %v1669_v53 = vpop.xlane.xlu1 %1668 }
0x1073   :  { %v1674_v54 = vrot.slane %v1669_v53, %v7142_v57  ;;  %v1678_v31 = vrot.slane %v1669_v53, %v7221_v52  ;;  %v7531_v53 = vld [vmem:[%s8572_s0 + $0x18] sm:$0x3] }
0x1075   :  { %6449 = vrcp.f32 %v1674_v54 }
0x1076   :  { %6451 = vrcp.f32 %v1678_v31 }
0x107f   :  { %v6450_v6 = vpop.eup %6449 }
0x1080   :  { %v1683_v10 = vmul.f32 %v6450_v6, %v6444_v60  ;;  %v1682_v55 = vmul.f32 %v6450_v6, %v6442_v9  ;;  %v6452_v14 = vpop.eup %6451 }
0x1081   :  { %v1685_v5 = vmul.f32 %v6452_v14, %v6446_v45  ;;  %v1686_v19 = vmul.f32 %v6452_v14, %v6448_v46  ;;  %v7504_v45 = vld [vmem:[%s8572_s0 + $0x8] sm:$0x3] }
0x1082   :  { %1694 = vperm.xlu1 %6378, %v1683_v10   ;;  %1689 = vperm.xlu0 %6377, %v1682_v55  }
0x1086   :  { %1699 = vperm.xlu1 %6378, %v1685_v5   ;;  %1704 = vperm.xlu0 %6377, %v1686_v19  }
0x108a   :  { %1878 = vrot.lane.b32.xlu0 %v7435_v40, %s6875_s1 }
0x108e   :  { %1888 = vrot.lane.b32.xlu0 %v7435_v40, %s6876_s30  ;;  %v7511_v40 = vld [vmem:[%s8572_s0] sm:$0xff] }
0x109a   :  { %v1508_v21 = vpop.xlane.xlu0 %1507 }
0x109b   :  { %vm1509_vm13 = vcmp.eq.f32.partialorder %v1506_v51, %v1508_v21 }
0x109c   :  { %v1510_v22 = vsel %vm1509_vm13, %v1505_v26, inf }
0x10aa   :  { %1511 = vmin.xlane.f32.xlu1 %v1510_v22 }
0x1101   :  { %v7497_v9 = vpop.permute.xlu1 %1694  ;;  %v7499_v60 = vpop.permute.xlu0 %1689 }
0x1102   :  { %8626 = vst [vmem:[#allocation26_spill] sm:$0xff] %v7499_v60  ;;  %v1708_v46 = vmul.f32 %v7504_v45, %v7497_v9  ;;  %v1707_v23 = vmul.f32 %v7511_v40, %v7499_v60 }
0x1104   :  { %v1712_v42 = vsel %vm548_vm2, %v1708_v46, 0.0  ;;  %v1711_v29 = vsel %vm209_vm1, %v1707_v23, 0.0 }
0x1105   :  { %v1713_v30 = vadd.f32 %v1712_v42, %v1711_v29  ;;  %v7517_v36 = vpop.permute.xlu1 %1699  ;;  %v7519_v37 = vpop.permute.xlu0 %1704 }
0x1106   :  { %v1709_v51 = vmul.f32 %v7524_v47, %v7517_v36  ;;  %v1710_v54 = vmul.f32 %v7531_v53, %v7519_v37 }
0x1107   :  { %v1714_v31 = vrot.slane %v1713_v30, 4 }
0x1108   :  { %v1720_v6 = vsel %vm209_vm1, %v1709_v51, 0.0  ;;  %v1721_v10 = vsel %vm548_vm2, %v1710_v54, 0.0  ;;  %v8627_v51 = vmov 0.0   ;;  %v1514_v54 = vcvt.f32.s32 %v1508_v21 }
0x1109   :  { %v1715_v55 = vadd.f32 %v1714_v31, %v1713_v30  ;;  %v1722_v14 = vadd.f32 %v1721_v10, %v1720_v6  ;;  %v8628_v30 = vmov 0.0|0.0  }
0x110a   :  { %v1515_v6 = vshll.u32 %v1514_v54, 16 }
0x110b   :  { %v1716_v5 = vrot.slane %v1715_v55, 2  ;;  %v1723_v19 = vrot.slane %v1722_v14, 4 }
0x110d   :  { %v1717_v27 = vadd.f32 %v1716_v5, %v1715_v55  ;;  %v1724_v26 = vadd.f32 %v1723_v19, %v1722_v14 }
0x110f   :  { %v1725_v22 = vrot.slane %v1724_v26, 2  ;;  %v1718_v23 = vrot.slane %v1717_v27, 1 }
0x1111   :  { %v1726_v46 = vadd.f32 %v1725_v22, %v1724_v26  ;;  %v1719_v29 = vadd.f32 %v1718_v23, %v1717_v27  ;;  %v1879_v26 = vpop.permute.xlu0 %1878 }
0x1113   :  { %v1727_v42 = vrot.slane %v1726_v46, 1 }
0x1115   :  { %v1728_v2 = vadd.f32 %v1727_v42, %v1726_v46  ;;  %v1889_v54 = vpop.permute.xlu0 %1888 }
0x1117   :  { %v1731_v3 = vsel %vm595_vm4, %v1728_v2, %v1719_v29 }
0x1118   :  { %6027 = vmatmul.mubr.msk.f32.vlgmr.msra.gmra.mrb[10].mxu1 %vm209_vm1, %v1731_v3 }
0x1119   :  { %6233 = vmatpush1.bf16.msra.mxu1 %v7053_v17  ;;  %1975 = vmatprep.mubr.f32.mxu1 %v8627_v51 }
0x111a   :  { %6235 = vmatprep.subr.bf16.mxu1 %v7075_v25 }
0x111d   :  { %6237 = vmatpush1.bf16.msra.mxu1 %v7088_v28 }
0x111e   :  { %6244 = vmatprep.subr.bf16.mxu1 %v8628_v30 }
0x1137   :  { %v1512_v31 = vpop.xlane.xlu1 %1511 }
0x1138   :  { %v1513_v10 = vcvt.f32.s32 %v1512_v31 }
0x113a   :  { %v1516_v55 = vadd.s32 %v1515_v6, %v1513_v10 }
0x113c   :  { %vm1517_vm14 = vcmp.eq.s32.totalorder %v7196_v24, %v1516_v55 }
0x113d   :  { %v5832_v2 = vsel %vm1517_vm14, 1.0, %v8627_v51 }
0x113e   :  { %6034 = vmatmul.mubr.msk.f32.vlgmr.msra.gmra.mrb[10].mxu0 %vm804_vm7, %v5832_v2 }
0x113f   :  { %6240 = vmatpush3.bf16.msra.mxu0 %v7248_v56  ;;  %6044 = vmatprep.mubr.msk.f32.mxu0 %vm6870_vm0, %v8627_v51 }
0x1140   :  { %6241 = vmatprep.subr.bf16.mxu0 %v8628_v30 }
0x1143   :  { %6243 = vmatpush3.bf16.msra.mxu0 %v7254_v0 }
0x1144   :  { %6248 = vmatprep.subr.bf16.mxu0 %v7051_v16 }
0x11eb   :  { %v1800_v3 = vpop.f32.mrb[10].mxu1 }
0x11ec   :  { %v6028_v21 = vpop.f32.mrb[11].mxu1 }
0x1211   :  { %v1873_v14 = vpop.f32.mrb[10].mxu0 }
0x1212   :  { %v1874_v5 = vadd.f32 %v1873_v14, %v1800_v3  ;;  %v6035_v19 = vpop.f32.mrb[11].mxu0 }
0x1214   :  { %v1877_v27 = vadd.f32 %v7302_v62, %v1874_v5 }
0x1216   :  { %v1881_v22 = vadd.f32 %v1879_v26, %v1877_v27 }
0x1218   :  { %v5835_v46 = vmul.f32 -1.442695, %v1881_v22 }
0x121a   :  { %6453 = vpow2.f32 %v5835_v46 }
0x1224   :  { %v6454_v23 = vpop.eup %6453 }
0x1225   :  { %v1885_v42 = vadd.f32 1.0, %v6454_v23 }
0x1227   :  { %6455 = vrcp.f32 %v1885_v42 }
0x1231   :  { %v6456_v29 = vpop.eup %6455 }
0x1232   :  { %v1891_v31 = vmul.f32 %v6456_v29, %v1889_v54  ;;  %v1898_v2 = vsub.f32 1.0, %v6456_v29  ;;  %v1904_v3 = vmul.f32 %v6456_v29, %v7425_v43 }
0x1234   :  { %1893 = vrot.lane.b32.xlu0 %v1891_v31, %s6877_s24 }
0x12a6   :  { %v1894_v6 = vpop.permute.xlu0 %1893 }
0x12a7   :  { %v1896_v10 = vadd.f32 %v1894_v6, %v1877_v27 }
0x12a9   :  { %6457 = vtanh.f32 %v1896_v10 }
0x12b3   :  { %v6458_v55 = vpop.eup %6457 }
0x12b4   :  { %1900 = vrot.lane.b32.xlu0 %v6458_v55, %s6875_s1 }
0x1326   :  { %v1901_v62 = vpop.permute.xlu0 %1900 }
0x1327   :  { %v1903_v21 = vmul.f32 %v1901_v62, %v1898_v2  ;;  %v7581_v62 = vld [vmem:[#allocation8] ss:$0 sm:$0xff] }
0x1329   :  { %v7557_v14 = vadd.f32 %v1904_v3, %v1903_v21 }
0x132b   :  { %1907 = vrot.lane.b32.xlu0 %v7557_v14, %s6875_s1 }
0x139d   :  { %v1908_v5 = vpop.permute.xlu0 %1907 }
0x139e   :  { %5836 = vmatmul.mubr.msk.f32.vlgmr.msra.gmra.mrb[12].mxu1 %vm209_vm1, %v1908_v5 }
0x139f   :  { %6246 = vmatpush3.bf16.msra.mxu1 %v7283_v48  ;;  %6051 = vmatprep.mubr.msk.f32.mxu1 %vm6870_vm0, %v8627_v51 }
0x13a0   :  { %6255 = vmatprep.subr.bf16.mxu1 %v8628_v30 }
0x1471   :  { %v1977_v19 = vpop.f32.mrb[12].mxu1 }
0x1472   :  { %v7567_v27 = vadd.f32 %v1977_v19, %v7148_v61  ;;  %v7569_v43 = vpop.f32.mrb[13].mxu1 }
0x1474   :  { %v2021_v26 = vrot.slane %v7567_v27, %v7154_v4 }
0x1476   :  { %v2022_v22 = vcombine.high %v2021_v26, %v2021_v26  ;;  %v2029_v46 = vrot.slane %v2021_v26, %v7154_v4 }
0x1478   :  { %v2036_v23 = vrot.slane %v2022_v22, %v7154_v4  ;;  %v2040_v42 = vrot.slane %v2029_v46, %v7142_v57 }
0x147a   :  { %v2044_v29 = vrot.slane %v2036_v23, %v7142_v57  ;;  %v2047_v54 = vadd.f32 %v2040_v42, %v7172_v50  ;;  %v2048_v31 = vadd.f32 %v2040_v42, %v7165_v39 }
0x147c   :  { %v2049_v6 = vadd.f32 %v2044_v29, %v7181_v59  ;;  %6459 = vtanh.f32 %v2047_v54  ;;  %v2050_v10 = vadd.f32 %v2044_v29, %v7179_v58 }
0x147d   :  { %6461 = vtanh.f32 %v2048_v31 }
0x147e   :  { %6463 = vtanh.f32 %v2049_v6 }
0x147f   :  { %6465 = vtanh.f32 %v2050_v10 }
0x1486   :  { %v6460_v55 = vpop.eup %6459 }
0x1487   :  { %v6462_v2 = vpop.eup %6461  ;;  %v2055_v3 = vmul.f32 %v7581_v62, %v6460_v55 }
0x1488   :  { %v6464_v21 = vpop.eup %6463  ;;  %v2056_v5 = vmul.f32 %v7581_v62, %v6462_v2 }
0x1489   :  { %v2059_v19 = vsel %vm209_vm1, %v2055_v3, 0.0  ;;  %v2057_v22 = vmul.f32 %v7581_v62, %v6464_v21  ;;  %v6466_v46 = vpop.eup %6465 }
0x148a   :  { %v2062_v26 = vsel %vm548_vm2, %v2056_v5, 0.0  ;;  %2060 = vadd.xlane.f32.xlu0 %v2059_v19  ;;  %v2058_v42 = vmul.f32 %v7581_v62, %v6466_v46 }
0x148b   :  { %2063 = vadd.xlane.f32.xlu1 %v2062_v26  ;;  %v2065_v23 = vsel %vm209_vm1, %v2057_v22, 0.0 }
0x148c   :  { %v2068_v29 = vsel %vm548_vm2, %v2058_v42, 0.0 }
0x148f   :  { %2066 = vadd.xlane.f32.xlu1 %v2065_v23 }
0x1493   :  { %2069 = vadd.xlane.f32.xlu1 %v2068_v29 }
0x1517   :  { %v2061_v31 = vpop.xlane.xlu0 %2060 }
0x1518   :  { %v2064_v54 = vpop.xlane.xlu1 %2063  ;;  %v2071_v55 = vadd.f32 %v2061_v31, %v7206_v35 }
0x1519   :  { %v2072_v10 = vadd.f32 %v2064_v54, %v7206_v35 }
0x151a   :  { %v2082_v5 = vrot.slane %v2071_v55, %v7204_v34 }
0x151b   :  { %v2086_v21 = vrot.slane %v2072_v10, %v7200_v33 }
0x151c   :  { %v2067_v6 = vpop.xlane.xlu1 %2066 }
0x151d   :  { %v2073_v2 = vadd.f32 %v2067_v6, %v7206_v35  ;;  %v2087_v46 = vsel %vm584_vm3, %v2086_v21, %v2082_v5 }
0x151f   :  { %v2091_v26 = vrot.slane %v2073_v2, %v7204_v34 }
0x1520   :  { %v2070_v3 = vpop.xlane.xlu1 %2069 }
0x1521   :  { %v2074_v19 = vadd.f32 %v2070_v3, %v7206_v35 }
0x1523   :  { %v2095_v22 = vrot.slane %v2074_v19, %v7200_v33 }
0x1525   :  { %v2096_v23 = vsel %vm584_vm3, %v2095_v22, %v2091_v26 }
0x1526   :  { %v2097_v42 = vsel %vm595_vm4, %v2096_v23, %v2087_v46 }
0x1527   :  { %v2099_v29 = vsel %vm598_vm5, %v2097_v42, -inf }
0x1528   :  { %2100 = vmax.xlane.f32.xlu1 %v2099_v29 }
0x15b5   :  { %v2101_v54 = vpop.xlane.xlu1 %2100 }
0x15b6   :  { %v2106_v31 = vrot.slane %v2101_v54, %v7142_v57  ;;  %v2110_v6 = vrot.slane %v2101_v54, %v7221_v52 }
0x15b8   :  { %v2113_v15 = vsub.f32 %v2071_v55, %v2106_v31  ;;  %v2114_v3 = vsub.f32 %v2072_v10, %v2106_v31  ;;  %v2115_v41 = vsub.f32 %v2073_v2, %v2110_v6  ;;  %v2116_v32 = vsub.f32 %v2074_v19, %v2110_v6 }
0x15b9   :  { %v7607_v10 = vadd.f32 %v7569_v43, %v7357_v44 }
0x15ba   :  { %v2117_v18 = vmul.f32 1.442695, %v2113_v15  ;;  %v2119_v49 = vmul.f32 1.442695, %v2114_v3  ;;  %v2121_v21 = vmul.f32 1.442695, %v2115_v41 }
0x15bb   :  { %v2123_v5 = vmul.f32 1.442695, %v2116_v32  ;;  %8629 = vst [vmem:[#allocation27_spill] sm:$0xff] %v7607_v10  ;;  %v1982_v15 = vsel %vm993_vm8, %v7607_v10, -inf }
0x15bc   :  { %6467 = vpow2.f32 %v2117_v18 }
0x15bd   :  { %6469 = vpow2.f32 %v2119_v49 }
0x15be   :  { %6471 = vpow2.f32 %v2121_v21 }
0x15bf   :  { %6473 = vpow2.f32 %v2123_v5 }
0x15c6   :  { %v6468_v26 = vpop.eup %6467 }
0x15c7   :  { %v6470_v22 = vpop.eup %6469  ;;  %2130 = vperm.xlu1 %6378, %v6468_v26  }
0x15c8   :  { %2133 = vperm.xlu0 %6377, %v6470_v22   ;;  %v6472_v46 = vpop.eup %6471 }
0x15c9   :  { %v6474_v23 = vpop.eup %6473 }
0x15cb   :  { %2136 = vperm.xlu1 %6378, %v6472_v46  }
0x15cf   :  { %2139 = vperm.xlu1 %6378, %v6474_v23  }
0x15e7   :  { %1983 = vmax.xlane.f32.xlu0 %v1982_v15 }
0x1646   :  { %v2131_v41 = vpop.permute.xlu1 %2130 }
0x1647   :  { %v2134_v18 = vpop.permute.xlu0 %2133  ;;  %v2144_v55 = vrot.slane %v2131_v41, %v7204_v34 }
0x1648   :  { %v2148_v32 = vrot.slane %v2134_v18, %v7200_v33 }
0x164a   :  { %v2137_v49 = vpop.permute.xlu1 %2136  ;;  %v2149_v29 = vsel %vm584_vm3, %v2148_v32, %v2144_v55 }
0x164b   :  { %v2153_v19 = vrot.slane %v2137_v49, %v7204_v34 }
0x164e   :  { %v2140_v2 = vpop.permute.xlu1 %2139 }
0x164f   :  { %v2157_v42 = vrot.slane %v2140_v2, %v7200_v33 }
0x1651   :  { %v2158_v43 = vsel %vm584_vm3, %v2157_v42, %v2153_v19 }
0x1652   :  { %v2159_v54 = vsel %vm595_vm4, %v2158_v43, %v2149_v29 }
0x1653   :  { %v2161_v31 = vsel %vm598_vm5, %v2159_v54, 0.0 }
0x1654   :  { %2162 = vadd.xlane.f32.xlu1 %v2161_v31 }
0x1674   :  { %v7619_v6 = vpop.xlane.xlu0 %1983 }
0x1675   :  { %8630 = vst [vmem:[#allocation28_spill] sm:$0xff] %v7619_v6  ;;  %vm1994_vm15 = vcmp.ge.f32.partialorder %v7607_v10, %v7619_v6 }
0x1676   :  { %v1995_v3 = vsel %vm1994_vm15, %v7196_v24, 16 }
0x1677   :  { %v1996_v21 = vsel %vm993_vm8, %v1995_v3, 2147483647 }
0x1678   :  { %v1998_v5 = vshra.s32 %v1996_v21, 16  ;;  %v1997_v54 = vand.u32 65535, %v1996_v21 }
0x167a   :  { %v2000_v15 = vcvt.s32.f32 %v1998_v5  ;;  %v1999_v31 = vcvt.s32.f32 %v1997_v54 }
0x167c   :  { %2001 = vmin.xlane.f32.xlu0 %v2000_v15 }
0x16e1   :  { %v2163_v41 = vpop.xlane.xlu1 %2162 }
0x16e2   :  { %v2168_v18 = vrot.slane %v2163_v41, %v7142_v57  ;;  %v2172_v49 = vrot.slane %v2163_v41, %v7221_v52 }
0x16e4   :  { %6475 = vrcp.f32 %v2168_v18 }
0x16e5   :  { %6477 = vrcp.f32 %v2172_v49 }
0x16ee   :  { %v6476_v32 = vpop.eup %6475 }
0x16ef   :  { %v2177_v55 = vmul.f32 %v6476_v32, %v6470_v22  ;;  %v2176_v2 = vmul.f32 %v6476_v32, %v6468_v26  ;;  %v6478_v19 = vpop.eup %6477 }
0x16f0   :  { %v2179_v42 = vmul.f32 %v6478_v19, %v6472_v46  ;;  %v2180_v29 = vmul.f32 %v6478_v19, %v6474_v23 }
0x16f1   :  { %2188 = vperm.xlu1 %6378, %v2177_v55   ;;  %2183 = vperm.xlu0 %6377, %v2176_v2  }
0x16f5   :  { %2193 = vperm.xlu1 %6378, %v2179_v42   ;;  %2198 = vperm.xlu0 %6377, %v2180_v29  }
0x16f9   :  { %2372 = vrot.lane.b32.xlu0 %v7567_v27, %s6875_s1 }
0x16fd   :  { %2382 = vrot.lane.b32.xlu0 %v7567_v27, %s6876_s30 }
0x1709   :  { %v2002_v43 = vpop.xlane.xlu0 %2001 }
0x170a   :  { %vm2003_vm6 = vcmp.eq.f32.partialorder %v2000_v15, %v2002_v43 }
0x170b   :  { %v2004_v3 = vsel %vm2003_vm6, %v1999_v31, inf }
0x1719   :  { %2005 = vmin.xlane.f32.xlu1 %v2004_v3 }
0x1770   :  { %v7631_v26 = vpop.permute.xlu1 %2188  ;;  %v7633_v22 = vpop.permute.xlu0 %2183 }
0x1771   :  { %8631 = vst [vmem:[#allocation29_spill] sm:$0xff] %v7631_v26  ;;  %8632 = vst [vmem:[#allocation30_spill] sm:$0xff] %v7633_v22  ;;  %v2202_v46 = vmul.f32 %v7504_v45, %v7631_v26  ;;  %v2201_v23 = vmul.f32 %v7511_v40, %v7633_v22 }
0x1773   :  { %v2206_v5 = vsel %vm548_vm2, %v2202_v46, 0.0  ;;  %v2205_v27 = vsel %vm209_vm1, %v2201_v23, 0.0 }
0x1774   :  { %v2207_v41 = vadd.f32 %v2206_v5, %v2205_v27  ;;  %v7641_v21 = vpop.permute.xlu1 %2193  ;;  %v7643_v15 = vpop.permute.xlu0 %2198 }
0x1775   :  { %8633 = vst [vmem:[#allocation31_spill] sm:$0xff] %v7641_v21  ;;  %8634 = vst [vmem:[#allocation32_spill] sm:$0xff] %v7643_v15  ;;  %v2203_v18 = vmul.f32 %v7524_v47, %v7641_v21  ;;  %v2204_v49 = vmul.f32 %v7531_v53, %v7643_v15 }
0x1776   :  { %v2208_v32 = vrot.slane %v2207_v41, 4 }
0x1777   :  { %v2214_v55 = vsel %vm209_vm1, %v2203_v18, 0.0  ;;  %v2215_v2 = vsel %vm548_vm2, %v2204_v49, 0.0 }
0x1778   :  { %v2209_v19 = vadd.f32 %v2208_v32, %v2207_v41  ;;  %v2216_v42 = vadd.f32 %v2215_v2, %v2214_v55  ;;  %v2008_v41 = vcvt.f32.s32 %v2002_v43 }
0x177a   :  { %v2210_v29 = vrot.slane %v2209_v19, 2  ;;  %v2217_v54 = vrot.slane %v2216_v42, 4  ;;  %v2009_v49 = vshll.u32 %v2008_v41, 16 }
0x177c   :  { %v2211_v31 = vadd.f32 %v2210_v29, %v2209_v19  ;;  %v2218_v3 = vadd.f32 %v2217_v54, %v2216_v42  ;;  %v7670_v42 = vld [vmem:[%s8582_s10] ss:$0 sm:$0xff]  ;;  %v2373_v54 = vpop.permute.xlu0 %2372 }
0x177e   :  { %v2219_v46 = vrot.slane %v2218_v3, 2  ;;  %v2212_v5 = vrot.slane %v2211_v31, 1 }
0x1780   :  { %v2220_v23 = vadd.f32 %v2219_v46, %v2218_v3  ;;  %v2213_v10 = vadd.f32 %v2212_v5, %v2211_v31 }
0x1782   :  { %v2221_v27 = vrot.slane %v2220_v23, 1 }
0x1784   :  { %v2222_v6 = vadd.f32 %v2221_v27, %v2220_v23  ;;  %v2383_v27 = vpop.permute.xlu0 %2382 }
0x1786   :  { %v2225_v22 = vsel %vm595_vm4, %v2222_v6, %v2213_v10 }
0x1787   :  { %6045 = vmatmul.mubr.msk.f32.vlgmr.msra.gmra.mrb[12].mxu0 %vm209_vm1, %v2225_v22 }
0x1788   :  { %6250 = vmatpush1.bf16.msra.mxu0 %v7053_v17  ;;  %2469 = vmatprep.mubr.f32.mxu0 %v8627_v51 }
0x1789   :  { %6252 = vmatprep.subr.bf16.mxu0 %v7075_v25 }
0x178c   :  { %6254 = vmatpush1.bf16.msra.mxu0 %v7088_v28 }
0x178d   :  { %6261 = vmatprep.subr.bf16.mxu0 %v8628_v30 }
0x17a6   :  { %v2006_v18 = vpop.xlane.xlu1 %2005 }
0x17a7   :  { %v2007_v32 = vcvt.f32.s32 %v2006_v18 }
0x17a9   :  { %v2010_v55 = vadd.s32 %v2009_v49, %v2007_v32 }
0x17ab   :  { %vm2011_vm9 = vcmp.eq.s32.totalorder %v7196_v24, %v2010_v55 }
0x17ac   :  { %v5837_v10 = vsel %vm2011_vm9, 1.0, %v8627_v51 }
0x17ad   :  { %6052 = vmatmul.mubr.msk.f32.vlgmr.msra.gmra.mrb[14].mxu1 %vm804_vm7, %v5837_v10 }
0x17ae   :  { %6257 = vmatpush3.bf16.msra.mxu1 %v7248_v56  ;;  %6062 = vmatprep.mubr.msk.f32.mxu1 %vm6870_vm0, %v8627_v51 }
0x17af   :  { %6258 = vmatprep.subr.bf16.mxu1 %v8628_v30 }
0x17b2   :  { %6260 = vmatpush3.bf16.msra.mxu1 %v7254_v0 }
0x17b3   :  { %6265 = vmatprep.subr.bf16.mxu1 %v7051_v16 }
0x185a   :  { %v2294_v6 = vpop.f32.mrb[12].mxu0 }
0x185b   :  { %v6046_v43 = vpop.f32.mrb[13].mxu0 }
0x1880   :  { %v2367_v22 = vpop.f32.mrb[14].mxu1 }
0x1881   :  { %v2368_v2 = vadd.f32 %v2367_v22, %v2294_v6  ;;  %v6053_v19 = vpop.f32.mrb[15].mxu1 }
0x1883   :  { %v2371_v29 = vadd.f32 %v7670_v42, %v2368_v2 }
0x1885   :  { %v2375_v31 = vadd.f32 %v2373_v54, %v2371_v29 }
0x1887   :  { %v5840_v3 = vmul.f32 -1.442695, %v2375_v31 }
0x1889   :  { %6479 = vpow2.f32 %v5840_v3 }
0x1893   :  { %v6480_v46 = vpop.eup %6479 }
0x1894   :  { %v2379_v23 = vadd.f32 1.0, %v6480_v46 }
0x1896   :  { %6481 = vrcp.f32 %v2379_v23 }
0x18a0   :  { %v6482_v5 = vpop.eup %6481 }
0x18a1   :  { %v2385_v41 = vmul.f32 %v6482_v5, %v2383_v27  ;;  %v2392_v55 = vsub.f32 1.0, %v6482_v5  ;;  %v2398_v6 = vmul.f32 %v6482_v5, %v7557_v14 }
0x18a3   :  { %2387 = vrot.lane.b32.xlu0 %v2385_v41, %s6877_s24 }
0x1915   :  { %v2388_v18 = vpop.permute.xlu0 %2387 }
0x1916   :  { %v2390_v49 = vadd.f32 %v2388_v18, %v2371_v29 }
0x1918   :  { %6483 = vtanh.f32 %v2390_v49 }
0x1922   :  { %v6484_v32 = vpop.eup %6483 }
0x1923   :  { %2394 = vrot.lane.b32.xlu0 %v6484_v32, %s6875_s1 }
0x1995   :  { %v2395_v10 = vpop.permute.xlu0 %2394 }
0x1996   :  { %v2397_v43 = vmul.f32 %v2395_v10, %v2392_v55 }
0x1998   :  { %v7676_v22 = vadd.f32 %v2398_v6, %v2397_v43 }
0x199a   :  { %2401 = vrot.lane.b32.xlu0 %v7676_v22, %s6875_s1 }
0x1a0c   :  { %v2402_v2 = vpop.permute.xlu0 %2401 }
0x1a0d   :  { %5841 = vmatmul.mubr.msk.f32.vlgmr.msra.gmra.mrb[14].mxu0 %vm209_vm1, %v2402_v2 }
0x1a0e   :  { %6263 = vmatpush3.bf16.msra.mxu0 %v7283_v48  ;;  %6069 = vmatprep.mubr.msk.f32.mxu0 %vm6870_vm0, %v8627_v51 }
0x1a0f   :  { %6272 = vmatprep.subr.bf16.mxu0 %v8628_v30 }
0x1ae0   :  { %v2471_v19 = vpop.f32.mrb[14].mxu0 }
0x1ae1   :  { %v7686_v29 = vadd.f32 %v2471_v19, %v7148_v61  ;;  %v7688_v14 = vpop.f32.mrb[15].mxu0 }
0x1ae3   :  { %v2515_v54 = vrot.slane %v7686_v29, %v7154_v4 }
0x1ae5   :  { %v2516_v31 = vcombine.high %v2515_v54, %v2515_v54  ;;  %v2523_v3 = vrot.slane %v2515_v54, %v7154_v4 }
0x1ae7   :  { %v2530_v46 = vrot.slane %v2516_v31, %v7154_v4  ;;  %v2534_v23 = vrot.slane %v2523_v3, %v7142_v57 }
0x1ae9   :  { %v2538_v5 = vrot.slane %v2530_v46, %v7142_v57  ;;  %v2541_v27 = vadd.f32 %v2534_v23, %v7172_v50  ;;  %v2542_v41 = vadd.f32 %v2534_v23, %v7165_v39 }
0x1aeb   :  { %v2543_v18 = vadd.f32 %v2538_v5, %v7181_v59  ;;  %6485 = vtanh.f32 %v2541_v27  ;;  %v2544_v49 = vadd.f32 %v2538_v5, %v7179_v58 }
0x1aec   :  { %6487 = vtanh.f32 %v2542_v41 }
0x1aed   :  { %6489 = vtanh.f32 %v2543_v18 }
0x1aee   :  { %6491 = vtanh.f32 %v2544_v49 }
0x1af5   :  { %v6486_v32 = vpop.eup %6485 }
0x1af6   :  { %v6488_v55 = vpop.eup %6487  ;;  %v2549_v10 = vmul.f32 %v7581_v62, %v6486_v32 }
0x1af7   :  { %v6490_v6 = vpop.eup %6489  ;;  %v2550_v43 = vmul.f32 %v7581_v62, %v6488_v55 }
0x1af8   :  { %v2553_v2 = vsel %vm209_vm1, %v2549_v10, 0.0  ;;  %v2551_v54 = vmul.f32 %v7581_v62, %v6490_v6  ;;  %v6492_v31 = vpop.eup %6491 }
0x1af9   :  { %v2556_v19 = vsel %vm548_vm2, %v2550_v43, 0.0  ;;  %2554 = vadd.xlane.f32.xlu0 %v2553_v2  ;;  %v2552_v46 = vmul.f32 %v7581_v62, %v6492_v31 }
0x1afa   :  { %2557 = vadd.xlane.f32.xlu1 %v2556_v19  ;;  %v2559_v3 = vsel %vm209_vm1, %v2551_v54, 0.0 }
0x1afb   :  { %v2562_v23 = vsel %vm548_vm2, %v2552_v46, 0.0 }
0x1afe   :  { %2560 = vadd.xlane.f32.xlu1 %v2559_v3 }
0x1b02   :  { %2563 = vadd.xlane.f32.xlu1 %v2562_v23 }
0x1b86   :  { %v2555_v27 = vpop.xlane.xlu0 %2554 }
0x1b87   :  { %v2558_v5 = vpop.xlane.xlu1 %2557  ;;  %v2565_v49 = vadd.f32 %v2555_v27, %v7206_v35 }
0x1b88   :  { %v2566_v18 = vadd.f32 %v2558_v5, %v7206_v35 }
0x1b89   :  { %v2576_v6 = vrot.slane %v2565_v49, %v7204_v34 }
0x1b8a   :  { %v2580_v10 = vrot.slane %v2566_v18, %v7200_v33 }
0x1b8b   :  { %v2561_v41 = vpop.xlane.xlu1 %2560 }
0x1b8c   :  { %v2567_v32 = vadd.f32 %v2561_v41, %v7206_v35  ;;  %v2581_v54 = vsel %vm584_vm3, %v2580_v10, %v2576_v6 }
0x1b8e   :  { %v2585_v2 = vrot.slane %v2567_v32, %v7204_v34 }
0x1b8f   :  { %v2564_v55 = vpop.xlane.xlu1 %2563 }
0x1b90   :  { %v2568_v43 = vadd.f32 %v2564_v55, %v7206_v35 }
0x1b92   :  { %v2589_v19 = vrot.slane %v2568_v43, %v7200_v33 }
0x1b94   :  { %v2590_v31 = vsel %vm584_vm3, %v2589_v19, %v2585_v2 }
0x1b95   :  { %v2591_v3 = vsel %vm595_vm4, %v2590_v31, %v2581_v54 }
0x1b96   :  { %v2593_v46 = vsel %vm598_vm5, %v2591_v3, -inf }
0x1b97   :  { %2594 = vmax.xlane.f32.xlu1 %v2593_v46 }
0x1c24   :  { %v2595_v23 = vpop.xlane.xlu1 %2594 }
0x1c25   :  { %v2600_v5 = vrot.slane %v2595_v23, %v7142_v57  ;;  %v2604_v27 = vrot.slane %v2595_v23, %v7221_v52 }
0x1c27   :  { %v2607_v41 = vsub.f32 %v2565_v49, %v2600_v5  ;;  %v2608_v55 = vsub.f32 %v2566_v18, %v2600_v5  ;;  %v2609_v26 = vsub.f32 %v2567_v32, %v2604_v27  ;;  %v2610_v60 = vsub.f32 %v2568_v43, %v2604_v27 }
0x1c28   :  { %v7724_v18 = vadd.f32 %v7688_v14, %v7357_v44 }
0x1c29   :  { %v2611_v15 = vmul.f32 1.442695, %v2607_v41  ;;  %v2613_v21 = vmul.f32 1.442695, %v2608_v55  ;;  %v2615_v10 = vmul.f32 1.442695, %v2609_v26 }
0x1c2a   :  { %v2617_v6 = vmul.f32 1.442695, %v2610_v60  ;;  %8635 = vst [vmem:[#allocation33_spill] sm:$0xff] %v7724_v18 }
0x1c2b   :  { %6493 = vpow2.f32 %v2611_v15  ;;  %v2476_v15 = vsel %vm993_vm8, %v7724_v18, -inf }
0x1c2c   :  { %6495 = vpow2.f32 %v2613_v21 }
0x1c2d   :  { %6497 = vpow2.f32 %v2615_v10 }
0x1c2e   :  { %6499 = vpow2.f32 %v2617_v6 }
0x1c35   :  { %v6494_v2 = vpop.eup %6493 }
0x1c36   :  { %v6496_v19 = vpop.eup %6495  ;;  %2624 = vperm.xlu1 %6378, %v6494_v2  }
0x1c37   :  { %2627 = vperm.xlu0 %6377, %v6496_v19   ;;  %v6498_v54 = vpop.eup %6497 }
0x1c38   :  { %v6500_v31 = vpop.eup %6499 }
0x1c3a   :  { %2630 = vperm.xlu1 %6378, %v6498_v54  }
0x1c3e   :  { %2633 = vperm.xlu1 %6378, %v6500_v31  }
0x1c56   :  { %2477 = vmax.xlane.f32.xlu0 %v2476_v15 }
0x1cb5   :  { %v2625_v26 = vpop.permute.xlu1 %2624 }
0x1cb6   :  { %v2628_v21 = vpop.permute.xlu0 %2627  ;;  %v2638_v32 = vrot.slane %v2625_v26, %v7204_v34 }
0x1cb7   :  { %v2642_v49 = vrot.slane %v2628_v21, %v7200_v33 }
0x1cb9   :  { %v2631_v60 = vpop.permute.xlu1 %2630  ;;  %v2643_v23 = vsel %vm584_vm3, %v2642_v49, %v2638_v32 }
0x1cba   :  { %v2647_v3 = vrot.slane %v2631_v60, %v7204_v34 }
0x1cbd   :  { %v2634_v43 = vpop.permute.xlu1 %2633 }
0x1cbe   :  { %v2651_v46 = vrot.slane %v2634_v43, %v7200_v33 }
0x1cc0   :  { %v2652_v14 = vsel %vm584_vm3, %v2651_v46, %v2647_v3 }
0x1cc1   :  { %v2653_v5 = vsel %vm595_vm4, %v2652_v14, %v2643_v23 }
0x1cc2   :  { %v2655_v27 = vsel %vm598_vm5, %v2653_v5, 0.0 }
0x1cc3   :  { %2656 = vadd.xlane.f32.xlu1 %v2655_v27 }
0x1ce3   :  { %v7736_v41 = vpop.xlane.xlu0 %2477 }
0x1ce4   :  { %8636 = vst [vmem:[#allocation34_spill] sm:$0xff] %v7736_v41  ;;  %vm2488_vm10 = vcmp.ge.f32.partialorder %v7724_v18, %v7736_v41 }
0x1ce5   :  { %v2489_v55 = vsel %vm2488_vm10, %v7196_v24, 16  ;;  %vm5667_vm10 = vcmask 622112  }
0x1ce6   :  { %v2490_v10 = vsel %vm993_vm8, %v2489_v55, 2147483647 }
0x1ce7   :  { %v2492_v6 = vshra.s32 %v2490_v10, 16  ;;  %v2491_v5 = vand.u32 65535, %v2490_v10 }
0x1ce9   :  { %v2494_v15 = vcvt.s32.f32 %v2492_v6  ;;  %v2493_v27 = vcvt.s32.f32 %v2491_v5 }
0x1ceb   :  { %2495 = vmin.xlane.f32.xlu0 %v2494_v15 }
0x1d50   :  { %v2657_v26 = vpop.xlane.xlu1 %2656 }
0x1d51   :  { %v2662_v21 = vrot.slane %v2657_v26, %v7142_v57  ;;  %v2666_v60 = vrot.slane %v2657_v26, %v7221_v52 }
0x1d53   :  { %6501 = vrcp.f32 %v2662_v21 }
0x1d54   :  { %6503 = vrcp.f32 %v2666_v60 }
0x1d5d   :  { %v6502_v49 = vpop.eup %6501 }
0x1d5e   :  { %v2671_v32 = vmul.f32 %v6502_v49, %v6496_v19  ;;  %v2670_v43 = vmul.f32 %v6502_v49, %v6494_v2  ;;  %v6504_v3 = vpop.eup %6503 }
0x1d5f   :  { %v2673_v46 = vmul.f32 %v6504_v3, %v6498_v54  ;;  %v2674_v23 = vmul.f32 %v6504_v3, %v6500_v31 }
0x1d60   :  { %2682 = vperm.xlu1 %6378, %v2671_v32   ;;  %2677 = vperm.xlu0 %6377, %v2670_v43  }
0x1d64   :  { %2687 = vperm.xlu1 %6378, %v2673_v46   ;;  %2692 = vperm.xlu0 %6377, %v2674_v23  }
0x1d68   :  { %2866 = vrot.lane.b32.xlu0 %v7686_v29, %s6875_s1 }
0x1d6c   :  { %2876 = vrot.lane.b32.xlu0 %v7686_v29, %s6876_s30 }
0x1d78   :  { %v2496_v14 = vpop.xlane.xlu0 %2495 }
0x1d79   :  { %vm2497_vm11 = vcmp.eq.f32.partialorder %v2494_v15, %v2496_v14 }
0x1d7a   :  { %v2498_v55 = vsel %vm2497_vm11, %v2493_v27, inf }
0x1d88   :  { %2499 = vmin.xlane.f32.xlu1 %v2498_v55 }
0x1ddf   :  { %v7748_v2 = vpop.permute.xlu1 %2682  ;;  %v7750_v19 = vpop.permute.xlu0 %2677 }
0x1de0   :  { %8637 = vst [vmem:[#allocation35_spill] sm:$0xff] %v7748_v2  ;;  %8638 = vst [vmem:[#allocation36_spill] sm:$0xff] %v7750_v19  ;;  %v2696_v54 = vmul.f32 %v7504_v45, %v7748_v2  ;;  %v2695_v31 = vmul.f32 %v7511_v40, %v7750_v19 }
0x1de2   :  { %v2700_v6 = vsel %vm548_vm2, %v2696_v54, 0.0  ;;  %v2699_v29 = vsel %vm209_vm1, %v2695_v31, 0.0 }
0x1de3   :  { %v2701_v26 = vadd.f32 %v2700_v6, %v2699_v29  ;;  %v7758_v10 = vpop.permute.xlu1 %2687  ;;  %v7760_v15 = vpop.permute.xlu0 %2692 }
0x1de4   :  { %8639 = vst [vmem:[#allocation37_spill] sm:$0xff] %v7760_v15  ;;  %v2697_v21 = vmul.f32 %v7524_v47, %v7758_v10  ;;  %v2698_v60 = vmul.f32 %v7531_v53, %v7760_v15  ;;  %v2502_v53 = vcvt.f32.s32 %v2496_v14 }
0x1de5   :  { %v2702_v49 = vrot.slane %v2701_v26, 4 }
0x1de6   :  { %v2708_v45 = vsel %vm209_vm1, %v2697_v21, 0.0  ;;  %v2709_v40 = vsel %vm548_vm2, %v2698_v60, 0.0  ;;  %v2503_v21 = vshll.u32 %v2502_v53, 16 }
0x1de7   :  { %v2703_v32 = vadd.f32 %v2702_v49, %v2701_v26  ;;  %v2710_v43 = vadd.f32 %v2709_v40, %v2708_v45 }
0x1de9   :  { %v2704_v3 = vrot.slane %v2703_v32, 2  ;;  %v2711_v46 = vrot.slane %v2710_v43, 4 }
0x1deb   :  { %v2705_v23 = vadd.f32 %v2704_v3, %v2703_v32  ;;  %v2712_v5 = vadd.f32 %v2711_v46, %v2710_v43 }
0x1ded   :  { %v2713_v27 = vrot.slane %v2712_v5, 2  ;;  %v2706_v54 = vrot.slane %v2705_v23, 1 }
0x1def   :  { %v2714_v55 = vadd.f32 %v2713_v27, %v2712_v5  ;;  %v2707_v6 = vadd.f32 %v2706_v54, %v2705_v23  ;;  %v2867_v23 = vpop.permute.xlu0 %2866 }
0x1df1   :  { %v2715_v31 = vrot.slane %v2714_v55, 1 }
0x1df3   :  { %v2716_v47 = vadd.f32 %v2715_v31, %v2714_v55 }
0x1df5   :  { %v2719_v29 = vsel %vm595_vm4, %v2716_v47, %v2707_v6  ;;  %v2877_v6 = vpop.permute.xlu0 %2876 }
0x1df6   :  { %6063 = vmatmul.mubr.msk.f32.vlgmr.msra.gmra.mrb[16].mxu1 %vm209_vm1, %v2719_v29 }
0x1df7   :  { %6267 = vmatpush1.bf16.msra.mxu1 %v7053_v17  ;;  %2963 = vmatprep.mubr.f32.mxu1 %v8627_v51 }
0x1df8   :  { %6269 = vmatprep.subr.bf16.mxu1 %v7075_v25 }
0x1dfb   :  { %6271 = vmatpush1.bf16.msra.mxu1 %v7088_v28 }
0x1dfc   :  { %6278 = vmatprep.subr.bf16.mxu1 %v8628_v30 }
0x1e15   :  { %v2500_v26 = vpop.xlane.xlu1 %2499 }
0x1e16   :  { %v2501_v60 = vcvt.f32.s32 %v2500_v26 }
0x1e18   :  { %v2504_v49 = vadd.s32 %v2503_v21, %v2501_v60 }
0x1e1a   :  { %vm2505_vm12 = vcmp.eq.s32.totalorder %v7196_v24, %v2504_v49 }
0x1e1b   :  { %v5842_v45 = vsel %vm2505_vm12, 1.0, %v8627_v51 }
0x1e1c   :  { %6070 = vmatmul.mubr.msk.f32.vlgmr.msra.gmra.mrb[16].mxu0 %vm804_vm7, %v5842_v45 }
0x1e1d   :  { %6274 = vmatpush3.bf16.msra.mxu0 %v7248_v56  ;;  %6080 = vmatprep.mubr.msk.f32.mxu0 %vm6870_vm0, %v8627_v51 }
0x1e1e   :  { %6275 = vmatprep.subr.bf16.mxu0 %v8628_v30 }
0x1e21   :  { %6277 = vmatpush3.bf16.msra.mxu0 %v7254_v0 }
0x1e22   :  { %6282 = vmatprep.subr.bf16.mxu0 %v7051_v16 }
0x1ec9   :  { %v2788_v14 = vpop.f32.mrb[16].mxu1 }
0x1eca   :  { %v6064_v40 = vpop.f32.mrb[17].mxu1 }
0x1eef   :  { %v2861_v32 = vpop.f32.mrb[16].mxu0 }
0x1ef0   :  { %v2862_v43 = vadd.f32 %v2861_v32, %v2788_v14  ;;  %v6071_v3 = vpop.f32.mrb[17].mxu0 }
0x1ef2   :  { %v2865_v46 = vadd.f32 %v7670_v42, %v2862_v43 }
0x1ef4   :  { %v2869_v5 = vadd.f32 %v2867_v23, %v2865_v46 }
0x1ef6   :  { %v5845_v27 = vmul.f32 -1.442695, %v2869_v5 }
0x1ef8   :  { %6505 = vpow2.f32 %v5845_v27 }
0x1f02   :  { %v6506_v55 = vpop.eup %6505 }
0x1f03   :  { %v2873_v54 = vadd.f32 1.0, %v6506_v55 }
0x1f05   :  { %6507 = vrcp.f32 %v2873_v54 }
0x1f0f   :  { %v6508_v31 = vpop.eup %6507 }
0x1f10   :  { %v2879_v47 = vmul.f32 %v6508_v31, %v2877_v6  ;;  %v2886_v21 = vsub.f32 1.0, %v6508_v31  ;;  %v2892_v49 = vmul.f32 %v6508_v31, %v7676_v22 }
0x1f12   :  { %2881 = vrot.lane.b32.xlu0 %v2879_v47, %s6877_s24 }
0x1f84   :  { %v2882_v29 = vpop.permute.xlu0 %2881 }
0x1f85   :  { %v2884_v53 = vadd.f32 %v2882_v29, %v2865_v46 }
0x1f87   :  { %6509 = vtanh.f32 %v2884_v53 }
0x1f91   :  { %v6510_v26 = vpop.eup %6509 }
0x1f92   :  { %2888 = vrot.lane.b32.xlu0 %v6510_v26, %s6875_s1 }
0x2004   :  { %v2889_v60 = vpop.permute.xlu0 %2888 }
0x2005   :  { %v2891_v45 = vmul.f32 %v2889_v60, %v2886_v21 }
0x2007   :  { %v7788_v14 = vadd.f32 %v2892_v49, %v2891_v45 }
0x2009   :  { %2895 = vrot.lane.b32.xlu0 %v7788_v14, %s6875_s1 }
0x207b   :  { %v2896_v40 = vpop.permute.xlu0 %2895 }
0x207c   :  { %5846 = vmatmul.mubr.msk.f32.vlgmr.msra.gmra.mrb[18].mxu1 %vm209_vm1, %v2896_v40 }
0x207d   :  { %6280 = vmatpush3.bf16.msra.mxu1 %v7283_v48  ;;  %6087 = vmatprep.mubr.msk.f32.mxu1 %vm6870_vm0, %v8627_v51 }
0x207e   :  { %6289 = vmatprep.subr.bf16.mxu1 %v8628_v30 }
0x214f   :  { %v2965_v32 = vpop.f32.mrb[18].mxu1 }
0x2150   :  { %v7798_v43 = vadd.f32 %v2965_v32, %v7148_v61  ;;  %v7800_v22 = vpop.f32.mrb[19].mxu1 }
0x2152   :  { %v3009_v3 = vrot.slane %v7798_v43, %v7154_v4 }
0x2154   :  { %v3010_v46 = vcombine.high %v3009_v3, %v3009_v3  ;;  %v3017_v23 = vrot.slane %v3009_v3, %v7154_v4 }
0x2156   :  { %v3024_v5 = vrot.slane %v3010_v46, %v7154_v4  ;;  %v3028_v27 = vrot.slane %v3017_v23, %v7142_v57 }
0x2158   :  { %v3032_v55 = vrot.slane %v3024_v5, %v7142_v57  ;;  %v3035_v54 = vadd.f32 %v3028_v27, %v7172_v50  ;;  %v3036_v31 = vadd.f32 %v3028_v27, %v7165_v39 }
0x215a   :  { %v3037_v6 = vadd.f32 %v3032_v55, %v7181_v59  ;;  %6511 = vtanh.f32 %v3035_v54  ;;  %v3038_v47 = vadd.f32 %v3032_v55, %v7179_v58 }
0x215b   :  { %6513 = vtanh.f32 %v3036_v31 }
0x215c   :  { %6515 = vtanh.f32 %v3037_v6 }
0x215d   :  { %6517 = vtanh.f32 %v3038_v47 }
0x2164   :  { %v6512_v29 = vpop.eup %6511 }
0x2165   :  { %v6514_v53 = vpop.eup %6513  ;;  %v3043_v26 = vmul.f32 %v7581_v62, %v6512_v29 }
0x2166   :  { %v6516_v21 = vpop.eup %6515  ;;  %v3044_v60 = vmul.f32 %v7581_v62, %v6514_v53 }
0x2167   :  { %v3047_v49 = vsel %vm209_vm1, %v3043_v26, 0.0  ;;  %v3045_v40 = vmul.f32 %v7581_v62, %v6516_v21  ;;  %v6518_v32 = vpop.eup %6517 }
0x2168   :  { %v3050_v45 = vsel %vm548_vm2, %v3044_v60, 0.0  ;;  %3048 = vadd.xlane.f32.xlu0 %v3047_v49  ;;  %v3046_v46 = vmul.f32 %v7581_v62, %v6518_v32 }
0x2169   :  { %3051 = vadd.xlane.f32.xlu1 %v3050_v45  ;;  %v3053_v3 = vsel %vm209_vm1, %v3045_v40, 0.0 }
0x216a   :  { %v3056_v23 = vsel %vm548_vm2, %v3046_v46, 0.0 }
0x216d   :  { %3054 = vadd.xlane.f32.xlu1 %v3053_v3 }
0x2171   :  { %3057 = vadd.xlane.f32.xlu1 %v3056_v23 }
0x21f5   :  { %v3049_v27 = vpop.xlane.xlu0 %3048 }
0x21f6   :  { %v3052_v5 = vpop.xlane.xlu1 %3051  ;;  %v3059_v31 = vadd.f32 %v3049_v27, %v7206_v35 }
0x21f7   :  { %v3060_v54 = vadd.f32 %v3052_v5, %v7206_v35 }
0x21f8   :  { %v3070_v53 = vrot.slane %v3059_v31, %v7204_v34 }
0x21f9   :  { %v3074_v29 = vrot.slane %v3060_v54, %v7200_v33 }
0x21fa   :  { %v3055_v55 = vpop.xlane.xlu1 %3054 }
0x21fb   :  { %v3061_v6 = vadd.f32 %v3055_v55, %v7206_v35  ;;  %v3075_v60 = vsel %vm584_vm3, %v3074_v29, %v3070_v53 }
0x21fd   :  { %v3079_v26 = vrot.slane %v3061_v6, %v7204_v34 }
0x21fe   :  { %v3058_v47 = vpop.xlane.xlu1 %3057 }
0x21ff   :  { %v3062_v62 = vadd.f32 %v3058_v47, %v7206_v35 }
0x2201   :  { %v3083_v21 = vrot.slane %v3062_v62, %v7200_v33 }
0x2203   :  { %v3084_v49 = vsel %vm584_vm3, %v3083_v21, %v3079_v26 }
0x2204   :  { %v3085_v45 = vsel %vm595_vm4, %v3084_v49, %v3075_v60 }
0x2205   :  { %v3087_v40 = vsel %vm598_vm5, %v3085_v45, -inf }
0x2206   :  { %3088 = vmax.xlane.f32.xlu1 %v3087_v40 }
0x2293   :  { %v3089_v32 = vpop.xlane.xlu1 %3088 }
0x2294   :  { %v3094_v3 = vrot.slane %v3089_v32, %v7142_v57  ;;  %v3098_v46 = vrot.slane %v3089_v32, %v7221_v52 }
0x2296   :  { %v3101_v23 = vsub.f32 %v3059_v31, %v3094_v3  ;;  %v3102_v5 = vsub.f32 %v3060_v54, %v3094_v3  ;;  %v3103_v27 = vsub.f32 %v3061_v6, %v3098_v46  ;;  %v3104_v18 = vsub.f32 %v3062_v62, %v3098_v46 }
0x2297   :  { %v7836_v54 = vadd.f32 %v7800_v22, %v7357_v44 }
0x2298   :  { %v3105_v55 = vmul.f32 1.442695, %v3101_v23  ;;  %v3107_v47 = vmul.f32 1.442695, %v3102_v5  ;;  %v3109_v29 = vmul.f32 1.442695, %v3103_v27 }
0x2299   :  { %v3111_v53 = vmul.f32 1.442695, %v3104_v18  ;;  %8640 = vst [vmem:[#allocation38_spill] sm:$0xff] %v7836_v54  ;;  %v2970_v31 = vsel %vm993_vm8, %v7836_v54, -inf }
0x229a   :  { %6519 = vpow2.f32 %v3105_v55 }
0x229b   :  { %6521 = vpow2.f32 %v3107_v47 }
0x229c   :  { %6523 = vpow2.f32 %v3109_v29 }
0x229d   :  { %6525 = vpow2.f32 %v3111_v53 }
0x22a4   :  { %v6520_v26 = vpop.eup %6519 }
0x22a5   :  { %v6522_v21 = vpop.eup %6521  ;;  %3118 = vperm.xlu1 %6378, %v6520_v26  }
0x22a6   :  { %3121 = vperm.xlu0 %6377, %v6522_v21   ;;  %v6524_v60 = vpop.eup %6523 }
0x22a7   :  { %v6526_v49 = vpop.eup %6525 }
0x22a9   :  { %3124 = vperm.xlu1 %6378, %v6524_v60  }
0x22ad   :  { %3127 = vperm.xlu1 %6378, %v6526_v49  }
0x22c5   :  { %2971 = vmax.xlane.f32.xlu0 %v2970_v31 }
0x2324   :  { %v3119_v6 = vpop.permute.xlu1 %3118 }
0x2325   :  { %v3122_v62 = vpop.permute.xlu0 %3121  ;;  %v3132_v40 = vrot.slane %v3119_v6, %v7204_v34 }
0x2326   :  { %v3136_v45 = vrot.slane %v3122_v62, %v7200_v33 }
0x2328   :  { %v3125_v18 = vpop.permute.xlu1 %3124  ;;  %v3137_v23 = vsel %vm584_vm3, %v3136_v45, %v3132_v40 }
0x2329   :  { %v3141_v3 = vrot.slane %v3125_v18, %v7204_v34 }
0x232c   :  { %v3128_v32 = vpop.permute.xlu1 %3127 }
0x232d   :  { %v3145_v46 = vrot.slane %v3128_v32, %v7200_v33 }
0x232f   :  { %v3146_v22 = vsel %vm584_vm3, %v3145_v46, %v3141_v3 }
0x2330   :  { %v3147_v5 = vsel %vm595_vm4, %v3146_v22, %v3137_v23 }
0x2331   :  { %v3149_v27 = vsel %vm598_vm5, %v3147_v5, 0.0 }
0x2332   :  { %3150 = vadd.xlane.f32.xlu1 %v3149_v27 }
0x2352   :  { %v7848_v55 = vpop.xlane.xlu0 %2971 }
0x2353   :  { %8641 = vst [vmem:[#allocation39_spill] sm:$0xff] %v7848_v55  ;;  %vm2982_vm13 = vcmp.ge.f32.partialorder %v7836_v54, %v7848_v55 }
0x2354   :  { %v2983_v47 = vsel %vm2982_vm13, %v7196_v24, 16 }
0x2355   :  { %v2984_v29 = vsel %vm993_vm8, %v2983_v47, 2147483647 }
0x2356   :  { %v2986_v53 = vshra.s32 %v2984_v29, 16  ;;  %v2985_v5 = vand.u32 65535, %v2984_v29 }
0x2358   :  { %v2988_v31 = vcvt.s32.f32 %v2986_v53  ;;  %v2987_v27 = vcvt.s32.f32 %v2985_v5 }
0x235a   :  { %2989 = vmin.xlane.f32.xlu0 %v2988_v31 }
0x23bf   :  { %v3151_v6 = vpop.xlane.xlu1 %3150 }
0x23c0   :  { %v3156_v62 = vrot.slane %v3151_v6, %v7142_v57  ;;  %v3160_v18 = vrot.slane %v3151_v6, %v7221_v52 }
0x23c2   :  { %6527 = vrcp.f32 %v3156_v62 }
0x23c3   :  { %6529 = vrcp.f32 %v3160_v18 }
0x23cc   :  { %v6528_v45 = vpop.eup %6527 }
0x23cd   :  { %v3165_v40 = vmul.f32 %v6528_v45, %v6522_v21  ;;  %v3164_v32 = vmul.f32 %v6528_v45, %v6520_v26  ;;  %v6530_v3 = vpop.eup %6529  ;;  %v7887_v45 = vld [vmem:[%s8572_s0 + $0x10] sm:$0xff] }
0x23ce   :  { %v3167_v46 = vmul.f32 %v6530_v3, %v6524_v60  ;;  %v3168_v23 = vmul.f32 %v6530_v3, %v6526_v49  ;;  %v7867_v60 = vld [vmem:[%s8572_s0 + $0x8] sm:$0x3] }
0x23cf   :  { %3176 = vperm.xlu1 %6378, %v3165_v40   ;;  %3171 = vperm.xlu0 %6377, %v3164_v32   ;;  %v7894_v32 = vld [vmem:[%s8572_s0 + $0x18] sm:$0x3] }
0x23d0   :  { %8646 = vst [vmem:[#allocation44_spill] sm:$0xff] %v7894_v32 }
0x23d3   :  { %3181 = vperm.xlu1 %6378, %v3167_v46   ;;  %3186 = vperm.xlu0 %6377, %v3168_v23  }
0x23d7   :  { %3360 = vrot.lane.b32.xlu0 %v7798_v43, %s6875_s1 }
0x23db   :  { %3370 = vrot.lane.b32.xlu0 %v7798_v43, %s6876_s30  ;;  %v7874_v43 = vld [vmem:[%s8572_s0] sm:$0xff] }
0x23e7   :  { %v2990_v22 = vpop.xlane.xlu0 %2989 }
0x23e8   :  { %vm2991_vm14 = vcmp.eq.f32.partialorder %v2988_v31, %v2990_v22 }
0x23e9   :  { %v2992_v47 = vsel %vm2991_vm14, %v2987_v27, inf  ;;  %vm5552_vm14 = vcmask 212112  }
0x23f7   :  { %2993 = vmin.xlane.f32.xlu1 %v2992_v47 }
0x244e   :  { %v7860_v26 = vpop.permute.xlu1 %3176  ;;  %v7862_v21 = vpop.permute.xlu0 %3171 }
0x244f   :  { %8642 = vst [vmem:[#allocation40_spill] sm:$0xff] %v7860_v26  ;;  %8643 = vst [vmem:[#allocation41_spill] sm:$0xff] %v7862_v21  ;;  %v3190_v49 = vmul.f32 %v7867_v60, %v7860_v26  ;;  %v3189_v29 = vmul.f32 %v7874_v43, %v7862_v21 }
0x2451   :  { %v3194_v53 = vsel %vm548_vm2, %v3190_v49, 0.0  ;;  %v3193_v31 = vsel %vm209_vm1, %v3189_v29, 0.0 }
0x2452   :  { %v3195_v6 = vadd.f32 %v3194_v53, %v3193_v31  ;;  %v7880_v62 = vpop.permute.xlu1 %3181  ;;  %v7882_v18 = vpop.permute.xlu0 %3186 }
0x2453   :  { %8644 = vst [vmem:[#allocation42_spill] sm:$0xff] %v7880_v62  ;;  %8645 = vst [vmem:[#allocation43_spill] sm:$0xff] %v7882_v18  ;;  %v3191_v40 = vmul.f32 %v7887_v45, %v7880_v62  ;;  %v3192_v3 = vmul.f32 %v7894_v32, %v7882_v18 }
0x2454   :  { %v3196_v46 = vrot.slane %v3195_v6, 4 }
0x2455   :  { %v3202_v23 = vsel %vm209_vm1, %v3191_v40, 0.0  ;;  %v3203_v5 = vsel %vm548_vm2, %v3192_v3, 0.0 }
0x2456   :  { %v3197_v27 = vadd.f32 %v3196_v46, %v3195_v6  ;;  %v3204_v47 = vadd.f32 %v3203_v5, %v3202_v23  ;;  %v2996_v6 = vcvt.f32.s32 %v2990_v22  ;;  %v3361_v23 = vpop.permute.xlu0 %3360 }
0x2458   :  { %v3198_v49 = vrot.slane %v3197_v27, 2  ;;  %v3205_v29 = vrot.slane %v3204_v47, 4  ;;  %v2997_v40 = vshll.u32 %v2996_v6, 16 }
0x245a   :  { %v3199_v53 = vadd.f32 %v3198_v49, %v3197_v27  ;;  %v3206_v31 = vadd.f32 %v3205_v29, %v3204_v47 }
0x245c   :  { %v3207_v54 = vrot.slane %v3206_v31, 2  ;;  %v3200_v41 = vrot.slane %v3199_v53, 1 }
0x245e   :  { %v3208_v55 = vadd.f32 %v3207_v54, %v3206_v31  ;;  %v3201_v26 = vadd.f32 %v3200_v41, %v3199_v53  ;;  %v3371_v53 = vpop.permute.xlu0 %3370 }
0x2460   :  { %v3209_v21 = vrot.slane %v3208_v55, 1 }
0x2462   :  { %v3210_v62 = vadd.f32 %v3209_v21, %v3208_v55 }
0x2464   :  { %v3213_v19 = vsel %vm595_vm4, %v3210_v62, %v3201_v26 }
0x2465   :  { %6081 = vmatmul.mubr.msk.f32.vlgmr.msra.gmra.mrb[18].mxu0 %vm209_vm1, %v3213_v19 }
0x2466   :  { %6284 = vmatpush1.bf16.msra.mxu0 %v7053_v17  ;;  %3457 = vmatprep.mubr.f32.mxu0 %v8627_v51 }
0x2467   :  { %6286 = vmatprep.subr.bf16.mxu0 %v7075_v25 }
0x246a   :  { %6288 = vmatpush1.bf16.msra.mxu0 %v7088_v28 }
0x246b   :  { %6295 = vmatprep.subr.bf16.mxu0 %v8628_v30 }
0x2484   :  { %v2994_v54 = vpop.xlane.xlu1 %2993 }
0x2485   :  { %v2995_v3 = vcvt.f32.s32 %v2994_v54 }
0x2487   :  { %v2998_v41 = vadd.s32 %v2997_v40, %v2995_v3 }
0x2489   :  { %vm2999_vm15 = vcmp.eq.s32.totalorder %v7196_v24, %v2998_v41 }
0x248a   :  { %v5847_v55 = vsel %vm2999_vm15, 1.0, %v8627_v51  ;;  %vm5749_vm15 = vcmask 80896  }
0x248b   :  { %6088 = vmatmul.mubr.msk.f32.vlgmr.msra.gmra.mrb[20].mxu1 %vm804_vm7, %v5847_v55 }
0x248c   :  { %6291 = vmatpush3.bf16.msra.mxu1 %v7248_v56  ;;  %6098 = vmatprep.mubr.msk.f32.mxu1 %vm6870_vm0, %v8627_v51 }
0x248d   :  { %6292 = vmatprep.subr.bf16.mxu1 %v8628_v30 }
0x2490   :  { %6294 = vmatpush3.bf16.msra.mxu1 %v7254_v0 }
0x2491   :  { %6299 = vmatprep.subr.bf16.mxu1 %v7051_v16 }
0x2538   :  { %v3282_v19 = vpop.f32.mrb[18].mxu0 }
0x2539   :  { %v6082_v22 = vpop.f32.mrb[19].mxu0 }
0x255e   :  { %v3355_v26 = vpop.f32.mrb[20].mxu1 }
0x255f   :  { %v3356_v21 = vadd.f32 %v3355_v26, %v3282_v19  ;;  %v6089_v62 = vpop.f32.mrb[21].mxu1 }
0x2561   :  { %v3359_v46 = vadd.f32 %v7670_v42, %v3356_v21 }
0x2563   :  { %v3363_v5 = vadd.f32 %v3361_v23, %v3359_v46 }
0x2565   :  { %v5850_v27 = vmul.f32 -1.442695, %v3363_v5 }
0x2567   :  { %6531 = vpow2.f32 %v5850_v27 }
0x2571   :  { %v6532_v47 = vpop.eup %6531 }
0x2572   :  { %v3367_v49 = vadd.f32 1.0, %v6532_v47 }
0x2574   :  { %6533 = vrcp.f32 %v3367_v49 }
0x257e   :  { %v6534_v29 = vpop.eup %6533 }
0x257f   :  { %v3373_v31 = vmul.f32 %v6534_v29, %v3371_v53  ;;  %v3380_v3 = vsub.f32 1.0, %v6534_v29  ;;  %v3386_v41 = vmul.f32 %v6534_v29, %v7788_v14 }
0x2581   :  { %3375 = vrot.lane.b32.xlu0 %v3373_v31, %s6877_s24 }
0x25f3   :  { %v3376_v6 = vpop.permute.xlu0 %3375 }
0x25f4   :  { %v3378_v54 = vadd.f32 %v3376_v6, %v3359_v46 }
0x25f6   :  { %6535 = vtanh.f32 %v3378_v54 }
0x2600   :  { %v6536_v40 = vpop.eup %6535 }
0x2601   :  { %3382 = vrot.lane.b32.xlu0 %v6536_v40, %s6875_s1  ;;  %v7944_v40 = vld [vmem:[#allocation8] ss:$0 sm:$0xff] }
0x2673   :  { %v3383_v42 = vpop.permute.xlu0 %3382 }
0x2674   :  { %v3385_v55 = vmul.f32 %v3383_v42, %v3380_v3 }
0x2676   :  { %v7920_v19 = vadd.f32 %v3386_v41, %v3385_v55 }
0x2678   :  { %3389 = vrot.lane.b32.xlu0 %v7920_v19, %s6875_s1 }
0x26ea   :  { %v3390_v22 = vpop.permute.xlu0 %3389 }
0x26eb   :  { %5851 = vmatmul.mubr.msk.f32.vlgmr.msra.gmra.mrb[20].mxu0 %vm209_vm1, %v3390_v22 }
0x26ec   :  { %6297 = vmatpush3.bf16.msra.mxu0 %v7283_v48  ;;  %6105 = vmatprep.mubr.msk.f32.mxu0 %vm6870_vm0, %v8627_v51 }
0x26ed   :  { %6306 = vmatprep.subr.bf16.mxu0 %v8628_v30 }
0x27be   :  { %v3459_v26 = vpop.f32.mrb[20].mxu0 }
0x27bf   :  { %v7930_v21 = vadd.f32 %v3459_v26, %v7148_v61  ;;  %v7932_v14 = vpop.f32.mrb[21].mxu0 }
0x27c1   :  { %v3503_v62 = vrot.slane %v7930_v21, %v7154_v4 }
0x27c3   :  { %v3504_v46 = vcombine.high %v3503_v62, %v3503_v62  ;;  %v3511_v23 = vrot.slane %v3503_v62, %v7154_v4 }
0x27c5   :  { %v3518_v5 = vrot.slane %v3504_v46, %v7154_v4  ;;  %v3522_v27 = vrot.slane %v3511_v23, %v7142_v57 }
0x27c7   :  { %v3526_v47 = vrot.slane %v3518_v5, %v7142_v57  ;;  %v3529_v49 = vadd.f32 %v3522_v27, %v7172_v50  ;;  %v3530_v29 = vadd.f32 %v3522_v27, %v7165_v39 }
0x27c9   :  { %v3531_v53 = vadd.f32 %v3526_v47, %v7181_v59  ;;  %6537 = vtanh.f32 %v3529_v49  ;;  %v3532_v31 = vadd.f32 %v3526_v47, %v7179_v58 }
0x27ca   :  { %6539 = vtanh.f32 %v3530_v29 }
0x27cb   :  { %6541 = vtanh.f32 %v3531_v53 }
0x27cc   :  { %6543 = vtanh.f32 %v3532_v31 }
0x27d3   :  { %v6538_v6 = vpop.eup %6537 }
0x27d4   :  { %v6540_v54 = vpop.eup %6539  ;;  %v3537_v3 = vmul.f32 %v7944_v40, %v6538_v6 }
0x27d5   :  { %v6542_v42 = vpop.eup %6541  ;;  %v3538_v41 = vmul.f32 %v7944_v40, %v6540_v54 }
0x27d6   :  { %v3541_v55 = vsel %vm209_vm1, %v3537_v3, 0.0  ;;  %v3539_v26 = vmul.f32 %v7944_v40, %v6542_v42  ;;  %v6544_v62 = vpop.eup %6543 }
0x27d7   :  { %v3544_v22 = vsel %vm548_vm2, %v3538_v41, 0.0  ;;  %3542 = vadd.xlane.f32.xlu0 %v3541_v55  ;;  %v3540_v23 = vmul.f32 %v7944_v40, %v6544_v62 }
0x27d8   :  { %3545 = vadd.xlane.f32.xlu1 %v3544_v22  ;;  %v3547_v46 = vsel %vm209_vm1, %v3539_v26, 0.0 }
0x27d9   :  { %v3550_v5 = vsel %vm548_vm2, %v3540_v23, 0.0 }
0x27dc   :  { %3548 = vadd.xlane.f32.xlu1 %v3547_v46 }
0x27e0   :  { %3551 = vadd.xlane.f32.xlu1 %v3550_v5 }
0x2864   :  { %v3543_v47 = vpop.xlane.xlu0 %3542 }
0x2865   :  { %v3546_v27 = vpop.xlane.xlu1 %3545  ;;  %v3553_v53 = vadd.f32 %v3543_v47, %v7206_v35 }
0x2866   :  { %v3554_v29 = vadd.f32 %v3546_v27, %v7206_v35 }
0x2867   :  { %v3564_v3 = vrot.slane %v3553_v53, %v7204_v34 }
0x2868   :  { %v3568_v54 = vrot.slane %v3554_v29, %v7200_v33 }
0x2869   :  { %v3549_v49 = vpop.xlane.xlu1 %3548 }
0x286a   :  { %v3555_v31 = vadd.f32 %v3549_v49, %v7206_v35  ;;  %v3569_v22 = vsel %vm584_vm3, %v3568_v54, %v3564_v3 }
0x286c   :  { %v3573_v41 = vrot.slane %v3555_v31, %v7204_v34 }
0x286d   :  { %v3552_v6 = vpop.xlane.xlu1 %3551 }
0x286e   :  { %v3556_v42 = vadd.f32 %v3552_v6, %v7206_v35 }
0x2870   :  { %v3577_v55 = vrot.slane %v3556_v42, %v7200_v33 }
0x2872   :  { %v3578_v26 = vsel %vm584_vm3, %v3577_v55, %v3573_v41 }
0x2873   :  { %v3579_v62 = vsel %vm595_vm4, %v3578_v26, %v3569_v22 }
0x2874   :  { %v3581_v46 = vsel %vm598_vm5, %v3579_v62, -inf }
0x2875   :  { %3582 = vmax.xlane.f32.xlu1 %v3581_v46 }
0x2902   :  { %v3583_v23 = vpop.xlane.xlu1 %3582 }
0x2903   :  { %v3588_v5 = vrot.slane %v3583_v23, %v7142_v57  ;;  %v3592_v27 = vrot.slane %v3583_v23, %v7221_v52 }
0x2905   :  { %v3595_v47 = vsub.f32 %v3553_v53, %v3588_v5  ;;  %v3596_v49 = vsub.f32 %v3554_v29, %v3588_v5  ;;  %v3597_v6 = vsub.f32 %v3555_v31, %v3592_v27  ;;  %v3598_v15 = vsub.f32 %v3556_v42, %v3592_v27 }
0x2906   :  { %v7970_v29 = vadd.f32 %v7932_v14, %v7357_v44 }
0x2907   :  { %v3599_v18 = vmul.f32 1.442695, %v3595_v47  ;;  %v3601_v2 = vmul.f32 1.442695, %v3596_v49  ;;  %v3603_v54 = vmul.f32 1.442695, %v3597_v6 }
0x2908   :  { %v3605_v3 = vmul.f32 1.442695, %v3598_v15  ;;  %8647 = vst [vmem:[#allocation45_spill] sm:$0xff] %v7970_v29 }
0x2909   :  { %6545 = vpow2.f32 %v3599_v18  ;;  %v3464_v18 = vsel %vm993_vm8, %v7970_v29, -inf }
0x290a   :  { %6547 = vpow2.f32 %v3601_v2 }
0x290b   :  { %6549 = vpow2.f32 %v3603_v54 }
0x290c   :  { %6551 = vpow2.f32 %v3605_v3 }
0x2913   :  { %v6546_v41 = vpop.eup %6545 }
0x2914   :  { %v6548_v55 = vpop.eup %6547  ;;  %3612 = vperm.xlu1 %6378, %v6546_v41  }
0x2915   :  { %3615 = vperm.xlu0 %6377, %v6548_v55   ;;  %v6550_v22 = vpop.eup %6549 }
0x2916   :  { %v6552_v26 = vpop.eup %6551 }
0x2918   :  { %3618 = vperm.xlu1 %6378, %v6550_v22  }
0x291c   :  { %3621 = vperm.xlu1 %6378, %v6552_v26  }
0x2934   :  { %3465 = vmax.xlane.f32.xlu0 %v3464_v18 }
0x2993   :  { %v3613_v2 = vpop.permute.xlu1 %3612 }
0x2994   :  { %v3616_v53 = vpop.permute.xlu0 %3615  ;;  %v3626_v42 = vrot.slane %v3613_v2, %v7204_v34 }
0x2995   :  { %v3630_v31 = vrot.slane %v3616_v53, %v7200_v33 }
0x2997   :  { %v3619_v15 = vpop.permute.xlu1 %3618  ;;  %v3631_v5 = vsel %vm584_vm3, %v3630_v31, %v3626_v42 }
0x2998   :  { %v3635_v46 = vrot.slane %v3619_v15, %v7204_v34 }
0x299b   :  { %v3622_v62 = vpop.permute.xlu1 %3621 }
0x299c   :  { %v3639_v23 = vrot.slane %v3622_v62, %v7200_v33 }
0x299e   :  { %v3640_v14 = vsel %vm584_vm3, %v3639_v23, %v3635_v46 }
0x299f   :  { %v3641_v27 = vsel %vm595_vm4, %v3640_v14, %v3631_v5 }
0x29a0   :  { %v3643_v47 = vsel %vm598_vm5, %v3641_v27, 0.0 }
0x29a1   :  { %3644 = vadd.xlane.f32.xlu1 %v3643_v47 }
0x29c1   :  { %v7982_v49 = vpop.xlane.xlu0 %3465 }
0x29c2   :  { %8648 = vst [vmem:[#allocation46_spill] sm:$0xff] %v7982_v49  ;;  %vm3476_vm6 = vcmp.ge.f32.partialorder %v7970_v29, %v7982_v49 }
0x29c3   :  { %v3477_v6 = vsel %vm3476_vm6, %v7196_v24, 16  ;;  %vm5575_vm6 = vcmask 294112  }
0x29c4   :  { %v3478_v54 = vsel %vm993_vm8, %v3477_v6, 2147483647 }
0x29c5   :  { %v3480_v3 = vshra.s32 %v3478_v54, 16  ;;  %v3479_v27 = vand.u32 65535, %v3478_v54 }
0x29c7   :  { %v3482_v18 = vcvt.s32.f32 %v3480_v3  ;;  %v3481_v47 = vcvt.s32.f32 %v3479_v27 }
0x29c9   :  { %3483 = vmin.xlane.f32.xlu0 %v3482_v18 }
0x2a2e   :  { %v3645_v2 = vpop.xlane.xlu1 %3644 }
0x2a2f   :  { %v3650_v53 = vrot.slane %v3645_v2, %v7142_v57  ;;  %v3654_v15 = vrot.slane %v3645_v2, %v7221_v52 }
0x2a31   :  { %6553 = vrcp.f32 %v3650_v53 }
0x2a32   :  { %6555 = vrcp.f32 %v3654_v15 }
0x2a3b   :  { %v6554_v31 = vpop.eup %6553 }
0x2a3c   :  { %v3659_v42 = vmul.f32 %v6554_v31, %v6548_v55  ;;  %v3658_v62 = vmul.f32 %v6554_v31, %v6546_v41  ;;  %v6556_v46 = vpop.eup %6555  ;;  %v5662_v41 = vadd.s32 4294967228, %v7196_v24  ;;  %v5657_v55 = vadd.s32 4294967236, %v7196_v24 }
0x2a3d   :  { %v3661_v23 = vmul.f32 %v6556_v46, %v6550_v22  ;;  %v3662_v5 = vmul.f32 %v6556_v46, %v6552_v26 }
0x2a3e   :  { %3670 = vperm.xlu1 %6378, %v3659_v42   ;;  %3665 = vperm.xlu0 %6377, %v3658_v62   ;;  %v5665_v22 = vsub.s32 %v5662_v41, %v7028_v7  ;;  %v5660_v26 = vsub.s32 %v5657_v55, %v7028_v7 }
0x2a42   :  { %3675 = vperm.xlu1 %6378, %v3661_v23   ;;  %3680 = vperm.xlu0 %6377, %v3662_v5  }
0x2a46   :  { %3854 = vrot.lane.b32.xlu0 %v7930_v21, %s6875_s1 }
0x2a4a   :  { %3864 = vrot.lane.b32.xlu0 %v7930_v21, %s6876_s30 }
0x2a56   :  { %v3484_v14 = vpop.xlane.xlu0 %3483 }
0x2a57   :  { %vm3485_vm9 = vcmp.eq.f32.partialorder %v3482_v18, %v3484_v14 }
0x2a58   :  { %v3486_v6 = vsel %vm3485_vm9, %v3481_v47, inf  ;;  %vm5751_vm9 = vcmask 162816  }
0x2a66   :  { %3487 = vmin.xlane.f32.xlu1 %v3486_v6 }
0x2abd   :  { %v3671_v3 = vpop.permute.xlu1 %3670  ;;  %v3666_v2 = vpop.permute.xlu0 %3665 }
0x2abe   :  { %v3684_v53 = vmul.f32 %v7867_v60, %v3671_v3  ;;  %v5666_v21 = vrot.slane %v3671_v3, %v5665_v22  ;;  %v3683_v54 = vmul.f32 %v7874_v43, %v3666_v2  ;;  %v5661_v18 = vrot.slane %v3666_v2, %v5660_v26 }
0x2ac0   :  { %v3688_v15 = vsel %vm548_vm2, %v3684_v53, 0.0  ;;  %v3687_v31 = vsel %vm209_vm1, %v3683_v54, 0.0  ;;  %v5668_v42 = vsel %vm5667_vm10, %v5666_v21, %v5661_v18 }
0x2ac1   :  { %v3689_v62 = vadd.f32 %v3688_v15, %v3687_v31  ;;  %v3676_v46 = vpop.permute.xlu1 %3675  ;;  %v3681_v23 = vpop.permute.xlu0 %3680 }
0x2ac2   :  { %v3685_v5 = vmul.f32 %v7887_v45, %v3676_v46  ;;  %v5672_v27 = vrot.slane %v3676_v46, %v5660_v26  ;;  %v3686_v47 = vmul.f32 %v7894_v32, %v3681_v23  ;;  %v5676_v6 = vrot.slane %v3681_v23, %v5665_v22 }
0x2ac3   :  { %v3690_v41 = vrot.slane %v3689_v62, 4 }
0x2ac4   :  { %v3696_v55 = vsel %vm209_vm1, %v3685_v5, 0.0  ;;  %v3697_v3 = vsel %vm548_vm2, %v3686_v47, 0.0  ;;  %v5677_v2 = vsel %vm5667_vm10, %v5676_v6, %v5672_v27  ;;  %vm5598_vm10 = vcmask 376112  }
0x2ac5   :  { %v3691_v53 = vadd.f32 %v3690_v41, %v3689_v62  ;;  %v3698_v54 = vadd.f32 %v3697_v3, %v3696_v55  ;;  %v8009_v21 = vsel %vm595_vm4, %v5677_v2, %v5668_v42  ;;  %v3490_v42 = vcvt.f32.s32 %v3484_v14  ;;  %v8030_v3 = vld [vmem:[%s8582_s10] ss:$0 sm:$0xff] }
0x2ac7   :  { %v3692_v18 = vrot.slane %v3691_v53, 2  ;;  %v3699_v15 = vrot.slane %v3698_v54, 4 }
0x2ac9   :  { %v3693_v31 = vadd.f32 %v3692_v18, %v3691_v53  ;;  %v3700_v29 = vadd.f32 %v3699_v15, %v3698_v54  ;;  %v3855_v53 = vpop.permute.xlu0 %3854 }
0x2acb   :  { %v3701_v26 = vrot.slane %v3700_v29, 2  ;;  %v3694_v46 = vrot.slane %v3693_v31, 1 }
0x2acd   :  { %v3702_v49 = vadd.f32 %v3701_v26, %v3700_v29  ;;  %v3695_v23 = vadd.f32 %v3694_v46, %v3693_v31  ;;  %v3491_v29 = vshll.u32 %v3490_v42, 16  ;;  %v3865_v46 = vpop.permute.xlu0 %3864 }
0x2acf   :  { %v3703_v22 = vrot.slane %v3702_v49, 1 }
0x2ad1   :  { %v3704_v32 = vadd.f32 %v3703_v22, %v3702_v49 }
0x2ad3   :  { %v3707_v5 = vsel %vm595_vm4, %v3704_v32, %v3695_v23 }
0x2ad4   :  { %6099 = vmatmul.mubr.msk.f32.vlgmr.msra.gmra.mrb[22].mxu1 %vm209_vm1, %v3707_v5 }
0x2ad5   :  { %6301 = vmatpush1.bf16.msra.mxu1 %v7053_v17  ;;  %3951 = vmatprep.mubr.f32.mxu1 %v8627_v51 }
0x2ad6   :  { %6303 = vmatprep.subr.bf16.mxu1 %v7075_v25 }
0x2ad9   :  { %6305 = vmatpush1.bf16.msra.mxu1 %v7088_v28 }
0x2ada   :  { %6312 = vmatprep.subr.bf16.mxu1 %v8628_v30 }
0x2af3   :  { %v3488_v62 = vpop.xlane.xlu1 %3487 }
0x2af4   :  { %v3489_v27 = vcvt.f32.s32 %v3488_v62 }
0x2af6   :  { %v3492_v47 = vadd.s32 %v3491_v29, %v3489_v27 }
0x2af8   :  { %vm3493_vm11 = vcmp.eq.s32.totalorder %v7196_v24, %v3492_v47 }
0x2af9   :  { %v5852_v32 = vsel %vm3493_vm11, 1.0, %v8627_v51  ;;  %vm5621_vm11 = vcmask 458112  }
0x2afa   :  { %6106 = vmatmul.mubr.msk.f32.vlgmr.msra.gmra.mrb[22].mxu0 %vm804_vm7, %v5852_v32 }
0x2afb   :  { %6308 = vmatpush3.bf16.msra.mxu0 %v7248_v56  ;;  %6116 = vmatprep.mubr.msk.f32.mxu0 %vm6870_vm0, %v8627_v51 }
0x2afc   :  { %6309 = vmatprep.subr.bf16.mxu0 %v8628_v30 }
0x2aff   :  { %6311 = vmatpush3.bf16.msra.mxu0 %v7254_v0 }
0x2b00   :  { %6316 = vmatprep.subr.bf16.mxu0 %v7051_v16 }
0x2ba7   :  { %v3776_v49 = vpop.f32.mrb[22].mxu1 }
0x2ba8   :  { %v6100_v14 = vpop.f32.mrb[23].mxu1 }
0x2bcd   :  { %v3849_v6 = vpop.f32.mrb[22].mxu0 }
0x2bce   :  { %v3850_v41 = vadd.f32 %v3849_v6, %v3776_v49  ;;  %v6107_v55 = vpop.f32.mrb[23].mxu0 }
0x2bd0   :  { %v3853_v2 = vadd.f32 %v8030_v3, %v3850_v41 }
0x2bd2   :  { %v3857_v54 = vadd.f32 %v3855_v53, %v3853_v2 }
0x2bd4   :  { %v5855_v18 = vmul.f32 -1.442695, %v3857_v54 }
0x2bd6   :  { %6557 = vpow2.f32 %v5855_v18 }
0x2be0   :  { %v6558_v15 = vpop.eup %6557 }
0x2be1   :  { %v3861_v31 = vadd.f32 1.0, %v6558_v15 }
0x2be3   :  { %6559 = vrcp.f32 %v3861_v31 }
0x2bed   :  { %v6560_v26 = vpop.eup %6559 }
0x2bee   :  { %v3867_v22 = vmul.f32 %v6560_v26, %v3865_v46  ;;  %v3874_v62 = vsub.f32 1.0, %v6560_v26  ;;  %v3880_v27 = vmul.f32 %v6560_v26, %v7920_v19 }
0x2bf0   :  { %3869 = vrot.lane.b32.xlu0 %v3867_v22, %s6877_s24 }
0x2c62   :  { %v3870_v23 = vpop.permute.xlu0 %3869 }
0x2c63   :  { %v3872_v5 = vadd.f32 %v3870_v23, %v3853_v2 }
0x2c65   :  { %6561 = vtanh.f32 %v3872_v5 }
0x2c6f   :  { %v6562_v42 = vpop.eup %6561 }
0x2c70   :  { %3876 = vrot.lane.b32.xlu0 %v6562_v42, %s6875_s1 }
0x2ce2   :  { %v3877_v29 = vpop.permute.xlu0 %3876 }
0x2ce3   :  { %v3879_v47 = vmul.f32 %v3877_v29, %v3874_v62 }
0x2ce5   :  { %v8036_v32 = vadd.f32 %v3880_v27, %v3879_v47 }
0x2ce7   :  { %3883 = vrot.lane.b32.xlu0 %v8036_v32, %s6875_s1 }
0x2d59   :  { %v3884_v49 = vpop.permute.xlu0 %3883 }
0x2d5a   :  { %5856 = vmatmul.mubr.msk.f32.vlgmr.msra.gmra.mrb[24].mxu1 %vm209_vm1, %v3884_v49 }
0x2d5b   :  { %6314 = vmatpush3.bf16.msra.mxu1 %v7283_v48  ;;  %6123 = vmatprep.mubr.msk.f32.mxu1 %vm6870_vm0, %v8627_v51 }
0x2d5c   :  { %6323 = vmatprep.subr.bf16.mxu1 %v8628_v30 }
0x2e2d   :  { %v3953_v14 = vpop.f32.mrb[24].mxu1 }
0x2e2e   :  { %v8046_v6 = vadd.f32 %v3953_v14, %v7148_v61  ;;  %v8048_v19 = vpop.f32.mrb[25].mxu1 }
0x2e30   :  { %v3997_v41 = vrot.slane %v8046_v6, %v7154_v4 }
0x2e32   :  { %v3998_v55 = vcombine.high %v3997_v41, %v3997_v41  ;;  %v4005_v2 = vrot.slane %v3997_v41, %v7154_v4 }
0x2e34   :  { %v4012_v53 = vrot.slane %v3998_v55, %v7154_v4  ;;  %v4016_v54 = vrot.slane %v4005_v2, %v7142_v57 }
0x2e36   :  { %v4020_v18 = vrot.slane %v4012_v53, %v7142_v57  ;;  %v4023_v15 = vadd.f32 %v4016_v54, %v7172_v50  ;;  %v4024_v31 = vadd.f32 %v4016_v54, %v7165_v39 }
0x2e38   :  { %v4025_v26 = vadd.f32 %v4020_v18, %v7181_v59  ;;  %6563 = vtanh.f32 %v4023_v15  ;;  %v4026_v46 = vadd.f32 %v4020_v18, %v7179_v58 }
0x2e39   :  { %6565 = vtanh.f32 %v4024_v31 }
0x2e3a   :  { %6567 = vtanh.f32 %v4025_v26 }
0x2e3b   :  { %6569 = vtanh.f32 %v4026_v46 }
0x2e42   :  { %v6564_v22 = vpop.eup %6563 }
0x2e43   :  { %v6566_v23 = vpop.eup %6565  ;;  %v4031_v5 = vmul.f32 %v7944_v40, %v6564_v22 }
0x2e44   :  { %v6568_v42 = vpop.eup %6567  ;;  %v4032_v62 = vmul.f32 %v7944_v40, %v6566_v23 }
0x2e45   :  { %v4035_v29 = vsel %vm209_vm1, %v4031_v5, 0.0  ;;  %v4033_v47 = vmul.f32 %v7944_v40, %v6568_v42  ;;  %v6570_v49 = vpop.eup %6569 }
0x2e46   :  { %v4038_v27 = vsel %vm548_vm2, %v4032_v62, 0.0  ;;  %4036 = vadd.xlane.f32.xlu0 %v4035_v29  ;;  %v4034_v41 = vmul.f32 %v7944_v40, %v6570_v49 }
0x2e47   :  { %4039 = vadd.xlane.f32.xlu1 %v4038_v27  ;;  %v4041_v14 = vsel %vm209_vm1, %v4033_v47, 0.0 }
0x2e48   :  { %v4044_v55 = vsel %vm548_vm2, %v4034_v41, 0.0 }
0x2e4b   :  { %4042 = vadd.xlane.f32.xlu1 %v4041_v14 }
0x2e4f   :  { %4045 = vadd.xlane.f32.xlu1 %v4044_v55 }
0x2ed3   :  { %v4037_v53 = vpop.xlane.xlu0 %4036 }
0x2ed4   :  { %v4040_v2 = vpop.xlane.xlu1 %4039  ;;  %v4047_v15 = vadd.f32 %v4037_v53, %v7206_v35 }
0x2ed5   :  { %v4048_v18 = vadd.f32 %v4040_v2, %v7206_v35 }
0x2ed6   :  { %v4058_v22 = vrot.slane %v4047_v15, %v7204_v34 }
0x2ed7   :  { %v4062_v46 = vrot.slane %v4048_v18, %v7200_v33 }
0x2ed8   :  { %v4043_v54 = vpop.xlane.xlu1 %4042 }
0x2ed9   :  { %v4049_v31 = vadd.f32 %v4043_v54, %v7206_v35  ;;  %v4063_v62 = vsel %vm584_vm3, %v4062_v46, %v4058_v22 }
0x2edb   :  { %v4067_v5 = vrot.slane %v4049_v31, %v7204_v34 }
0x2edc   :  { %v4046_v26 = vpop.xlane.xlu1 %4045 }
0x2edd   :  { %v4050_v23 = vadd.f32 %v4046_v26, %v7206_v35 }
0x2edf   :  { %v4071_v42 = vrot.slane %v4050_v23, %v7200_v33 }
0x2ee1   :  { %v4072_v29 = vsel %vm584_vm3, %v4071_v42, %v4067_v5 }
0x2ee2   :  { %v4073_v27 = vsel %vm595_vm4, %v4072_v29, %v4063_v62 }
0x2ee3   :  { %v4075_v47 = vsel %vm598_vm5, %v4073_v27, -inf }
0x2ee4   :  { %4076 = vmax.xlane.f32.xlu1 %v4075_v47 }
0x2f71   :  { %v4077_v49 = vpop.xlane.xlu1 %4076 }
0x2f72   :  { %v4082_v14 = vrot.slane %v4077_v49, %v7142_v57  ;;  %v4086_v41 = vrot.slane %v4077_v49, %v7221_v52 }
0x2f74   :  { %v4089_v55 = vsub.f32 %v4047_v15, %v4082_v14  ;;  %v4090_v2 = vsub.f32 %v4048_v18, %v4082_v14  ;;  %v4091_v53 = vsub.f32 %v4049_v31, %v4086_v41  ;;  %v4092_v35 = vsub.f32 %v4050_v23, %v4086_v41 }
0x2f75   :  { %v8084_v18 = vadd.f32 %v8048_v19, %v7357_v44 }
0x2f76   :  { %v4093_v54 = vmul.f32 1.442695, %v4089_v55  ;;  %v4095_v26 = vmul.f32 1.442695, %v4090_v2  ;;  %v4097_v46 = vmul.f32 1.442695, %v4091_v53 }
0x2f77   :  { %v4099_v22 = vmul.f32 1.442695, %v4092_v35  ;;  %v3958_v15 = vsel %vm993_vm8, %v8084_v18, -inf }
0x2f78   :  { %6571 = vpow2.f32 %v4093_v54 }
0x2f79   :  { %6573 = vpow2.f32 %v4095_v26 }
0x2f7a   :  { %6575 = vpow2.f32 %v4097_v46 }
0x2f7b   :  { %6577 = vpow2.f32 %v4099_v22 }
0x2f82   :  { %v6572_v5 = vpop.eup %6571 }
0x2f83   :  { %v6574_v42 = vpop.eup %6573  ;;  %4106 = vperm.xlu1 %6378, %v6572_v5  }
0x2f84   :  { %4109 = vperm.xlu0 %6377, %v6574_v42   ;;  %v6576_v62 = vpop.eup %6575 }
0x2f85   :  { %v6578_v29 = vpop.eup %6577 }
0x2f87   :  { %4112 = vperm.xlu1 %6378, %v6576_v62  }
0x2f8b   :  { %4115 = vperm.xlu1 %6378, %v6578_v29  }
0x2fa3   :  { %3959 = vmax.xlane.f32.xlu0 %v3958_v15 }
0x3002   :  { %v4107_v31 = vpop.permute.xlu1 %4106 }
0x3003   :  { %v4110_v23 = vpop.permute.xlu0 %4109  ;;  %v4120_v47 = vrot.slane %v4107_v31, %v7204_v34 }
0x3004   :  { %v4124_v27 = vrot.slane %v4110_v23, %v7200_v33 }
0x3006   :  { %v4113_v35 = vpop.permute.xlu1 %4112  ;;  %v4125_v55 = vsel %vm584_vm3, %v4124_v27, %v4120_v47 }
0x3007   :  { %v4129_v14 = vrot.slane %v4113_v35, %v7204_v34 }
0x300a   :  { %v4116_v49 = vpop.permute.xlu1 %4115 }
0x300b   :  { %v4133_v41 = vrot.slane %v4116_v49, %v7200_v33 }
0x300d   :  { %v4134_v19 = vsel %vm584_vm3, %v4133_v41, %v4129_v14 }
0x300e   :  { %v4135_v2 = vsel %vm595_vm4, %v4134_v19, %v4125_v55 }
0x300f   :  { %v4137_v53 = vsel %vm598_vm5, %v4135_v2, 0.0 }
0x3010   :  { %4138 = vadd.xlane.f32.xlu1 %v4137_v53  ;;  %v5547_v53 = vadd.s32 4294967278, %v7196_v24 }
0x3030   :  { %v8096_v54 = vpop.xlane.xlu0 %3959 }
0x3031   :  { %vm3970_vm12 = vcmp.ge.f32.partialorder %v8084_v18, %v8096_v54 }
0x3032   :  { %v3971_v26 = vsel %vm3970_vm12, %v7196_v24, 16  ;;  %vm5753_vm12 = vcmask 244736  }
0x3033   :  { %v3972_v46 = vsel %vm993_vm8, %v3971_v26, 2147483647  ;;  %v5550_v26 = vsub.s32 %v5547_v53, %v7028_v7 }
0x3034   :  { %v3974_v22 = vshra.s32 %v3972_v46, 16  ;;  %v3973_v2 = vand.u32 65535, %v3972_v46  ;;  %v5534_v46 = vrot.slane %v7273_v13, %v7204_v34  ;;  %v5588_v13 = vadd.s32 4294967266, %v7196_v24 }
0x3036   :  { %v3976_v15 = vcvt.s32.f32 %v3974_v22  ;;  %v5591_v53 = vsub.s32 %v5588_v13, %v7028_v7  ;;  %v5680_v13 = vadd.s32 4294967226, %v7196_v24 }
0x3038   :  { %3977 = vmin.xlane.f32.xlu0 %v3976_v15 }
0x309d   :  { %v4139_v31 = vpop.xlane.xlu1 %4138 }
0x309e   :  { %v4144_v23 = vrot.slane %v4139_v31, %v7142_v57  ;;  %v4148_v35 = vrot.slane %v4139_v31, %v7221_v52  ;;  %v5565_v31 = vadd.s32 4294967276, %v7196_v24 }
0x30a0   :  { %6579 = vrcp.f32 %v4144_v23 }
0x30a1   :  { %6581 = vrcp.f32 %v4148_v35  ;;  %v5561_v35 = vrot.slane %v7397_v12, %v5550_v26  ;;  %v5568_v12 = vsub.s32 %v5565_v31, %v7028_v7 }
0x30aa   :  { %v6580_v27 = vpop.eup %6579 }
0x30ab   :  { %v4153_v47 = vmul.f32 %v6580_v27, %v6574_v42  ;;  %v4152_v49 = vmul.f32 %v6580_v27, %v6572_v5  ;;  %v6582_v14 = vpop.eup %6581  ;;  %v3975_v42 = vcvt.s32.f32 %v3973_v2  ;;  %v5611_v2 = vadd.s32 4294967256, %v7196_v24 }
0x30ac   :  { %v4155_v41 = vmul.f32 %v6582_v14, %v6576_v62  ;;  %v4156_v55 = vmul.f32 %v6582_v14, %v6578_v29  ;;  %v5542_v62 = vadd.s32 4294967286, %v7196_v24  ;;  %v5538_v29 = vrot.slane %v7277_v20, %v7200_v33 }
0x30ad   :  { %4164 = vperm.xlu1 %6378, %v4153_v47   ;;  %4159 = vperm.xlu0 %6377, %v4152_v49   ;;  %v5525_v20 = vrot.slane %v7263_v63, %v7204_v34  ;;  %v5551_v47 = vrot.slane %v7385_v38, %v5550_v26  ;;  %v5593_v49 = vadd.s32 4294967258, %v7196_v24 }
0x30ae   :  { %v5545_v22 = vsub.s32 %v5542_v62, %v7028_v7  ;;  %v5539_v27 = vsel %vm584_vm3, %v5538_v29, %v5534_v46  ;;  %v8649_v29 = vld [vmem:[#allocation26_spill] sm:$0xff] }
0x30af   :  { %v5569_v26 = vrot.slane %v8649_v29, %v5568_v12 }
0x30b0   :  { %v5557_v23 = vrot.slane %v7395_v11, %v5545_v22 }
0x30b1   :  { %4169 = vperm.xlu1 %6378, %v4155_v41   ;;  %4174 = vperm.xlu0 %6377, %v4156_v55   ;;  %v5580_v55 = vrot.slane %v7517_v36, %v5568_v12  ;;  %v5634_v36 = vadd.s32 4294967246, %v7196_v24 }
0x30b2   :  { %v5562_v63 = vsel %vm5552_vm14, %v5561_v35, %v5557_v23 }
0x30b3   :  { %v5637_v12 = vsub.s32 %v5634_v36, %v7028_v7  ;;  %v5683_v36 = vsub.s32 %v5680_v13, %v7028_v7 }
0x30b5   :  { %4348 = vrot.lane.b32.xlu0 %v8046_v6, %s6875_s1 }
0x30b9   :  { %4358 = vrot.lane.b32.xlu0 %v8046_v6, %s6876_s30  ;;  %v5529_v6 = vrot.slane %v7267_v8, %v7200_v33  ;;  %v5546_v8 = vrot.slane %v7387_v1, %v5545_v22  ;;  %v5616_v1 = vadd.s32 4294967248, %v7196_v24  ;;  %v5639_v22 = vadd.s32 4294967238, %v7196_v24 }
0x30bb   :  { %v5530_v14 = vsel %vm584_vm3, %v5529_v6, %v5525_v20  ;;  %v8650_v6 = vld [vmem:[#allocation31_spill] sm:$0xff]  ;;  %v5619_v35 = vsub.s32 %v5616_v1, %v7028_v7  ;;  %v5614_v20 = vsub.s32 %v5611_v2, %v7028_v7  ;;  %v8654_v1 = vld [vmem:[#allocation37_spill] sm:$0xff] }
0x30bc   :  { %v5540_v41 = vsel %vm595_vm4, %v5539_v27, %v5530_v14  ;;  %v5603_v46 = vrot.slane %v8650_v6, %v5591_v53  ;;  %v8657_v6 = vld [vmem:[#allocation42_spill] sm:$0xff] }
0x30bd   :  { %v5630_v2 = vrot.slane %v8654_v1, %v5619_v35 }
0x30c5   :  { %v8108_v19 = vpop.xlane.xlu0 %3977 }
0x30c6   :  { %vm3979_vm13 = vcmp.eq.f32.partialorder %v3976_v15, %v8108_v19  ;;  %v5570_v15 = vadd.s32 4294967268, %v7196_v24 }
0x30c7   :  { %v3980_v5 = vsel %vm3979_vm13, %v3975_v42, inf  ;;  %v5553_v42 = vsel %vm5552_vm14, %v5551_v47, %v5546_v8  ;;  %v8653_v47 = vld [vmem:[#allocation30_spill] sm:$0xff]  ;;  %vm5644_vm13 = vcmask 540112   ;;  %vm5690_vm14 = vcmask 704112  }
0x30c8   :  { %v5573_v11 = vsub.s32 %v5570_v15, %v7028_v7  ;;  %v8651_v15 = vld [vmem:[#allocation32_spill] sm:$0xff]  ;;  %v5592_v8 = vrot.slane %v8653_v47, %v5591_v53 }
0x30c9   :  { %v8656_v53 = vld [vmem:[#allocation36_spill] sm:$0xff] }
0x30ca   :  { %v5584_v38 = vrot.slane %v7519_v37, %v5573_v11  ;;  %v5574_v62 = vrot.slane %v7497_v9, %v5573_v11  ;;  %v5563_v37 = vsel %vm595_vm4, %v5562_v63, %v5553_v42  ;;  %v8652_v9 = vld [vmem:[#allocation29_spill] sm:$0xff]  ;;  %v5642_v11 = vsub.s32 %v5639_v22, %v7028_v7  ;;  %v8655_v42 = vld [vmem:[#allocation35_spill] sm:$0xff] }
0x30cb   :  { %v5615_v29 = vrot.slane %v8656_v53, %v5614_v20 }
0x30cc   :  { %v5585_v23 = vsel %vm5575_vm6, %v5584_v38, %v5580_v55  ;;  %v5576_v14 = vsel %vm5575_vm6, %v5574_v62, %v5569_v26  ;;  %v5626_v38 = vrot.slane %v7758_v10, %v5614_v20  ;;  %v8660_v20 = vld [vmem:[#allocation41_spill] sm:$0xff]  ;;  %vm5757_vm6 = vcmask 408576  }
0x30cd   :  { %v5586_v63 = vsel %vm595_vm4, %v5585_v23, %v5576_v14  ;;  %v8659_v23 = vld [vmem:[#allocation40_spill] sm:$0xff]  ;;  %v5638_v47 = vrot.slane %v8660_v20, %v5637_v12 }
0x30d5   :  { %3981 = vmin.xlane.f32.xlu1 %v3980_v5  ;;  %v5596_v5 = vsub.s32 %v5593_v49, %v7028_v7  ;;  %v5685_v49 = vadd.s32 4294967218, %v7196_v24 }
0x30d7   :  { %v5607_v31 = vrot.slane %v8651_v15, %v5596_v5  ;;  %v5597_v27 = vrot.slane %v8652_v9, %v5596_v5  ;;  %v5620_v5 = vrot.slane %v8655_v42, %v5619_v35  ;;  %v5649_v15 = vrot.slane %v8657_v6, %v5637_v12  ;;  %v8658_v9 = vld [vmem:[#allocation43_spill] sm:$0xff] }
0x30d8   :  { %v5653_v62 = vrot.slane %v8658_v9, %v5642_v11  ;;  %v5688_v22 = vsub.s32 %v5685_v49, %v7028_v7  ;;  %v5643_v35 = vrot.slane %v8659_v23, %v5642_v11 }
0x30d9   :  { %v5608_v55 = vsel %vm5598_vm10, %v5607_v31, %v5603_v46  ;;  %v5599_v26 = vsel %vm5598_vm10, %v5597_v27, %v5592_v8  ;;  %v5750_v46 = vsel %vm5749_vm15, %v5540_v41, %v5563_v37  ;;  %v5631_v31 = vsel %vm5621_vm11, %v5630_v2, %v5626_v38 }
0x30da   :  { %v5609_v10 = vsel %vm595_vm4, %v5608_v55, %v5599_v26  ;;  %v5752_v14 = vsel %vm5751_vm9, %v5750_v46, %v5586_v63  ;;  %v5622_v1 = vsel %vm5621_vm11, %v5620_v5, %v5615_v29  ;;  %v5654_v27 = vsel %vm5644_vm13, %v5653_v62, %v5649_v15  ;;  %v8661_v15 = vld [vmem:[#allocation44_spill] sm:$0xff] }
0x30db   :  { %v5754_v55 = vsel %vm5753_vm12, %v5752_v14, %v5609_v10  ;;  %vm5755_vm15 = vcmask 326656   ;;  %v5632_v11 = vsel %vm595_vm4, %v5631_v31, %v5622_v1  ;;  %v5645_v38 = vsel %vm5644_vm13, %v5643_v35, %v5638_v47 }
0x30dc   :  { %v5655_v5 = vsel %vm595_vm4, %v5654_v27, %v5645_v38  ;;  %vm5759_vm9 = vcmask 490496   ;;  %v5756_v26 = vsel %vm5755_vm15, %v5754_v55, %v5632_v11  ;;  %vm5761_vm10 = vcmask 572416  }
0x30dd   :  { %v5758_v10 = vsel %vm5757_vm6, %v5756_v26, %v5655_v5  ;;  %vm5500_vm15 = vcmask 654336  }
0x312c   :  { %v4165_v8 = vpop.permute.xlu1 %4164  ;;  %v4160_v49 = vpop.permute.xlu0 %4159 }
0x312d   :  { %v4178_v13 = vmul.f32 %v7867_v60, %v4165_v8  ;;  %v5689_v42 = vrot.slane %v4165_v8, %v5688_v22  ;;  %v4177_v41 = vmul.f32 %v7874_v43, %v4160_v49  ;;  %v5684_v37 = vrot.slane %v4160_v49, %v5683_v36 }
0x312f   :  { %v4182_v12 = vsel %vm548_vm2, %v4178_v13, 0.0  ;;  %v4181_v63 = vsel %vm209_vm1, %v4177_v41, 0.0  ;;  %v5691_v2 = vsel %vm5690_vm14, %v5689_v42, %v5684_v37 }
0x3130   :  { %v4183_v60 = vadd.f32 %v4182_v12, %v4181_v63  ;;  %v4170_v53 = vpop.permute.xlu1 %4169  ;;  %v4175_v29 = vpop.permute.xlu0 %4174 }
0x3131   :  { %v4179_v43 = vmul.f32 %v7887_v45, %v4170_v53  ;;  %v5695_v6 = vrot.slane %v4170_v53, %v5683_v36  ;;  %v4180_v9 = vmul.f32 %v8661_v15, %v4175_v29  ;;  %v5699_v62 = vrot.slane %v4175_v29, %v5688_v22 }
0x3132   :  { %v4184_v46 = vrot.slane %v4183_v60, 4  ;;  %v5760_v45 = vsel %vm5759_vm9, %v5758_v10, %v8009_v21  ;;  %v3984_v21 = vcvt.f32.s32 %v8108_v19 }
0x3133   :  { %v4190_v31 = vsel %vm209_vm1, %v4179_v43, 0.0  ;;  %v4191_v23 = vsel %vm548_vm2, %v4180_v9, 0.0  ;;  %v5700_v35 = vsel %vm5690_vm14, %v5699_v62, %v5695_v6  ;;  %vm5713_vm14 = vcmask 786112  }
0x3134   :  { %v4185_v20 = vadd.f32 %v4184_v46, %v4183_v60  ;;  %v4192_v47 = vadd.f32 %v4191_v23, %v4190_v31  ;;  %v5701_v14 = vsel %vm595_vm4, %v5700_v35, %v5691_v2  ;;  %v3985_v12 = vshll.u32 %v3984_v21, 16  ;;  %v4349_v15 = vpop.permute.xlu0 %4348 }
0x3135   :  { %v8187_v36 = vsel %vm5761_vm10, %v5760_v45, %v5701_v14  ;;  %vm5764_vm10 = vcmask 736256  }
0x3136   :  { %v4186_v22 = vrot.slane %v4185_v20, 2  ;;  %v4193_v1 = vrot.slane %v4192_v47, 4 }
0x3138   :  { %v4187_v27 = vadd.f32 %v4186_v22, %v4185_v20  ;;  %v4194_v8 = vadd.f32 %v4193_v1, %v4192_v47  ;;  %v4359_v31 = vpop.permute.xlu0 %4358 }
0x313a   :  { %v4195_v49 = vrot.slane %v4194_v8, 2  ;;  %v4188_v13 = vrot.slane %v4187_v27, 1 }
0x313c   :  { %v4196_v42 = vadd.f32 %v4195_v49, %v4194_v8  ;;  %v4189_v37 = vadd.f32 %v4188_v13, %v4187_v27 }
0x313e   :  { %v4197_v41 = vrot.slane %v4196_v42, 1 }
0x3140   :  { %v4198_v55 = vadd.f32 %v4197_v41, %v4196_v42 }
0x3142   :  { %v4201_v11 = vsel %vm595_vm4, %v4198_v55, %v4189_v37 }
0x3143   :  { %6117 = vmatmul.mubr.msk.f32.vlgmr.msra.gmra.mrb[24].mxu0 %vm209_vm1, %v4201_v11 }
0x3144   :  { %6318 = vmatpush1.bf16.msra.mxu0 %v7053_v17  ;;  %4445 = vmatprep.mubr.f32.mxu0 %v8627_v51 }
0x3145   :  { %6320 = vmatprep.subr.bf16.mxu0 %v7075_v25 }
0x3148   :  { %6322 = vmatpush1.bf16.msra.mxu0 %v7088_v28 }
0x3149   :  { %6329 = vmatprep.subr.bf16.mxu0 %v8628_v30 }
0x3162   :  { %v3982_v38 = vpop.xlane.xlu1 %3981 }
0x3163   :  { %v3983_v63 = vcvt.f32.s32 %v3982_v38 }
0x3165   :  { %v3986_v2 = vadd.s32 %v3985_v12, %v3983_v63 }
0x3167   :  { %vm3987_vm11 = vcmp.eq.s32.totalorder %v7196_v24, %v3986_v2 }
0x3168   :  { %v5857_v5 = vsel %vm3987_vm11, 1.0, %v8627_v51  ;;  %vm5766_vm11 = vcmask 812032  }
0x3169   :  { %6124 = vmatmul.mubr.msk.f32.vlgmr.msra.gmra.mrb[26].mxu1 %vm804_vm7, %v5857_v5 }
0x316a   :  { %6325 = vmatpush3.bf16.msra.mxu1 %v7248_v56  ;;  %6134 = vmatprep.mubr.msk.f32.mxu1 %vm6870_vm0, %v8627_v51 }
0x316b   :  { %6326 = vmatprep.subr.bf16.mxu1 %v8628_v30 }
0x316e   :  { %6328 = vmatpush3.bf16.msra.mxu1 %v7254_v0 }
0x316f   :  { %6333 = vmatprep.subr.bf16.mxu1 %v7051_v16 }
0x3216   :  { %v4270_v19 = vpop.f32.mrb[24].mxu0 }
0x3217   :  { %v6118_v60 = vpop.f32.mrb[25].mxu0 }
0x323c   :  { %v4343_v53 = vpop.f32.mrb[26].mxu1 }
0x323d   :  { %v4344_v29 = vadd.f32 %v4343_v53, %v4270_v19  ;;  %v6125_v43 = vpop.f32.mrb[27].mxu1 }
0x323f   :  { %v4347_v6 = vadd.f32 %v8030_v3, %v4344_v29 }
0x3241   :  { %v4351_v9 = vadd.f32 %v4349_v15, %v4347_v6 }
0x3243   :  { %v5860_v62 = vmul.f32 -1.442695, %v4351_v9 }
0x3245   :  { %6583 = vpow2.f32 %v5860_v62 }
0x324f   :  { %v6584_v26 = vpop.eup %6583 }
0x3250   :  { %v4355_v46 = vadd.f32 1.0, %v6584_v26 }
0x3252   :  { %6585 = vrcp.f32 %v4355_v46 }
0x325c   :  { %v6586_v10 = vpop.eup %6585 }
0x325d   :  { %v4361_v23 = vmul.f32 %v6586_v10, %v4359_v31  ;;  %v4368_v47 = vsub.f32 1.0, %v6586_v10  ;;  %v4374_v45 = vmul.f32 %v6586_v10, %v8036_v32 }
0x325f   :  { %4363 = vrot.lane.b32.xlu0 %v4361_v23, %s6877_s24  ;;  %v8662_v23 = vld [vmem:[#allocation21_spill] sm:$0xff] }
0x32d1   :  { %v4364_v16 = vpop.permute.xlu0 %4363 }
0x32d2   :  { %v4366_v35 = vadd.f32 %v4364_v16, %v4347_v6 }
0x32d4   :  { %6587 = vtanh.f32 %v4366_v35 }
0x32de   :  { %v6588_v20 = vpop.eup %6587 }
0x32df   :  { %4370 = vrot.lane.b32.xlu0 %v6588_v20, %s6875_s1 }
0x3351   :  { %v4371_v14 = vpop.permute.xlu0 %4370 }
0x3352   :  { %v4373_v22 = vmul.f32 %v4371_v14, %v4368_v47 }
0x3354   :  { %v8210_v1 = vadd.f32 %v4374_v45, %v4373_v22 }
0x3356   :  { %4377 = vrot.lane.b32.xlu0 %v8210_v1, %s6875_s1 }
0x33c8   :  { %v4378_v27 = vpop.permute.xlu0 %4377 }
0x33c9   :  { %5861 = vmatmul.mubr.msk.f32.vlgmr.msra.gmra.mrb[26].mxu0 %vm209_vm1, %v4378_v27 }
0x33ca   :  { %6331 = vmatpush3.bf16.msra.mxu0 %v7283_v48  ;;  %6141 = vmatprep.mubr.msk.f32.mxu0 %vm6870_vm0, %v8627_v51 }
0x33cb   :  { %6340 = vmatprep.subr.bf16.mxu0 %v8628_v30 }
0x349c   :  { %v4447_v8 = vpop.f32.mrb[26].mxu0 }
0x349d   :  { %v8220_v49 = vadd.f32 %v4447_v8, %v7148_v61  ;;  %v8222_v32 = vpop.f32.mrb[27].mxu0 }
0x349f   :  { %v4491_v13 = vrot.slane %v8220_v49, %v7154_v4 }
0x34a1   :  { %v4492_v42 = vcombine.high %v4491_v13, %v4491_v13  ;;  %v4499_v41 = vrot.slane %v4491_v13, %v7154_v4 }
0x34a3   :  { %v4506_v37 = vrot.slane %v4492_v42, %v7154_v4  ;;  %v4510_v55 = vrot.slane %v4499_v41, %v7142_v57 }
0x34a5   :  { %v4514_v11 = vrot.slane %v4506_v37, %v7142_v57  ;;  %v4517_v21 = vadd.f32 %v4510_v55, %v7172_v50  ;;  %v4518_v38 = vadd.f32 %v4510_v55, %v7165_v39 }
0x34a7   :  { %v4519_v12 = vadd.f32 %v4514_v11, %v7181_v59  ;;  %6589 = vtanh.f32 %v4517_v21  ;;  %v4520_v63 = vadd.f32 %v4514_v11, %v7179_v58 }
0x34a8   :  { %6591 = vtanh.f32 %v4518_v38 }
0x34a9   :  { %6593 = vtanh.f32 %v4519_v12 }
0x34aa   :  { %6595 = vtanh.f32 %v4520_v63 }
0x34b1   :  { %v6590_v2 = vpop.eup %6589 }
0x34b2   :  { %v6592_v5 = vpop.eup %6591  ;;  %v4525_v19 = vmul.f32 %v7944_v40, %v6590_v2 }
0x34b3   :  { %v6594_v60 = vpop.eup %6593  ;;  %v4526_v53 = vmul.f32 %v7944_v40, %v6592_v5 }
0x34b4   :  { %v4529_v29 = vsel %vm209_vm1, %v4525_v19, 0.0  ;;  %v4527_v6 = vmul.f32 %v7944_v40, %v6594_v60  ;;  %v6596_v15 = vpop.eup %6595 }
0x34b5   :  { %v4532_v43 = vsel %vm548_vm2, %v4526_v53, 0.0  ;;  %4530 = vadd.xlane.f32.xlu0 %v4529_v29  ;;  %v4528_v62 = vmul.f32 %v7944_v40, %v6596_v15  ;;  %v8258_v15 = vadd.f32 %v8222_v32, %v7357_v44 }
0x34b6   :  { %4533 = vadd.xlane.f32.xlu1 %v4532_v43  ;;  %v4535_v9 = vsel %vm209_vm1, %v4527_v6, 0.0 }
0x34b7   :  { %v4538_v26 = vsel %vm548_vm2, %v4528_v62, 0.0 }
0x34ba   :  { %4536 = vadd.xlane.f32.xlu1 %v4535_v9  ;;  %v4452_v9 = vsel %vm993_vm8, %v8258_v15, -inf }
0x34be   :  { %4539 = vadd.xlane.f32.xlu1 %v4538_v26 }
0x3542   :  { %v4531_v10 = vpop.xlane.xlu0 %4530 }
0x3543   :  { %v4534_v46 = vpop.xlane.xlu1 %4533  ;;  %v4541_v35 = vadd.f32 %v4531_v10, %v8662_v23 }
0x3544   :  { %v4542_v16 = vadd.f32 %v4534_v46, %v8662_v23 }
0x3545   :  { %v4552_v45 = vrot.slane %v4541_v35, %v7204_v34 }
0x3546   :  { %v4556_v14 = vrot.slane %v4542_v16, %v7200_v33 }
0x3547   :  { %v4537_v31 = vpop.xlane.xlu1 %4536 }
0x3548   :  { %v4543_v20 = vadd.f32 %v4537_v31, %v8662_v23  ;;  %v4557_v8 = vsel %vm584_vm3, %v4556_v14, %v4552_v45 }
0x354a   :  { %v4561_v22 = vrot.slane %v4543_v20, %v7204_v34 }
0x354b   :  { %v4540_v47 = vpop.xlane.xlu1 %4539 }
0x354c   :  { %v4544_v40 = vadd.f32 %v4540_v47, %v8662_v23 }
0x354e   :  { %v4565_v27 = vrot.slane %v4544_v40, %v7200_v33 }
0x3550   :  { %v4566_v13 = vsel %vm584_vm3, %v4565_v27, %v4561_v22 }
0x3551   :  { %v4567_v42 = vsel %vm595_vm4, %v4566_v13, %v4557_v8 }
0x3552   :  { %v4569_v41 = vsel %vm598_vm5, %v4567_v42, -inf }
0x3553   :  { %4570 = vmax.xlane.f32.xlu1 %v4569_v41 }
0x35e0   :  { %v4571_v37 = vpop.xlane.xlu1 %4570 }
0x35e1   :  { %v4576_v55 = vrot.slane %v4571_v37, %v7142_v57  ;;  %v4580_v11 = vrot.slane %v4571_v37, %v7221_v52 }
0x35e3   :  { %v4583_v21 = vsub.f32 %v4541_v35, %v4576_v55  ;;  %v4584_v38 = vsub.f32 %v4542_v16, %v4576_v55  ;;  %v4585_v12 = vsub.f32 %v4543_v20, %v4580_v11  ;;  %v4586_v5 = vsub.f32 %v4544_v40, %v4580_v11 }
0x35e5   :  { %v4587_v63 = vmul.f32 1.442695, %v4583_v21  ;;  %v4589_v2 = vmul.f32 1.442695, %v4584_v38  ;;  %v4591_v19 = vmul.f32 1.442695, %v4585_v12 }
0x35e6   :  { %v4593_v60 = vmul.f32 1.442695, %v4586_v5 }
0x35e7   :  { %6597 = vpow2.f32 %v4587_v63 }
0x35e8   :  { %6599 = vpow2.f32 %v4589_v2 }
0x35e9   :  { %6601 = vpow2.f32 %v4591_v19 }
0x35ea   :  { %6603 = vpow2.f32 %v4593_v60 }
0x35f1   :  { %v6598_v53 = vpop.eup %6597 }
0x35f2   :  { %v6600_v29 = vpop.eup %6599  ;;  %4600 = vperm.xlu1 %6378, %v6598_v53  }
0x35f3   :  { %4603 = vperm.xlu0 %6377, %v6600_v29   ;;  %v6602_v43 = vpop.eup %6601 }
0x35f4   :  { %v6604_v6 = vpop.eup %6603 }
0x35f6   :  { %4606 = vperm.xlu1 %6378, %v6602_v43  }
0x35fa   :  { %4609 = vperm.xlu1 %6378, %v6604_v6  }
0x3612   :  { %4453 = vmax.xlane.f32.xlu0 %v4452_v9 }
0x3671   :  { %v4601_v62 = vpop.permute.xlu1 %4600 }
0x3672   :  { %v4604_v26 = vpop.permute.xlu0 %4603  ;;  %v4614_v31 = vrot.slane %v4601_v62, %v7204_v34 }
0x3673   :  { %v4618_v10 = vrot.slane %v4604_v26, %v7200_v33 }
0x3675   :  { %v4607_v46 = vpop.permute.xlu1 %4606  ;;  %v4619_v47 = vsel %vm584_vm3, %v4618_v10, %v4614_v31  ;;  %v8295_v10 = vld [vmem:[%s8572_s0] sm:$0xff] }
0x3676   :  { %v4623_v35 = vrot.slane %v4607_v46, %v7204_v34 }
0x3679   :  { %v4610_v16 = vpop.permute.xlu1 %4609 }
0x367a   :  { %v4627_v20 = vrot.slane %v4610_v16, %v7200_v33 }
0x367c   :  { %v4628_v32 = vsel %vm584_vm3, %v4627_v20, %v4623_v35 }
0x367d   :  { %v4629_v14 = vsel %vm595_vm4, %v4628_v32, %v4619_v47 }
0x367e   :  { %v4631_v45 = vsel %vm598_vm5, %v4629_v14, 0.0 }
0x367f   :  { %4632 = vadd.xlane.f32.xlu1 %v4631_v45 }
0x369f   :  { %v8270_v40 = vpop.xlane.xlu0 %4453 }
0x36a0   :  { %vm4464_vm12 = vcmp.ge.f32.partialorder %v8258_v15, %v8270_v40 }
0x36a1   :  { %v4465_v22 = vsel %vm4464_vm12, %v7196_v24, 16 }
0x36a2   :  { %v4466_v27 = vsel %vm993_vm8, %v4465_v22, 2147483647  ;;  %v8304_v22 = vld [vmem:[%s8572_s0 + $0x10] sm:$0xff] }
0x36a3   :  { %v4468_v8 = vshra.s32 %v4466_v27, 16  ;;  %v4467_v5 = vand.u32 65535, %v4466_v27 }
0x36a5   :  { %v4470_v13 = vcvt.s32.f32 %v4468_v8  ;;  %v4469_v19 = vcvt.s32.f32 %v4467_v5 }
0x36a7   :  { %4471 = vmin.xlane.f32.xlu0 %v4470_v13 }
0x370c   :  { %v4633_v42 = vpop.xlane.xlu1 %4632 }
0x370d   :  { %v4638_v41 = vrot.slane %v4633_v42, %v7142_v57  ;;  %v4642_v37 = vrot.slane %v4633_v42, %v7221_v52 }
0x370f   :  { %6605 = vrcp.f32 %v4638_v41 }
0x3710   :  { %6607 = vrcp.f32 %v4642_v37 }
0x3719   :  { %v6606_v55 = vpop.eup %6605 }
0x371a   :  { %v4647_v11 = vmul.f32 %v6606_v55, %v6600_v29  ;;  %v4646_v21 = vmul.f32 %v6606_v55, %v6598_v53  ;;  %v6608_v38 = vpop.eup %6607  ;;  %v5708_v53 = vadd.s32 4294967208, %v7196_v24  ;;  %v5703_v29 = vadd.s32 4294967216, %v7196_v24 }
0x371b   :  { %v4649_v12 = vmul.f32 %v6608_v38, %v6602_v43  ;;  %v4650_v63 = vmul.f32 %v6608_v38, %v6604_v6 }
0x371c   :  { %4658 = vperm.xlu1 %6378, %v4647_v11   ;;  %4653 = vperm.xlu0 %6377, %v4646_v21   ;;  %v5711_v43 = vsub.s32 %v5708_v53, %v7028_v7  ;;  %v5706_v6 = vsub.s32 %v5703_v29, %v7028_v7 }
0x3720   :  { %4663 = vperm.xlu1 %6378, %v4649_v12   ;;  %4668 = vperm.xlu0 %6377, %v4650_v63  }
0x3724   :  { %4842 = vrot.lane.b32.xlu0 %v8220_v49, %s6875_s1 }
0x3728   :  { %4852 = vrot.lane.b32.xlu0 %v8220_v49, %s6876_s30  ;;  %v8289_v49 = vld [vmem:[%s8572_s0 + $0x8] sm:$0x3] }
0x3734   :  { %v4472_v2 = vpop.xlane.xlu0 %4471 }
0x3735   :  { %vm4473_vm13 = vcmp.eq.f32.partialorder %v4470_v13, %v4472_v2  ;;  %v8310_v13 = vld [vmem:[%s8572_s0 + $0x18] sm:$0x3]  ;;  %s6878_s0 = smov 16  }
0x3736   :  { %v4474_v60 = vsel %vm4473_vm13, %v4469_v19, inf }
0x3744   :  { %4475 = vmin.xlane.f32.xlu1 %v4474_v60 }
0x379b   :  { %v4659_v9 = vpop.permute.xlu1 %4658  ;;  %v4654_v62 = vpop.permute.xlu0 %4653 }
0x379c   :  { %v4672_v26 = vmul.f32 %v8289_v49, %v4659_v9  ;;  %v5712_v46 = vrot.slane %v4659_v9, %v5711_v43  ;;  %v4671_v31 = vmul.f32 %v8295_v10, %v4654_v62  ;;  %v5707_v16 = vrot.slane %v4654_v62, %v5706_v6 }
0x379e   :  { %v4676_v35 = vsel %vm548_vm2, %v4672_v26, 0.0  ;;  %v4675_v20 = vsel %vm209_vm1, %v4671_v31, 0.0  ;;  %v5714_v47 = vsel %vm5713_vm14, %v5712_v46, %v5707_v16 }
0x379f   :  { %v4677_v32 = vadd.f32 %v4676_v35, %v4675_v20  ;;  %v4664_v14 = vpop.permute.xlu1 %4663  ;;  %v4669_v45 = vpop.permute.xlu0 %4668 }
0x37a0   :  { %v4673_v27 = vmul.f32 %v8304_v22, %v4664_v14  ;;  %v5718_v8 = vrot.slane %v4664_v14, %v5706_v6  ;;  %v4674_v42 = vmul.f32 %v8310_v13, %v4669_v45  ;;  %v5722_v41 = vrot.slane %v4669_v45, %v5711_v43 }
0x37a1   :  { %v4678_v37 = vrot.slane %v4677_v32, 4 }
0x37a2   :  { %v4684_v55 = vsel %vm209_vm1, %v4673_v27, 0.0  ;;  %v4685_v11 = vsel %vm548_vm2, %v4674_v42, 0.0  ;;  %v5723_v21 = vsel %vm5713_vm14, %v5722_v41, %v5718_v8 }
0x37a3   :  { %v4679_v38 = vadd.f32 %v4678_v37, %v4677_v32  ;;  %v4686_v12 = vadd.f32 %v4685_v11, %v4684_v55  ;;  %v5724_v63 = vsel %vm595_vm4, %v5723_v21, %v5714_v47  ;;  %v4843_v27 = vpop.permute.xlu0 %4842 }
0x37a4   :  { %v8319_v5 = vsel %vm5500_vm15, %v8187_v36, %v5724_v63  ;;  %v4478_v36 = vcvt.f32.s32 %v4472_v2 }
0x37a5   :  { %v4680_v19 = vrot.slane %v4679_v38, 2  ;;  %v4687_v60 = vrot.slane %v4686_v12, 4 }
0x37a6   :  { %v4479_v35 = vshll.u32 %v4478_v36, 16 }
0x37a7   :  { %v4681_v53 = vadd.f32 %v4680_v19, %v4679_v38  ;;  %v4688_v29 = vadd.f32 %v4687_v60, %v4686_v12  ;;  %v4853_v55 = vpop.permute.xlu0 %4852 }
0x37a9   :  { %v4689_v43 = vrot.slane %v4688_v29, 2  ;;  %v4682_v6 = vrot.slane %v4681_v53, 1 }
0x37ab   :  { %v4690_v9 = vadd.f32 %v4689_v43, %v4688_v29  ;;  %v4683_v26 = vadd.f32 %v4682_v6, %v4681_v53 }
0x37ad   :  { %v4691_v62 = vrot.slane %v4690_v9, 1 }
0x37af   :  { %v4692_v46 = vadd.f32 %v4691_v62, %v4690_v9 }
0x37b1   :  { %v4695_v31 = vsel %vm595_vm4, %v4692_v46, %v4683_v26 }
0x37b2   :  { %6135 = vmatmul.mubr.msk.f32.vlgmr.msra.gmra.mrb[28].mxu1 %vm209_vm1, %v4695_v31 }
0x37b3   :  { %6335 = vmatpush1.bf16.msra.mxu1 %v7053_v17  ;;  %4939 = vmatprep.mubr.f32.mxu1 %v8627_v51 }
0x37b4   :  { %6337 = vmatprep.subr.bf16.mxu1 %v7075_v25 }
0x37b7   :  { %6339 = vmatpush1.bf16.msra.mxu1 %v7088_v28 }
0x37b8   :  { %6346 = vmatprep.subr.bf16.mxu1 %v8628_v30 }
0x37d1   :  { %v4476_v16 = vpop.xlane.xlu1 %4475 }
0x37d2   :  { %v4477_v20 = vcvt.f32.s32 %v4476_v16 }
0x37d4   :  { %v4480_v47 = vadd.s32 %v4479_v35, %v4477_v20 }
0x37d6   :  { %vm4481_vm6 = vcmp.eq.s32.totalorder %v7196_v24, %v4480_v47  ;;  %v6697_v47 = vld [vmem:[#allocation8] ss:$0 sm:$0xff] }
0x37d7   :  { %v5862_v32 = vsel %vm4481_vm6, 1.0, %v8627_v51 }
0x37d8   :  { %6142 = vmatmul.mubr.msk.f32.vlgmr.msra.gmra.mrb[28].mxu0 %vm804_vm7, %v5862_v32 }
0x37d9   :  { %6342 = vmatpush3.bf16.msra.mxu0 %v7248_v56  ;;  %6152 = vmatprep.mubr.msk.f32.mxu0 %vm6870_vm0, %v8627_v51 }
0x37da   :  { %6343 = vmatprep.subr.bf16.mxu0 %v8628_v30 }
0x37dd   :  { %6345 = vmatpush3.bf16.msra.mxu0 %v7254_v0 }
0x37de   :  { %6349 = vmatprep.subr.bf16.mxu0 %v8628_v30 }
0x3885   :  { %v4764_v17 = vpop.f32.mrb[28].mxu1 }
0x3886   :  { %v6136_v25 = vpop.f32.mrb[29].mxu1 }
0x38ab   :  { %v4837_v28 = vpop.f32.mrb[28].mxu0 }
0x38ac   :  { %v4838_v2 = vadd.f32 %v4837_v28, %v4764_v17  ;;  %v6143_v14 = vpop.f32.mrb[29].mxu0 }
0x38ae   :  { %v4841_v45 = vadd.f32 %v8030_v3, %v4838_v2 }
0x38b0   :  { %v4845_v8 = vadd.f32 %v4843_v27, %v4841_v45 }
0x38b2   :  { %v5865_v42 = vmul.f32 -1.442695, %v4845_v8 }
0x38b4   :  { %6609 = vpow2.f32 %v5865_v42 }
0x38be   :  { %v6610_v56 = vpop.eup %6609 }
0x38bf   :  { %v4849_v41 = vadd.f32 1.0, %v6610_v56 }
0x38c1   :  { %6611 = vrcp.f32 %v4849_v41 }
0x38cb   :  { %v6612_v37 = vpop.eup %6611 }
0x38cc   :  { %v4855_v11 = vmul.f32 %v6612_v37, %v4853_v55  ;;  %v4862_v12 = vsub.f32 1.0, %v6612_v37  ;;  %v4868_v63 = vmul.f32 %v6612_v37, %v8210_v1 }
0x38ce   :  { %4857 = vrot.lane.b32.xlu0 %v4855_v11, %s6877_s24 }
0x3940   :  { %v4858_v0 = vpop.permute.xlu0 %4857 }
0x3941   :  { %v4860_v21 = vadd.f32 %v4858_v0, %v4841_v45 }
0x3943   :  { %6613 = vtanh.f32 %v4860_v21 }
0x394d   :  { %v6614_v38 = vpop.eup %6613 }
0x394e   :  { %4864 = vrot.lane.b32.xlu0 %v6614_v38, %s6875_s1 }
0x39c0   :  { %v4865_v3 = vpop.permute.xlu0 %4864 }
0x39c1   :  { %v4867_v19 = vmul.f32 %v4865_v3, %v4862_v12 }
0x39c3   :  { %v8341_v60 = vadd.f32 %v4868_v63, %v4867_v19 }
0x39c5   :  { %4871 = vrot.lane.b32.xlu0 %v8341_v60, %s6875_s1 }
0x3a37   :  { %v4872_v53 = vpop.permute.xlu0 %4871 }
0x3a38   :  { %5866 = vmatmul.mubr.msk.f32.vlgmr.msra.gmra.mrb[30].mxu1 %vm209_vm1, %v4872_v53 }
0x3a39   :  { %6348 = vmatpush3.bf16.msra.mxu1 %v7283_v48  ;;  %6159 = vmatprep.mubr.msk.f32.mxu1 %vm6870_vm0, %v8627_v51 }
0x3b0b   :  { %v4941_v29 = vpop.f32.mrb[30].mxu1 }
0x3b0c   :  { %v8350_v43 = vadd.f32 %v4941_v29, %v7148_v61  ;;  %v8352_v6 = vpop.f32.mrb[31].mxu1 }
0x3b0e   :  { %v4985_v1 = vrot.slane %v8350_v43, %v7154_v4 }
0x3b10   :  { %v4986_v9 = vcombine.high %v4985_v1, %v4985_v1  ;;  %v4993_v62 = vrot.slane %v4985_v1, %v7154_v4 }
0x3b12   :  { %v5000_v26 = vrot.slane %v4986_v9, %v7154_v4  ;;  %v5004_v46 = vrot.slane %v4993_v62, %v7142_v57 }
0x3b14   :  { %v5008_v48 = vrot.slane %v5000_v26, %v7142_v57  ;;  %v5011_v31 = vadd.f32 %v5004_v46, %v7172_v50  ;;  %v5012_v36 = vadd.f32 %v5004_v46, %v7165_v39 }
0x3b16   :  { %v5013_v61 = vadd.f32 %v5008_v48, %v7181_v59  ;;  %6615 = vtanh.f32 %v5011_v31  ;;  %v5014_v16 = vadd.f32 %v5008_v48, %v7179_v58 }
0x3b17   :  { %6617 = vtanh.f32 %v5012_v36 }
0x3b18   :  { %6619 = vtanh.f32 %v5013_v61 }
0x3b19   :  { %6621 = vtanh.f32 %v5014_v16 }
0x3b20   :  { %v6616_v35 = vpop.eup %6615 }
0x3b21   :  { %v6618_v20 = vpop.eup %6617  ;;  %v5019_v4 = vmul.f32 %v6697_v47, %v6616_v35 }
0x3b22   :  { %v6620_v32 = vpop.eup %6619  ;;  %v5020_v17 = vmul.f32 %v6697_v47, %v6618_v20  ;;  %v8384_v20 = vadd.f32 %v8352_v6, %v7357_v44 }
0x3b23   :  { %v5023_v25 = vsel %vm209_vm1, %v5019_v4, 0.0  ;;  %v5021_v39 = vmul.f32 %v6697_v47, %v6620_v32  ;;  %v6622_v28 = vpop.eup %6621 }
0x3b24   :  { %v5026_v50 = vsel %vm548_vm2, %v5020_v17, 0.0  ;;  %5024 = vadd.xlane.f32.xlu0 %v5023_v25  ;;  %v5022_v58 = vmul.f32 %v6697_v47, %v6622_v28  ;;  %v4946_v47 = vsel %vm993_vm8, %v8384_v20, -inf }
0x3b25   :  { %5027 = vadd.xlane.f32.xlu1 %v5026_v50  ;;  %v5029_v59 = vsel %vm209_vm1, %v5021_v39, 0.0 }
0x3b26   :  { %v5032_v2 = vsel %vm548_vm2, %v5022_v58, 0.0 }
0x3b29   :  { %5030 = vadd.xlane.f32.xlu1 %v5029_v59 }
0x3b2d   :  { %5033 = vadd.xlane.f32.xlu1 %v5032_v2 }
0x3bb1   :  { %v5025_v45 = vpop.xlane.xlu0 %5024 }
0x3bb2   :  { %v5028_v14 = vpop.xlane.xlu1 %5027  ;;  %v5035_v42 = vadd.f32 %v5025_v45, %v8662_v23 }
0x3bb3   :  { %v5036_v8 = vadd.f32 %v5028_v14, %v8662_v23 }
0x3bb4   :  { %v5046_v55 = vrot.slane %v5035_v42, %v7204_v34 }
0x3bb5   :  { %v5050_v37 = vrot.slane %v5036_v8, %v7200_v33 }
0x3bb6   :  { %v5031_v27 = vpop.xlane.xlu1 %5030 }
0x3bb7   :  { %v5037_v56 = vadd.f32 %v5031_v27, %v8662_v23  ;;  %v5051_v38 = vsel %vm584_vm3, %v5050_v37, %v5046_v55 }
0x3bb9   :  { %v5055_v0 = vrot.slane %v5037_v56, %v7204_v34 }
0x3bba   :  { %v5034_v41 = vpop.xlane.xlu1 %5033 }
0x3bbb   :  { %v5038_v11 = vadd.f32 %v5034_v41, %v8662_v23 }
0x3bbd   :  { %v5059_v21 = vrot.slane %v5038_v11, %v7200_v33 }
0x3bbf   :  { %v5060_v12 = vsel %vm584_vm3, %v5059_v21, %v5055_v0 }
0x3bc0   :  { %v5061_v3 = vsel %vm595_vm4, %v5060_v12, %v5051_v38 }
0x3bc1   :  { %v5063_v63 = vsel %vm598_vm5, %v5061_v3, -inf  ;;  %v8665_v3 = vld [vmem:[#allocation28_spill] sm:$0xff] }
0x3bc2   :  { %5064 = vmax.xlane.f32.xlu1 %v5063_v63  ;;  %v8666_v63 = vld [vmem:[#allocation27_spill] sm:$0xff] }
0x3c4f   :  { %v5065_v19 = vpop.xlane.xlu1 %5064 }
0x3c50   :  { %v5070_v53 = vrot.slane %v5065_v19, %v7142_v57  ;;  %v5074_v29 = vrot.slane %v5065_v19, %v7221_v52  ;;  %v8415_v19 = vsub.f32 %v8666_v63, %v8665_v3 }
0x3c52   :  { %v5077_v1 = vsub.f32 %v5035_v42, %v5070_v53  ;;  %v5078_v23 = vsub.f32 %v5036_v8, %v5070_v53  ;;  %v5079_v9 = vsub.f32 %v5037_v56, %v5074_v29  ;;  %v5080_v46 = vsub.f32 %v5038_v11, %v5074_v29  ;;  %v8667_v29 = vld [vmem:[#allocation34_spill] sm:$0xff] }
0x3c53   :  { %v1986_v53 = vmul.f32 1.442695, %v8415_v19 }
0x3c54   :  { %v5081_v62 = vmul.f32 1.442695, %v5077_v1  ;;  %v5083_v26 = vmul.f32 1.442695, %v5078_v23  ;;  %v5085_v48 = vmul.f32 1.442695, %v5079_v9 }
0x3c55   :  { %v5087_v31 = vmul.f32 1.442695, %v5080_v46  ;;  %v8668_v1 = vld [vmem:[#allocation33_spill] sm:$0xff]  ;;  %v8670_v46 = vld [vmem:[#allocation38_spill] sm:$0xff] }
0x3c56   :  { %6623 = vpow2.f32 %v5081_v62  ;;  %v8420_v23 = vsub.f32 %v8668_v1, %v8667_v29 }
0x3c57   :  { %6625 = vpow2.f32 %v5083_v26  ;;  %v8669_v26 = vld [vmem:[#allocation39_spill] sm:$0xff] }
0x3c58   :  { %6627 = vpow2.f32 %v5085_v48  ;;  %v2480_v62 = vmul.f32 1.442695, %v8420_v23  ;;  %v8427_v48 = vsub.f32 %v8670_v46, %v8669_v26 }
0x3c59   :  { %6629 = vpow2.f32 %v5087_v31 }
0x3c60   :  { %v6624_v36 = vpop.eup %6623 }
0x3c61   :  { %v6626_v61 = vpop.eup %6625  ;;  %5094 = vperm.xlu1 %6378, %v6624_v36  }
0x3c62   :  { %5097 = vperm.xlu0 %6377, %v6626_v61   ;;  %v6628_v16 = vpop.eup %6627 }
0x3c63   :  { %v6630_v35 = vpop.eup %6629 }
0x3c65   :  { %5100 = vperm.xlu1 %6378, %v6628_v16  }
0x3c69   :  { %5103 = vperm.xlu1 %6378, %v6630_v35  }
0x3c81   :  { %4947 = vmax.xlane.f32.xlu0 %v4946_v47 }
0x3ce0   :  { %v5095_v4 = vpop.permute.xlu1 %5094 }
0x3ce1   :  { %v5098_v32 = vpop.permute.xlu0 %5097  ;;  %v5108_v50 = vrot.slane %v5095_v4, %v7204_v34 }
0x3ce2   :  { %v5112_v25 = vrot.slane %v5098_v32, %v7200_v33 }
0x3ce4   :  { %v5101_v17 = vpop.permute.xlu1 %5100  ;;  %v5113_v58 = vsel %vm584_vm3, %v5112_v25, %v5108_v50 }
0x3ce5   :  { %v5117_v28 = vrot.slane %v5101_v17, %v7204_v34  ;;  %v8438_v17 = vsub.f32 %v8258_v15, %v8270_v40 }
0x3ce8   :  { %v5104_v39 = vpop.permute.xlu1 %5103 }
0x3ce9   :  { %v5121_v59 = vrot.slane %v5104_v39, %v7200_v33  ;;  %v8673_v39 = vld [vmem:[#allocation23_spill] sm:$0xff] }
0x3ceb   :  { %v5122_v44 = vsel %vm584_vm3, %v5121_v59, %v5117_v28  ;;  %v8674_v28 = vld [vmem:[#allocation22_spill] sm:$0xff] }
0x3cec   :  { %v5123_v6 = vsel %vm595_vm4, %v5122_v44, %v5113_v58  ;;  %v8443_v59 = vsub.f32 %v8674_v28, %v8673_v39  ;;  %v4456_v58 = vmul.f32 1.442695, %v8438_v17 }
0x3ced   :  { %v5125_v2 = vsel %vm598_vm5, %v5123_v6, 0.0  ;;  %vm5736_vm5 = vcmask 868112  }
0x3cee   :  { %5126 = vadd.xlane.f32.xlu1 %v5125_v2  ;;  %v998_v2 = vmul.f32 1.442695, %v8443_v59 }
0x3d0e   :  { %v8396_v14 = vpop.xlane.xlu0 %4947 }
0x3d0f   :  { %vm4958_vm9 = vcmp.ge.f32.partialorder %v8384_v20, %v8396_v14 }
0x3d10   :  { %v4959_v45 = vsel %vm4958_vm9, %v7196_v24, 16 }
0x3d11   :  { %v4960_v34 = vsel %vm993_vm8, %v4959_v45, 2147483647 }
0x3d12   :  { %v4962_v27 = vshra.s32 %v4960_v34, 16 }
0x3d14   :  { %v4964_v33 = vcvt.s32.f32 %v4962_v27 }
0x3d16   :  { %4965 = vmin.xlane.f32.xlu0 %v4964_v33 }
0x3d7b   :  { %v5127_v8 = vpop.xlane.xlu1 %5126 }
0x3d7c   :  { %v5132_v42 = vrot.slane %v5127_v8, %v7142_v57  ;;  %v5136_v56 = vrot.slane %v5127_v8, %v7221_v52  ;;  %v8663_v57 = vld [vmem:[#allocation25_spill] sm:$0xff]  ;;  %v8664_v52 = vld [vmem:[#allocation24_spill] sm:$0xff] }
0x3d7d   :  { %v8410_v38 = vsub.f32 %v8664_v52, %v8663_v57 }
0x3d7e   :  { %6631 = vrcp.f32 %v5132_v42 }
0x3d7f   :  { %6633 = vrcp.f32 %v5136_v56  ;;  %v1492_v12 = vmul.f32 1.442695, %v8410_v38 }
0x3d81   :  { %6635 = vpow2.f32 %v1492_v12 }
0x3d82   :  { %6637 = vpow2.f32 %v1986_v53 }
0x3d83   :  { %6639 = vpow2.f32 %v2480_v62 }
0x3d88   :  { %v6632_v41 = vpop.eup %6631 }
0x3d89   :  { %v5141_v37 = vmul.f32 %v6632_v41, %v6626_v61  ;;  %v5140_v55 = vmul.f32 %v6632_v41, %v6624_v36  ;;  %v6634_v11 = vpop.eup %6633  ;;  %v2974_v36 = vmul.f32 1.442695, %v8427_v48  ;;  %v8671_v61 = vld [vmem:[#allocation46_spill] sm:$0xff]  ;;  %v5731_v41 = vadd.s32 4294967198, %v7196_v24 }
0x3d8a   :  { %v5143_v0 = vmul.f32 %v6634_v11, %v6628_v16  ;;  %v5144_v21 = vmul.f32 %v6634_v11, %v6630_v35  ;;  %v8672_v16 = vld [vmem:[#allocation45_spill] sm:$0xff] }
0x3d8b   :  { %5152 = vperm.xlu1 %6378, %v5141_v37   ;;  %5147 = vperm.xlu0 %6377, %v5140_v55   ;;  %v8433_v35 = vsub.f32 %v8672_v16, %v8671_v61  ;;  %v6636_v4 = vpop.eup %6635  ;;  %6641 = vpow2.f32 %v2974_v36  ;;  %v5726_v37 = vadd.s32 4294967206, %v7196_v24  ;;  %v5734_v55 = vsub.s32 %v5731_v41, %v7028_v7 }
0x3d8c   :  { %v1494_v25 = vsel %vm993_vm8, %v6636_v4, 0.0  ;;  %v6638_v50 = vpop.eup %6637 }
0x3d8d   :  { %v3468_v32 = vmul.f32 1.442695, %v8433_v35  ;;  %v1988_v44 = vsel %vm993_vm8, %v6638_v50, 0.0  ;;  %v6640_v6 = vpop.eup %6639  ;;  %v5729_v11 = vsub.s32 %v5726_v37, %v7028_v7 }
0x3d8e   :  { %v2482_v15 = vsel %vm993_vm8, %v6640_v6, 0.0 }
0x3d8f   :  { %5157 = vperm.xlu1 %6378, %v5143_v0   ;;  %5162 = vperm.xlu0 %6377, %v5144_v21   ;;  %6643 = vpow2.f32 %v3468_v32 }
0x3d90   :  { %6645 = vpow2.f32 %v4456_v58 }
0x3d91   :  { %6647 = vpow2.f32 %v998_v2 }
0x3d93   :  { %5336 = vrot.lane.b32.xlu0 %v8350_v43, %s6875_s1 }
0x3d95   :  { %v6642_v40 = vpop.eup %6641 }
0x3d96   :  { %v2976_v45 = vsel %vm993_vm8, %v6642_v40, 0.0 }
0x3d97   :  { %5346 = vrot.lane.b32.xlu0 %v8350_v43, %s6876_s30  ;;  %v4961_v43 = vand.u32 65535, %v4960_v34 }
0x3d99   :  { %v4963_v31 = vcvt.s32.f32 %v4961_v43  ;;  %v6644_v34 = vpop.eup %6643 }
0x3d9a   :  { %v3470_v27 = vsel %vm993_vm8, %v6644_v34, 0.0 }
0x3da3   :  { %v8422_v9 = vpop.xlane.xlu0 %4965 }
0x3da4   :  { %vm4967_vm3 = vcmp.eq.f32.partialorder %v4964_v33, %v8422_v9  ;;  %v6646_v33 = vpop.eup %6645 }
0x3da5   :  { %v4968_v47 = vsel %vm4967_vm3, %v4963_v31, inf  ;;  %v4458_v8 = vsel %vm993_vm8, %v6646_v33, 0.0  ;;  %v6648_v42 = vpop.eup %6647 }
0x3da6   :  { %v1000_v56 = vsel %vm993_vm8, %v6648_v42, 0.0 }
0x3db3   :  { %4969 = vmin.xlane.f32.xlu1 %v4968_v47 }
0x3db7   :  { %1495 = vadd.xlane.f32.xlu1 %v1494_v25 }
0x3dbb   :  { %1989 = vadd.xlane.f32.xlu1 %v1988_v44 }
0x3dbf   :  { %2483 = vadd.xlane.f32.xlu1 %v2482_v15 }
0x3dc3   :  { %2977 = vadd.xlane.f32.xlu1 %v2976_v45 }
0x3dc7   :  { %3471 = vadd.xlane.f32.xlu1 %v3470_v27 }
0x3dcb   :  { %4459 = vadd.xlane.f32.xlu1 %v4458_v8 }
0x3dcf   :  { %1001 = vadd.xlane.f32.xlu1 %v1000_v56 }
0x3e0a   :  { %v5153_v0 = vpop.permute.xlu1 %5152  ;;  %v5148_v21 = vpop.permute.xlu0 %5147 }
0x3e0b   :  { %v5166_v57 = vmul.f32 %v8289_v49, %v5153_v0  ;;  %v5165_v52 = vmul.f32 %v8295_v10, %v5148_v21  ;;  %v5735_v3 = vrot.slane %v5153_v0, %v5734_v55  ;;  %v5730_v53 = vrot.slane %v5148_v21, %v5729_v11 }
0x3e0d   :  { %v5170_v12 = vsel %vm548_vm2, %v5166_v57, 0.0  ;;  %v5169_v63 = vsel %vm209_vm1, %v5165_v52, 0.0  ;;  %v5737_v49 = vsel %vm5736_vm5, %v5735_v3, %v5730_v53  ;;  %v6698_v53 = vld [vmem:[%s8582_s10] ss:$0 sm:$0xff] }
0x3e0e   :  { %v5171_v29 = vadd.f32 %v5170_v12, %v5169_v63  ;;  %v5158_v1 = vpop.permute.xlu1 %5157  ;;  %v5163_v43 = vpop.permute.xlu0 %5162 }
0x3e0f   :  { %v5167_v62 = vmul.f32 %v8304_v22, %v5158_v1  ;;  %v5741_v26 = vrot.slane %v5158_v1, %v5729_v11  ;;  %v5168_v7 = vmul.f32 %v8310_v13, %v5163_v43  ;;  %v5745_v46 = vrot.slane %v5163_v43, %v5734_v55 }
0x3e10   :  { %v5172_v31 = vrot.slane %v5171_v29, 4 }
0x3e11   :  { %v5178_v10 = vsel %vm209_vm1, %v5167_v62, 0.0  ;;  %v5179_v36 = vsel %vm548_vm2, %v5168_v7, 0.0  ;;  %v5746_v61 = vsel %vm5736_vm5, %v5745_v46, %v5741_v26 }
0x3e12   :  { %v5173_v16 = vadd.f32 %v5172_v31, %v5171_v29  ;;  %v5180_v47 = vadd.f32 %v5179_v36, %v5178_v10  ;;  %v5747_v4 = vsel %vm595_vm4, %v5746_v61, %v5737_v49  ;;  %v5337_v1 = vpop.permute.xlu0 %5336  ;;  %v5364_v10 = vld [vmem:[%s8583_s11] sm:$0xff]  ;;  %v5365_v36 = vld [vmem:[%s8583_s11 + $0x8] sm:$0xff]  ;;  %v5366_v61 = vld [vmem:[%s8583_s11 + $0x10] sm:$0xff] }
0x3e13   :  { %v5765_v32 = vsel %vm5764_vm10, %v8319_v5, %v5747_v4  ;;  %v4972_v5 = vcvt.f32.s32 %v8422_v9 }
0x3e14   :  { %v5174_v22 = vrot.slane %v5173_v16, 2  ;;  %v5181_v25 = vrot.slane %v5180_v47, 4  ;;  %5767 = vst.msk [vmem:[#allocation12] sm:$0x3] %vm5766_vm11, %v5765_v32 }
0x3e15   :  { %v4973_v45 = vshll.u32 %v4972_v5, 16 }
0x3e16   :  { %v5175_v13 = vadd.f32 %v5174_v22, %v5173_v16  ;;  %v5182_v50 = vadd.f32 %v5181_v25, %v5180_v47  ;;  %v5347_v7 = vpop.permute.xlu0 %5346  ;;  %v6350_v16 = vpack.c.bf16 %v5365_v36, %v5364_v10  ;;  %v5367_v47 = vld [vmem:[%s8583_s11 + $0x18] sm:$0xff] }
0x3e17   :  { %v6353_v4 = vpack.c.bf16 %v5367_v47, %v5366_v61 }
0x3e18   :  { %v5183_v39 = vrot.slane %v5182_v50, 2  ;;  %v5176_v28 = vrot.slane %v5175_v13, 1 }
0x3e1a   :  { %v5184_v58 = vadd.f32 %v5183_v39, %v5182_v50  ;;  %v5177_v6 = vadd.f32 %v5176_v28, %v5175_v13 }
0x3e1c   :  { %v5185_v44 = vrot.slane %v5184_v58, 1 }
0x3e1e   :  { %v5186_v2 = vadd.f32 %v5185_v44, %v5184_v58  ;;  %v5871_v44 = vld [vmem:[%s8584_s12] ss:$0 sm:$0xff]  ;;  %s6880_s12 = smov 80  }
0x3e20   :  { %v5189_v15 = vsel %vm595_vm4, %v5186_v2, %v5177_v6 }
0x3e21   :  { %6153 = vmatmul.mubr.msk.f32.vlgmr.msra.gmra.mrb[30].mxu0 %vm209_vm1, %v5189_v15 }
0x3e22   :  { %6170 = vmatprep.mubr.msk.f32.mxu0 %vm6870_vm0, %v8627_v51  ;;  %6351 = vmatpush3.bf16.msra.mxu0 %v6350_v16 }
0x3e23   :  { %6352 = vmatprep.subr.bf16.mxu0 %v8628_v30  ;;  %v3961_v30 = vsub.f32 %v8084_v18, %v8096_v54 }
0x3e25   :  { %v3962_v58 = vmul.f32 1.442695, %v3961_v30 }
0x3e26   :  { %6354 = vmatpush3.bf16.msra.mxu0 %v6353_v4 }
0x3e40   :  { %v4970_v40 = vpop.xlane.xlu1 %4969 }
0x3e41   :  { %v4971_v34 = vcvt.f32.s32 %v4970_v40 }
0x3e43   :  { %v4974_v27 = vadd.s32 %v4973_v45, %v4971_v34  ;;  %v8513_v45 = vsub.f32 %v8384_v20, %v8396_v14 }
0x3e44   :  { %v1496_v33 = vpop.xlane.xlu1 %1495 }
0x3e45   :  { %vm4975_vm12 = vcmp.eq.s32.totalorder %v7196_v24, %v4974_v27  ;;  %6649 = vlog2.f32 %v1496_v33  ;;  %v4950_v34 = vmul.f32 1.442695, %v8513_v45 }
0x3e46   :  { %v5867_v8 = vsel %vm4975_vm12, 1.0, %v8627_v51 }
0x3e47   :  { %6160 = vmatmul.mubr.msk.f32.vlgmr.msra.gmra.mrb[32].mxu1 %vm804_vm7, %v5867_v8 }
0x3e48   :  { %v8475_v42 = vpop.xlane.xlu1 %1989 }
0x3e4c   :  { %v2484_v56 = vpop.xlane.xlu1 %2483 }
0x3e4d   :  { %6651 = vlog2.f32 %v2484_v56 }
0x3e4f   :  { %v6650_v41 = vpop.eup %6649 }
0x3e50   :  { %v1498_v37 = vmul.f32 0.6931472, %v6650_v41  ;;  %v2978_v55 = vpop.xlane.xlu1 %2977 }
0x3e51   :  { %6653 = vlog2.f32 %v2978_v55 }
0x3e52   :  { %v1499_v9 = vsub.f32 %v8410_v38, %v1498_v37 }
0x3e54   :  { %5463 = vrot.lane.b32.xlu1 %v1499_v9, %s6878_s0  ;;  %v3472_v9 = vpop.xlane.xlu1 %3471 }
0x3e57   :  { %v6652_v11 = vpop.eup %6651 }
0x3e58   :  { %v2486_v24 = vmul.f32 0.6931472, %v6652_v11  ;;  %v4460_v11 = vpop.xlane.xlu1 %4459 }
0x3e5a   :  { %v2487_v0 = vsub.f32 %v8420_v23, %v2486_v24 }
0x3e5b   :  { %v6654_v51 = vpop.eup %6653 }
0x3e5c   :  { %v2980_v21 = vmul.f32 0.6931472, %v6654_v51  ;;  %5471 = vrot.lane.b32.xlu1 %v2487_v0, %s6879_s28 }
0x3e5e   :  { %v2981_v57 = vsub.f32 %v8427_v48, %v2980_v21 }
0x3e60   :  { %5475 = vrot.lane.b32.xlu1 %v2981_v57, %s6877_s24 }
0x3ef4   :  { %v5258_v52 = vpop.f32.mrb[30].mxu0 }
0x3ef5   :  { %v6154_v12 = vpop.f32.mrb[31].mxu0 }
0x3f1a   :  { %v5331_v3 = vpop.f32.mrb[32].mxu1 }
0x3f1b   :  { %v5332_v63 = vadd.f32 %v5331_v3, %v5258_v52  ;;  %v6161_v38 = vpop.f32.mrb[33].mxu1 }
0x3f1d   :  { %v5335_v29 = vadd.f32 %v6698_v53, %v5332_v63 }
0x3f1f   :  { %v5339_v23 = vadd.f32 %v5337_v1, %v5335_v29 }
0x3f21   :  { %v5870_v43 = vmul.f32 -1.442695, %v5339_v23 }
0x3f23   :  { %6655 = vpow2.f32 %v5870_v43 }
0x3f2d   :  { %v6656_v62 = vpop.eup %6655 }
0x3f2e   :  { %v5343_v26 = vadd.f32 1.0, %v6656_v62 }
0x3f30   :  { %6657 = vrcp.f32 %v5343_v26 }
0x3f3a   :  { %v6658_v48 = vpop.eup %6657 }
0x3f3b   :  { %v5349_v46 = vmul.f32 %v6658_v48, %v5347_v7  ;;  %v5356_v22 = vsub.f32 1.0, %v6658_v48  ;;  %v5362_v13 = vmul.f32 %v6658_v48, %v8341_v60 }
0x3f3d   :  { %5351 = vrot.lane.b32.xlu0 %v5349_v46, %s6877_s24 }
0x3faf   :  { %v5352_v31 = vpop.permute.xlu0 %5351 }
0x3fb0   :  { %v5354_v49 = vadd.f32 %v5352_v31, %v5335_v29 }
0x3fb2   :  { %6659 = vtanh.f32 %v5354_v49 }
0x3fb3   :  { %6661 = vpow2.f32 %v3962_v58 }
0x3fbc   :  { %v6660_v32 = vpop.eup %6659 }
0x3fbd   :  { %5358 = vrot.lane.b32.xlu0 %v6660_v32, %s6875_s1  ;;  %v6662_v5 = vpop.eup %6661 }
0x3fbe   :  { %v3964_v40 = vsel %vm993_vm8, %v6662_v5, 0.0 }
0x402f   :  { %v5359_v25 = vpop.permute.xlu0 %5358 }
0x4030   :  { %v5361_v50 = vmul.f32 %v5359_v25, %v5356_v22 }
0x4032   :  { %v5363_v39 = vadd.f32 %v5362_v13, %v5361_v50 }
0x4034   :  { %5376 = vrot.lane.b32.xlu0 %v5363_v39, %s6875_s1 }
0x40a6   :  { %v5377_v28 = vpop.permute.xlu0 %5376 }
0x40a7   :  { %5769 = vst.msk [vmem:[#allocation14] sm:$0x3] %vm548_vm2, %v5377_v28  ;;  %6171 = vmatmul.mubr.msk.f32.vlgmr.msra.gmra.mrb[32].mxu0 %vm209_vm1, %v5377_v28 }
0x417a   :  { %v5446_v6 = vpop.f32.mrb[32].mxu0 }
0x417b   :  { %v5447_v60 = vadd.f32 %v5871_v44, %v5446_v6  ;;  %v6172_v2 = vpop.f32.mrb[33].mxu0 }
0x417d   :  { %v5450_v15 = vsel %vm993_vm8, %v5447_v60, -inf }
0x417e   :  { %5451 = vmax.xlane.f32.xlu0 %v5450_v15 }
0x4182   :  { %3965 = vadd.xlane.f32.xlu0 %v3964_v40 }
0x420b   :  { %v5452_v18 = vpop.xlane.xlu0 %5451 }
0x420c   :  { %v8515_v54 = vsub.f32 %v5447_v60, %v5452_v18 }
0x420e   :  { %v5454_v27 = vmul.f32 1.442695, %v8515_v54 }
0x420f   :  { %v3966_v33 = vpop.xlane.xlu0 %3965 }
0x4210   :  { %6663 = vpow2.f32 %v5454_v27 }
0x4211   :  { %6665 = vlog2.f32 %v3966_v33 }
0x4212   :  { %6667 = vpow2.f32 %v4950_v34 }
0x4213   :  { %6669 = vlog2.f32 %v8475_v42 }
0x4214   :  { %6671 = vlog2.f32 %v3472_v9 }
0x4215   :  { %6673 = vlog2.f32 %v4460_v11 }
0x421a   :  { %v6664_v8 = vpop.eup %6663 }
0x421b   :  { %v6666_v56 = vpop.eup %6665  ;;  %v5456_v41 = vsel %vm993_vm8, %v6664_v8, 0.0 }
0x421c   :  { %v6668_v37 = vpop.eup %6667  ;;  %v3968_v55 = vmul.f32 0.6931472, %v6666_v56  ;;  %5457 = vadd.xlane.f32.xlu0 %v5456_v41 }
0x421d   :  { %v4952_v14 = vsel %vm993_vm8, %v6668_v37, 0.0  ;;  %v6670_v24 = vpop.eup %6669 }
0x421e   :  { %v3969_v20 = vsub.f32 %v3961_v30, %v3968_v55  ;;  %v1992_v0 = vmul.f32 0.6931472, %v6670_v24  ;;  %v6672_v51 = vpop.eup %6671 }
0x421f   :  { %v3474_v57 = vmul.f32 0.6931472, %v6672_v51  ;;  %v6674_v52 = vpop.eup %6673 }
0x4220   :  { %5483 = vrot.lane.b32.xlu1 %v3969_v20, %s6875_s1  ;;  %4953 = vadd.xlane.f32.xlu0 %v4952_v14  ;;  %v1993_v21 = vsub.f32 %v8415_v19, %v1992_v0  ;;  %v4462_v3 = vmul.f32 0.6931472, %v6674_v52  ;;  %s6881_s1 = smov 112  }
0x4221   :  { %v3475_v12 = vsub.f32 %v8433_v35, %v3474_v57 }
0x4222   :  { %v4463_v63 = vsub.f32 %v8438_v17, %v4462_v3 }
0x4236   :  { %5467 = vrot.lane.b32.xlu0 %v1993_v21, %s6876_s30 }
0x423a   :  { %5479 = vrot.lane.b32.xlu0 %v3475_v12, %s6880_s12 }
0x423e   :  { %5487 = vrot.lane.b32.xlu0 %v4463_v63, %s6881_s1 }
0x42a9   :  { %v5458_v42 = vpop.xlane.xlu0 %5457 }
0x42aa   :  { %6675 = vlog2.f32 %v5458_v42 }
0x42ab   :  { %6798 = shalt.err (!%p6795_p8)
}
0x42ac   :  { %s6799_s25 = scalar_lea.hbm %s8586_s14, 32 }
0x42ad   :  { %p6800_p9 = scmp.ne.s32.totalorder %s8586_s14, %s6799_s25  ;;  %p6803_p10 = scmp.lt.u32.totalorder %s6799_s25, %s8586_s14 }
0x42af   :  { %p6805_p11 = pnand %p6803_p10, %p6800_p9 }
0x42b1   :  { %6808 = shalt.err (!%p6805_p11)
}
0x42b2   :  { %5789 = dma.vmem_to_hbm [thread:$0]  %s5787_s8, 32, %s8586_s14, [#allocation13]  }
0x42b3   :  { %s6883_s28 = smov [#allocation14]  }
0x42b4   :  { %v6676_v19 = vpop.eup %6675  ;;  %s5796_s5 = sshll.u32 %s6883_s28, 4  ;;  %s5797_s5 = int_to_ptr.vmem [resolvable:$true] %s5796_s5 }
0x42b5   :  { %v5460_v35 = vmul.f32 0.6931472, %v6676_v19  ;;  %s6809_s21 = scalar_lea.vmem %s5797_s5, 32  ;;  %p6814_p13 = scmp.lt.s32.totalorder %s5797_s5, %s5797_s5 }
0x42b6   :  { %p6810_p12 = scmp.ne.s32.totalorder %s5797_s5, %s6809_s21  ;;  %p6815_p0 = scmp.lt.s32.totalorder %s6809_s21, %s6809_s21 }
0x42b8   :  { %p6816_p1 = por %p6815_p0, %p6814_p13 }
0x42ba   :  { %p6817_p2 = pnand %p6816_p1, %p6810_p12 }
0x42bc   :  { %6820 = shalt.err (!%p6817_p2)
}
0x42bd   :  { %s6821_s10 = scalar_lea.hbm %s8587_s15, 32 }
0x42be   :  { %p6822_p3 = scmp.ne.s32.totalorder %s8587_s15, %s6821_s10  ;;  %p6825_p4 = scmp.lt.u32.totalorder %s6821_s10, %s8587_s15 }
0x42c0   :  { %p6827_p5 = pnand %p6825_p4, %p6822_p3 }
0x42c2   :  { %6830 = shalt.err (!%p6827_p5)
}
0x42c3   :  { %5799 = dma.vmem_to_hbm [thread:$0]  %s5797_s5, 32, %s8587_s15, [#allocation13]   ;;  %v5461_v17 = vsub.f32 %v8515_v54, %v5460_v35  ;;  %v1002_v38 = vpop.xlane.xlu1 %1001  ;;  %v4954_v29 = vpop.xlane.xlu0 %4953  ;;  %vm5496_vm0 = vcmask 392192   ;;  %vm5498_vm2 = vcmask 523264   ;;  %vm5502_vm4 = vcmask 785408   ;;  %v8675_v39 = vld [vmem:[#allocation20_spill] sm:$0xff] }
0x42c4   :  { %6677 = vlog2.f32 %v1002_v38  ;;  %vm5504_vm8 = vcmask 916480   ;;  %vm5518_vm13 = vcmask 1041408   ;;  %vm5519_vm14 = vcmask 257026   ;;  %s6884_s15 = smov [#allocation11]  }
0x42c5   :  { %5491 = vrot.lane.b32.xlu1 %v5461_v17, %s6878_s0  ;;  %6679 = vlog2.f32 %v4954_v29  ;;  %s5776_s0 = sshll.u32 %s6884_s15, 4  ;;  %s5777_s0 = int_to_ptr.vmem [resolvable:$true] %s5776_s0 }
0x42c6   :  { %s6831_s11 = scalar_lea.vmem %s5777_s0, 64  ;;  %p6836_p7 = scmp.lt.s32.totalorder %s5777_s0, %s5777_s0 }
0x42c7   :  { %v5464_v23 = vpop.permute.xlu1 %5463  ;;  %v5468_v62 = vpop.permute.xlu0 %5467  ;;  %p6832_p6 = scmp.ne.s32.totalorder %s5777_s0, %s6831_s11  ;;  %p6837_p8 = scmp.lt.s32.totalorder %s6831_s11, %s6831_s11 }
0x42c9   :  { %p6838_p9 = por %p6837_p8, %p6836_p7 }
0x42cb   :  { %v5472_v26 = vpop.permute.xlu1 %5471  ;;  %v5480_v10 = vpop.permute.xlu0 %5479  ;;  %p6839_p10 = pnand %p6838_p9, %p6832_p6 }
0x42ce   :  { %v6678_v53 = vpop.eup %6677 }
0x42cf   :  { %v1004_v1 = vmul.f32 0.6931472, %v6678_v53  ;;  %v6680_v31 = vpop.eup %6679  ;;  %v5476_v49 = vpop.permute.xlu1 %5475 }
0x42d0   :  { %v4956_v61 = vmul.f32 0.6931472, %v6680_v31 }
0x42d1   :  { %v1005_v43 = vsub.f32 %v8443_v59, %v1004_v1  ;;  %v5488_v59 = vpop.permute.xlu0 %5487 }
0x42d2   :  { %v4957_v4 = vsub.f32 %v8513_v45, %v4956_v61 }
0x42d3   :  { %v5494_v48 = vsel %vm804_vm7, %v1005_v43, %v5464_v23  ;;  %v5484_v16 = vpop.permute.xlu1 %5483 }
0x42d4   :  { %v5495_v7 = vsel %vm209_vm1, %v5494_v48, %v5468_v62  ;;  %vm5520_vm1 = vmor %vm5519_vm14, %vm5518_vm13 }
0x42d5   :  { %v5497_v46 = vsel %vm5496_vm0, %v5495_v7, %v5472_v26 }
0x42d6   :  { %v5499_v36 = vsel %vm5498_vm2, %v5497_v46, %v5476_v49 }
0x42d7   :  { %v5501_v47 = vsel %vm5500_vm15, %v5499_v36, %v5480_v10 }
0x42d8   :  { %v5503_v32 = vsel %vm5502_vm4, %v5501_v47, %v5484_v16 }
0x42d9   :  { %v5505_v25 = vsel %vm5504_vm8, %v5503_v32, %v5488_v59 }
0x4337   :  { %v5492_v22 = vpop.permute.xlu1 %5491 }
0x4338   :  { %v5506_v13 = vsel %vm804_vm7, %v4957_v4, %v5492_v22 }
0x4339   :  { %v5509_v50 = vcombine.low %v5505_v25, %v5506_v13 }
0x433b   :  { %v5516_v28 = vrot.slane %v5509_v50, %v8675_v39 }
0x433d   :  { %5521 = vst.msk [vmem:[#allocation11] sm:$0xf] %vm5520_vm1, %v5516_v28 }
0x433e   :  { %6842 = shalt.err (!%p6839_p10)
}
0x433f   :  { %s6843_s1 = scalar_lea.hbm %s8585_s13, 64 }
0x4340   :  { %p6844_p11 = scmp.ne.s32.totalorder %s8585_s13, %s6843_s1  ;;  %p6847_p12 = scmp.lt.u32.totalorder %s6843_s1, %s8585_s13 }
0x4342   :  { %p6849_p13 = pnand %p6847_p12, %p6844_p11 }
0x4344   :  { %6852 = shalt.err (!%p6849_p13)
}
0x4345   :  { %5779 = dma.vmem_to_hbm [thread:$0]  %s5777_s0, 64, %s8585_s13, [#allocation5]  }
0x4346   :  { %6859 = dma.done.wait [#allocation5], 64  }
0x4347   :  { %6860 = vsyncadd [#allocation5], 4294967232 }
0x4348   :  { %6861 = dma.done.wait [#allocation13], 64  }
0x4349   :  { %6862 = vsyncadd [#allocation13], 4294967232 }
0x434a   :  { %5809 = vsyncpa [#allocation4], 1 }
0x434b   :  { %5810 = vsyncpa [#allocation7], 1 }
0x434c   :  { %5811 = vsyncpa [#allocation10], 1 }
0x434d   :  { %5812 = vsyncpa [#allocation5], 1 }
0x434e   :  { %5813 = vsyncpa [#allocation13], 1 }

</bundles_post_ra>
